<compile_context>
chip_gen: v7x
topology: tpu7x:2x2x1
jax: 0.10.0
libtpu: 0.0.40
codegen_flags: <defaults>
</compile_context>

<pallas_src>
from functools import partial

import jax
import jax.numpy as jnp
from jax import lax
from jax.experimental import pallas as pl
from jax.experimental.pallas import tpu as pltpu

EPS = 1e-5


# ----------------------------------------------------------------------------
# Fused kernel: one grid step = one (batch element, basis) pair, whole image.
# ----------------------------------------------------------------------------
def _fused_basic_block_kernel(gate_ref, scales_ref, base_ref, mean_ref,
                              w1_ref, w2_ref, bn1s_ref, bn1b_ref,
                              bn2s_ref, bn2b_ref,
                              out_bases_ref, final_ref):
    b = pl.program_id(1)                       # basis index (inner, "arbitrary")
    _, _, H, W, C = base_ref.shape
    Cout = final_ref.shape[-1]

    g = gate_ref[0, 0]                                   # sigmoid(block_gate)
    x = g * base_ref[0, 0] + (1.0 - g) * mean_ref[0]     # (H, W, C), residual
    xq = jnp.tanh(x)                                     # quan_activations (bitA==32)

    def conv3x3_relu_bn_add(inp_hwc, wmat, bn_s, bn_b, res_flat):
        cin = inp_hwc.shape[-1]
        # In-kernel 1-pixel zero halo (replaces the old XLA-side jnp.pad).
        zc = jnp.zeros((H, 1, cin), jnp.float32)
        zr = jnp.zeros((1, W + 2, cin), jnp.float32)
        xp = jnp.concatenate(
            [zr, jnp.concatenate([zc, inp_hwc, zc], axis=1), zr], axis=0)
        # im2col: (H*W, 9*cin) patch tile -> one MXU matmul with K = 9*cin.
        cols = [xp[kh:kh + H, kw:kw + W, :]
                for kh in range(3) for kw in range(3)]
        patches = jnp.concatenate(cols, axis=-1).reshape(H * W, 9 * cin)
        acc = jnp.dot(patches, wmat, preferred_element_type=jnp.float32)
        acc = jnp.maximum(acc, 0.0)            # ReLU *before* BN, as in reference
        acc = acc * bn_s + bn_b                # folded inference-mode BatchNorm
        return acc + res_flat                  # residual add, (H*W, Cout)

    out = conv3x3_relu_bn_add(xq, w1_ref[0], bn1s_ref[0], bn1b_ref[0],
                              x.reshape(H * W, C))
    out_q = jnp.tanh(out)                      # fused intermediate quantization
    out_new = conv3x3_relu_bn_add(out_q.reshape(H, W, Cout), w2_ref[0],
                                  bn2s_ref[0], bn2b_ref[0], out)

    out_bases_ref[...] = out_new.reshape(1, 1, H, W, Cout).astype(
        out_bases_ref.dtype)

    # Scale-accumulate into the VMEM-resident `final` block (resident across
    # the basis axis; written back to HBM once per batch element).
    contrib = (scales_ref[b] * out_new).reshape(1, H, W, Cout)

    @pl.when(b == 0)
    def _():
        final_ref[...] = contrib.astype(final_ref.dtype)

    @pl.when(b > 0)
    def _():
        final_ref[...] = final_ref[...] + contrib.astype(final_ref.dtype)


# ----------------------------------------------------------------------------
# Wrapper: NCHW (PyTorch convention) in/out, single fused pallas_call inside.
# ----------------------------------------------------------------------------
@partial(jax.jit, static_argnames=("add_gate",))
def basic_block_quant_forward(params, input_bases_nchw, input_mean_nchw,
                              add_gate=True):
    to_nhwc = lambda t: jnp.transpose(t, (0, 2, 3, 1))
    to_nchw = lambda t: jnp.transpose(t, (0, 3, 1, 2))
    num_bases = len(input_bases_nchw)
    mean = to_nhwc(input_mean_nchw).astype(jnp.float32)
    N, H, W, C = mean.shape

    if add_gate:
        gate = jax.nn.sigmoid(params['block_gate']).astype(jnp.float32)
        bases = jnp.stack([to_nhwc(t).astype(jnp.float32)
                           for t in input_bases_nchw])          # (nb, N, H, W, C)
    else:
        # downsample is None: x = input_mean (pre-tanh), residual = input_mean.
        gate = jnp.float32(0.0)
        bases = jnp.broadcast_to(mean[None], (num_bases,) + mean.shape)

    gate_arr = jnp.reshape(gate, (1, 1))
    scales = jnp.stack([jnp.reshape(s, ()) for s in params['scales']]
                       ).astype(jnp.float32)                    # (nb,)

    # Pack conv weights for im2col: (3,3,Cin,Cout) -> (9*Cin, Cout), stacked
    # over bases, column order (kh, kw, ci) to match the in-kernel patches.
    w1 = jnp.stack([w.reshape(9 * C, -1) for w in params['w1_hwio']])
    Cout = w1.shape[-1]
    w2 = jnp.stack([w.reshape(9 * Cout, Cout) for w in params['w2_hwio']])
    bn1s = jnp.stack(params['bn1_scale']).reshape(num_bases, 1, Cout)
    bn1b = jnp.stack(params['bn1_shift']).reshape(num_bases, 1, Cout)
    bn2s = jnp.stack(params['bn2_scale']).reshape(num_bases, 1, Cout)
    bn2b = jnp.stack(params['bn2_shift']).reshape(num_bases, 1, Cout)

    smem = pl.BlockSpec(memory_space=pltpu.MemorySpace.SMEM)
    per_basis = lambda n, b: (b, 0, 0)

    out_bases_arr, final = pl.pallas_call(
        _fused_basic_block_kernel,
        out_shape=(
            jax.ShapeDtypeStruct((num_bases, N, H, W, Cout), jnp.float32),
            jax.ShapeDtypeStruct((N, H, W, Cout), jnp.float32),
        ),
        grid_spec=pltpu.PrefetchScalarGridSpec(
            num_scalar_prefetch=0,
            grid=(N, num_bases),            # basis axis innermost (accumulator)
            in_specs=[
                smem,                                               # gate scalar
                smem,                                               # per-basis scales
                pl.BlockSpec((1, 1, H, W, C), lambda n, b: (b, n, 0, 0, 0)),
                pl.BlockSpec((1, H, W, C), lambda n, b: (n, 0, 0, 0)),
                pl.BlockSpec((1, 9 * C, Cout), per_basis),          # w1 (im2col)
                pl.BlockSpec((1, 9 * Cout, Cout), per_basis),       # w2 (im2col)
                pl.BlockSpec((1, 1, Cout), per_basis),              # bn1 scale
                pl.BlockSpec((1, 1, Cout), per_basis),              # bn1 shift
                pl.BlockSpec((1, 1, Cout), per_basis),              # bn2 scale
                pl.BlockSpec((1, 1, Cout), per_basis),              # bn2 shift
            ],
            out_specs=(
                pl.BlockSpec((1, 1, H, W, Cout), lambda n, b: (b, n, 0, 0, 0)),
                pl.BlockSpec((1, H, W, Cout), lambda n, b: (n, 0, 0, 0)),
            ),
        ),
        compiler_params=pltpu.CompilerParams(
            dimension_semantics=("parallel", "arbitrary")),
    )(gate_arr, scales, bases, mean, w1, w2, bn1s, bn1b, bn2s, bn2b)

    output_bases = [to_nchw(out_bases_arr[i]) for i in range(num_bases)]
    return output_bases, to_nchw(final)


# ----------------------------------------------------------------------------
# Parameters (deterministic, synthetic)
# ----------------------------------------------------------------------------
def init_params(key, num_bases, inplanes, planes):
    def bn_fold(kg, kb, km, kv, c):
        gamma = jax.random.uniform(kg, (c,), jnp.float32, 0.5, 1.5)
        beta = 0.1 * jax.random.normal(kb, (c,), jnp.float32)
        rmean = 0.1 * jax.random.normal(km, (c,), jnp.float32)
        rvar = jax.random.uniform(kv, (c,), jnp.float32, 0.5, 1.5)
        scale = gamma / jnp.sqrt(rvar + EPS)
        shift = beta - rmean * scale
        return scale, shift

    params = {'w1_hwio': [], 'w2_hwio': [], 'w1_oihw': [], 'w2_oihw': [],
              'bn1_scale': [], 'bn1_shift': [], 'bn2_scale': [], 'bn2_shift': [],
              'scales': []}
    keys = jax.random.split(key, 1 + 11 * num_bases)
    params['block_gate'] = jax.random.uniform(keys[0], (), jnp.float32)
    for i in range(num_bases):
        k = keys[1 + 11 * i: 1 + 11 * (i + 1)]
        w1 = 0.1 * jax.random.normal(k[0], (planes, inplanes, 3, 3), jnp.float32)
        w2 = 0.1 * jax.random.normal(k[1], (planes, planes, 3, 3), jnp.float32)
        params['w1_oihw'].append(w1)
        params['w2_oihw'].append(w2)
        params['w1_hwio'].append(jnp.transpose(w1, (2, 3, 1, 0)))
        params['w2_hwio'].append(jnp.transpose(w2, (2, 3, 1, 0)))
        s1, b1 = bn_fold(k[2], k[3], k[4], k[5], planes)
        s2, b2 = bn_fold(k[6], k[7], k[8], k[9], planes)
        params['bn1_scale'].append(s1); params['bn1_shift'].append(b1)
        params['bn2_scale'].append(s2); params['bn2_shift'].append(b2)
        params['scales'].append(jax.random.uniform(k[10], (), jnp.float32))
    return params


# ----------------------------------------------------------------------------
# Pure-JAX reference (NCHW) for a numerical sanity check
# ----------------------------------------------------------------------------
def reference_forward(params, input_bases, input_mean):
    g = jax.nn.sigmoid(params['block_gate'])
    outs, final = [], None
    for i in range(len(input_bases)):
        x = g * input_bases[i] + (1.0 - g) * input_mean
        residual = x
        xq = jnp.tanh(x)

        def conv_bn(inp, w_oihw, sc, sh, res):
            y = lax.conv_general_dilated(
                inp, w_oihw, (1, 1), 'SAME',
                dimension_numbers=('NCHW', 'OIHW', 'NCHW'),
                precision=lax.Precision.HIGHEST)
            y = jnp.maximum(y, 0.0)
            y = y * sc.reshape(1, -1, 1, 1) + sh.reshape(1, -1, 1, 1)
            return y + res

        out = conv_bn(xq, params['w1_oihw'][i], params['bn1_scale'][i],
                      params['bn1_shift'][i], residual)
        out_new = conv_bn(jnp.tanh(out), params['w2_oihw'][i],
                          params['bn2_scale'][i], params['bn2_shift'][i], out)
        outs.append(out_new)
        contrib = params['scales'][i] * out_new
        final = contrib if final is None else final + contrib
    return outs, final


if __name__ == "__main__":
    num_bases, N, C, H, W = 2, 2, 4, 16, 16   # inplanes = planes = 4, stride = 1
    key = jax.random.PRNGKey(0)
    k_par, k_mean, *k_bases = jax.random.split(key, 2 + num_bases)

    params = init_params(k_par, num_bases, C, C)
    input_mean = jax.random.normal(k_mean, (N, C, H, W), jnp.float32)
    input_bases = [jax.random.normal(k_bases[i], (N, C, H, W), jnp.float32)
                   for i in range(num_bases)]

    output_bases, final_output = basic_block_quant_forward(
        params, input_bases, input_mean, add_gate=True)
    jax.block_until_ready(final_output)
    for ob in output_bases:
        jax.block_until_ready(ob)

    ref_bases, ref_final = reference_forward(params, input_bases, input_mean)
    max_diff = float(jnp.max(jnp.abs(final_output - ref_final)))
    for a, b in zip(output_bases, ref_bases):
        max_diff = max(max_diff, float(jnp.max(jnp.abs(a - b))))
    assert max_diff < 1e-2, f"mismatch vs reference: {max_diff}"

    print("KERNEL_OK")
</pallas_src>

<mosaic_0001>
module attributes {stable_mosaic.version = 11 : i64} {
  func.func @_fused_basic_block_kernel(%arg0: i32, %arg1: i32, %arg2: memref<1x1xf32, #tpu.memory_space<smem>>, %arg3: memref<2xf32, #tpu.memory_space<smem>>, %arg4: memref<1x1x16x16x4xf32, #tpu.memory_space<vmem>>, %arg5: memref<1x16x16x4xf32, #tpu.memory_space<vmem>>, %arg6: memref<1x36x4xf32, #tpu.memory_space<vmem>>, %arg7: memref<1x36x4xf32, #tpu.memory_space<vmem>>, %arg8: memref<1x1x4xf32, #tpu.memory_space<vmem>>, %arg9: memref<1x1x4xf32, #tpu.memory_space<vmem>>, %arg10: memref<1x1x4xf32, #tpu.memory_space<vmem>>, %arg11: memref<1x1x4xf32, #tpu.memory_space<vmem>>, %arg12: memref<1x1x16x16x4xf32, #tpu.memory_space<vmem>>, %arg13: memref<1x16x16x4xf32, #tpu.memory_space<vmem>>) attributes {dimension_semantics = [#tpu.dimension_semantics<parallel>, #tpu.dimension_semantics<arbitrary>], iteration_bounds = array<i64: 2, 2>, scalar_prefetch = 0 : i64, scratch_operands = 0 : i64, tpu.core_type = #tpu.core_type<tc>, window_params = [{transform_indices = @transform_0, window_bounds = array<i64: 1, 1>}, {transform_indices = @transform_1, window_bounds = array<i64: 2>}, {transform_indices = @transform_2, window_bounds = array<i64: 1, 1, 16, 16, 4>}, {transform_indices = @transform_3, window_bounds = array<i64: 1, 16, 16, 4>}, {transform_indices = @transform_4, window_bounds = array<i64: 1, 36, 4>}, {transform_indices = @transform_5, window_bounds = array<i64: 1, 36, 4>}, {transform_indices = @transform_6, window_bounds = array<i64: 1, 1, 4>}, {transform_indices = @transform_7, window_bounds = array<i64: 1, 1, 4>}, {transform_indices = @transform_8, window_bounds = array<i64: 1, 1, 4>}, {transform_indices = @transform_9, window_bounds = array<i64: 1, 1, 4>}, {transform_indices = @transform_10, window_bounds = array<i64: 1, 1, 16, 16, 4>}, {transform_indices = @transform_11, window_bounds = array<i64: 1, 16, 16, 4>}]} {
    %c0 = arith.constant 0 : index
    %c0_0 = arith.constant 0 : index
    %0 = memref.load %arg2[%c0, %c0_0] : memref<1x1xf32, #tpu.memory_space<smem>>
    %c0_1 = arith.constant 0 : index
    %c0_2 = arith.constant 0 : index
    %c0_3 = arith.constant 0 : index
    %c0_4 = arith.constant 0 : index
    %c0_5 = arith.constant 0 : index
    %1 = vector.load %arg4[%c0_1, %c0_2, %c0_3, %c0_4, %c0_5] : memref<1x1x16x16x4xf32, #tpu.memory_space<vmem>>, vector<1x1x16x16x4xf32>
    %2 = vector.shape_cast %1 : vector<1x1x16x16x4xf32> to vector<16x16x4xf32>
    %3 = vector.broadcast %0 : f32 to vector<16x16x4xf32>
    %4 = arith.mulf %3, %2 : vector<16x16x4xf32>
    %cst = arith.constant 1.000000e+00 : f32
    %5 = arith.subf %cst, %0 : f32
    %c0_6 = arith.constant 0 : index
    %c0_7 = arith.constant 0 : index
    %c0_8 = arith.constant 0 : index
    %c0_9 = arith.constant 0 : index
    %6 = vector.load %arg5[%c0_6, %c0_7, %c0_8, %c0_9] : memref<1x16x16x4xf32, #tpu.memory_space<vmem>>, vector<1x16x16x4xf32>
    %7 = vector.shape_cast %6 : vector<1x16x16x4xf32> to vector<16x16x4xf32>
    %8 = vector.broadcast %5 : f32 to vector<16x16x4xf32>
    %9 = arith.mulf %8, %7 : vector<16x16x4xf32>
    %10 = arith.addf %4, %9 : vector<16x16x4xf32>
    %11 = math.tanh %10 : vector<16x16x4xf32>
    %c0_10 = arith.constant 0 : index
    %c0_11 = arith.constant 0 : index
    %c0_12 = arith.constant 0 : index
    %12 = vector.load %arg6[%c0_10, %c0_11, %c0_12] : memref<1x36x4xf32, #tpu.memory_space<vmem>>, vector<1x36x4xf32>
    %13 = vector.shape_cast %12 : vector<1x36x4xf32> to vector<36x4xf32>
    %c0_13 = arith.constant 0 : index
    %c0_14 = arith.constant 0 : index
    %c0_15 = arith.constant 0 : index
    %14 = vector.load %arg8[%c0_13, %c0_14, %c0_15] : memref<1x1x4xf32, #tpu.memory_space<vmem>>, vector<1x1x4xf32>
    %15 = vector.shape_cast %14 : vector<1x1x4xf32> to vector<1x4xf32>
    %c0_16 = arith.constant 0 : index
    %c0_17 = arith.constant 0 : index
    %c0_18 = arith.constant 0 : index
    %16 = vector.load %arg9[%c0_16, %c0_17, %c0_18] : memref<1x1x4xf32, #tpu.memory_space<vmem>>, vector<1x1x4xf32>
    %17 = vector.shape_cast %16 : vector<1x1x4xf32> to vector<1x4xf32>
    %18 = vector.shape_cast %10 : vector<16x16x4xf32> to vector<256x4xf32>
    %cst_19 = arith.constant 0.000000e+00 : f32
    %19 = vector.broadcast %cst_19 : f32 to vector<16x1x4xf32>
    %cst_20 = arith.constant 0.000000e+00 : f32
    %20 = vector.broadcast %cst_20 : f32 to vector<1x18x4xf32>
    %21 = tpu.concatenate %19, %11, %19 in 1 : vector<16x1x4xf32>, vector<16x16x4xf32>, vector<16x1x4xf32> -> vector<16x18x4xf32>
    %22 = tpu.concatenate %20, %21, %20 in 0 : vector<1x18x4xf32>, vector<16x18x4xf32>, vector<1x18x4xf32> -> vector<18x18x4xf32>
    %23 = vector.extract_strided_slice %22 {offsets = [0, 0, 0], sizes = [16, 16, 4], strides = [1, 1, 1]} : vector<18x18x4xf32> to vector<16x16x4xf32>
    %24 = vector.extract_strided_slice %22 {offsets = [0, 1, 0], sizes = [16, 16, 4], strides = [1, 1, 1]} : vector<18x18x4xf32> to vector<16x16x4xf32>
    %25 = vector.extract_strided_slice %22 {offsets = [0, 2, 0], sizes = [16, 16, 4], strides = [1, 1, 1]} : vector<18x18x4xf32> to vector<16x16x4xf32>
    %26 = vector.extract_strided_slice %22 {offsets = [1, 0, 0], sizes = [16, 16, 4], strides = [1, 1, 1]} : vector<18x18x4xf32> to vector<16x16x4xf32>
    %27 = vector.extract_strided_slice %22 {offsets = [1, 1, 0], sizes = [16, 16, 4], strides = [1, 1, 1]} : vector<18x18x4xf32> to vector<16x16x4xf32>
    %28 = vector.extract_strided_slice %22 {offsets = [1, 2, 0], sizes = [16, 16, 4], strides = [1, 1, 1]} : vector<18x18x4xf32> to vector<16x16x4xf32>
    %29 = vector.extract_strided_slice %22 {offsets = [2, 0, 0], sizes = [16, 16, 4], strides = [1, 1, 1]} : vector<18x18x4xf32> to vector<16x16x4xf32>
    %30 = vector.extract_strided_slice %22 {offsets = [2, 1, 0], sizes = [16, 16, 4], strides = [1, 1, 1]} : vector<18x18x4xf32> to vector<16x16x4xf32>
    %31 = vector.extract_strided_slice %22 {offsets = [2, 2, 0], sizes = [16, 16, 4], strides = [1, 1, 1]} : vector<18x18x4xf32> to vector<16x16x4xf32>
    %32 = tpu.concatenate %23, %24, %25, %26, %27, %28, %29, %30, %31 in 2 : vector<16x16x4xf32>, vector<16x16x4xf32>, vector<16x16x4xf32>, vector<16x16x4xf32>, vector<16x16x4xf32>, vector<16x16x4xf32>, vector<16x16x4xf32>, vector<16x16x4xf32>, vector<16x16x4xf32> -> vector<16x16x36xf32>
    %33 = vector.shape_cast %32 : vector<16x16x36xf32> to vector<256x36xf32>
    %cst_21 = arith.constant dense<0.000000e+00> : vector<256x4xf32>
    %34 = tpu.matmul %33, %13, %cst_21 {dimension_numbers = #tpu.dot_dimension_numbers<[1], [0], [0], [1], [0, 0, 1, 1], [], []>} : vector<256x36xf32>, vector<36x4xf32>, vector<256x4xf32> -> vector<256x4xf32>
    %cst_22 = arith.constant 0.000000e+00 : f32
    %35 = vector.broadcast %cst_22 : f32 to vector<256x4xf32>
    %36 = arith.maximumf %34, %35 : vector<256x4xf32>
    %37 = vector.broadcast %15 : vector<1x4xf32> to vector<256x4xf32>
    %38 = arith.mulf %36, %37 : vector<256x4xf32>
    %39 = vector.broadcast %17 : vector<1x4xf32> to vector<256x4xf32>
    %40 = arith.addf %38, %39 : vector<256x4xf32>
    %41 = arith.addf %40, %18 : vector<256x4xf32>
    %42 = math.tanh %41 : vector<256x4xf32>
    %43 = vector.shape_cast %42 : vector<256x4xf32> to vector<16x16x4xf32>
    %c0_23 = arith.constant 0 : index
    %c0_24 = arith.constant 0 : index
    %c0_25 = arith.constant 0 : index
    %44 = vector.load %arg7[%c0_23, %c0_24, %c0_25] : memref<1x36x4xf32, #tpu.memory_space<vmem>>, vector<1x36x4xf32>
    %45 = vector.shape_cast %44 : vector<1x36x4xf32> to vector<36x4xf32>
    %c0_26 = arith.constant 0 : index
    %c0_27 = arith.constant 0 : index
    %c0_28 = arith.constant 0 : index
    %46 = vector.load %arg10[%c0_26, %c0_27, %c0_28] : memref<1x1x4xf32, #tpu.memory_space<vmem>>, vector<1x1x4xf32>
    %47 = vector.shape_cast %46 : vector<1x1x4xf32> to vector<1x4xf32>
    %c0_29 = arith.constant 0 : index
    %c0_30 = arith.constant 0 : index
    %c0_31 = arith.constant 0 : index
    %48 = vector.load %arg11[%c0_29, %c0_30, %c0_31] : memref<1x1x4xf32, #tpu.memory_space<vmem>>, vector<1x1x4xf32>
    %49 = vector.shape_cast %48 : vector<1x1x4xf32> to vector<1x4xf32>
    %cst_32 = arith.constant 0.000000e+00 : f32
    %50 = vector.broadcast %cst_32 : f32 to vector<16x1x4xf32>
    %cst_33 = arith.constant 0.000000e+00 : f32
    %51 = vector.broadcast %cst_33 : f32 to vector<1x18x4xf32>
    %52 = tpu.concatenate %50, %43, %50 in 1 : vector<16x1x4xf32>, vector<16x16x4xf32>, vector<16x1x4xf32> -> vector<16x18x4xf32>
    %53 = tpu.concatenate %51, %52, %51 in 0 : vector<1x18x4xf32>, vector<16x18x4xf32>, vector<1x18x4xf32> -> vector<18x18x4xf32>
    %54 = vector.extract_strided_slice %53 {offsets = [0, 0, 0], sizes = [16, 16, 4], strides = [1, 1, 1]} : vector<18x18x4xf32> to vector<16x16x4xf32>
    %55 = vector.extract_strided_slice %53 {offsets = [0, 1, 0], sizes = [16, 16, 4], strides = [1, 1, 1]} : vector<18x18x4xf32> to vector<16x16x4xf32>
    %56 = vector.extract_strided_slice %53 {offsets = [0, 2, 0], sizes = [16, 16, 4], strides = [1, 1, 1]} : vector<18x18x4xf32> to vector<16x16x4xf32>
    %57 = vector.extract_strided_slice %53 {offsets = [1, 0, 0], sizes = [16, 16, 4], strides = [1, 1, 1]} : vector<18x18x4xf32> to vector<16x16x4xf32>
    %58 = vector.extract_strided_slice %53 {offsets = [1, 1, 0], sizes = [16, 16, 4], strides = [1, 1, 1]} : vector<18x18x4xf32> to vector<16x16x4xf32>
    %59 = vector.extract_strided_slice %53 {offsets = [1, 2, 0], sizes = [16, 16, 4], strides = [1, 1, 1]} : vector<18x18x4xf32> to vector<16x16x4xf32>
    %60 = vector.extract_strided_slice %53 {offsets = [2, 0, 0], sizes = [16, 16, 4], strides = [1, 1, 1]} : vector<18x18x4xf32> to vector<16x16x4xf32>
    %61 = vector.extract_strided_slice %53 {offsets = [2, 1, 0], sizes = [16, 16, 4], strides = [1, 1, 1]} : vector<18x18x4xf32> to vector<16x16x4xf32>
    %62 = vector.extract_strided_slice %53 {offsets = [2, 2, 0], sizes = [16, 16, 4], strides = [1, 1, 1]} : vector<18x18x4xf32> to vector<16x16x4xf32>
    %63 = tpu.concatenate %54, %55, %56, %57, %58, %59, %60, %61, %62 in 2 : vector<16x16x4xf32>, vector<16x16x4xf32>, vector<16x16x4xf32>, vector<16x16x4xf32>, vector<16x16x4xf32>, vector<16x16x4xf32>, vector<16x16x4xf32>, vector<16x16x4xf32>, vector<16x16x4xf32> -> vector<16x16x36xf32>
    %64 = vector.shape_cast %63 : vector<16x16x36xf32> to vector<256x36xf32>
    %cst_34 = arith.constant dense<0.000000e+00> : vector<256x4xf32>
    %65 = tpu.matmul %64, %45, %cst_34 {dimension_numbers = #tpu.dot_dimension_numbers<[1], [0], [0], [1], [0, 0, 1, 1], [], []>} : vector<256x36xf32>, vector<36x4xf32>, vector<256x4xf32> -> vector<256x4xf32>
    %cst_35 = arith.constant 0.000000e+00 : f32
    %66 = vector.broadcast %cst_35 : f32 to vector<256x4xf32>
    %67 = arith.maximumf %65, %66 : vector<256x4xf32>
    %68 = vector.broadcast %47 : vector<1x4xf32> to vector<256x4xf32>
    %69 = arith.mulf %67, %68 : vector<256x4xf32>
    %70 = vector.broadcast %49 : vector<1x4xf32> to vector<256x4xf32>
    %71 = arith.addf %69, %70 : vector<256x4xf32>
    %72 = arith.addf %71, %41 : vector<256x4xf32>
    %73 = vector.shape_cast %72 : vector<256x4xf32> to vector<1x1x16x16x4xf32>
    %c0_36 = arith.constant 0 : index
    %c0_37 = arith.constant 0 : index
    %c0_38 = arith.constant 0 : index
    %c0_39 = arith.constant 0 : index
    %c0_40 = arith.constant 0 : index
    %74 = vector.load %arg12[%c0_36, %c0_37, %c0_38, %c0_39, %c0_40] : memref<1x1x16x16x4xf32, #tpu.memory_space<vmem>>, vector<1x1x16x16x4xf32>
    tpu.vector_store %arg12[%c0_36, %c0_37, %c0_38, %c0_39, %c0_40], %73 {strides = array<i32>} : memref<1x1x16x16x4xf32, #tpu.memory_space<vmem>>, vector<1x1x16x16x4xf32>,
    %75 = arith.index_cast %arg1 : i32 to index
    %76 = memref.load %arg3[%75] : memref<2xf32, #tpu.memory_space<smem>>
    %77 = vector.broadcast %76 : f32 to vector<256x4xf32>
    %78 = arith.mulf %77, %72 : vector<256x4xf32>
    %79 = vector.shape_cast %78 : vector<256x4xf32> to vector<1x16x16x4xf32>
    %c0_i32 = arith.constant 0 : i32
    %80 = arith.cmpi eq, %arg1, %c0_i32 : i32
    %81 = arith.extui %80 : i1 to i32
    %c0_i32_41 = arith.constant 0 : i32
    %82 = arith.cmpi ne, %81, %c0_i32_41 : i32
    scf.if %82 {
      %c0_44 = arith.constant 0 : index
      %c0_45 = arith.constant 0 : index
      %c0_46 = arith.constant 0 : index
      %c0_47 = arith.constant 0 : index
      %86 = vector.load %arg13[%c0_44, %c0_45, %c0_46, %c0_47] : memref<1x16x16x4xf32, #tpu.memory_space<vmem>>, vector<1x16x16x4xf32>
      tpu.vector_store %arg13[%c0_44, %c0_45, %c0_46, %c0_47], %79 {strides = array<i32>} : memref<1x16x16x4xf32, #tpu.memory_space<vmem>>, vector<1x16x16x4xf32>,
    } else {
    }
    %c0_i32_42 = arith.constant 0 : i32
    %83 = arith.cmpi sgt, %arg1, %c0_i32_42 : i32
    %84 = arith.extui %83 : i1 to i32
    %c0_i32_43 = arith.constant 0 : i32
    %85 = arith.cmpi ne, %84, %c0_i32_43 : i32
    scf.if %85 {
      %c0_44 = arith.constant 0 : index
      %c0_45 = arith.constant 0 : index
      %c0_46 = arith.constant 0 : index
      %c0_47 = arith.constant 0 : index
      %86 = vector.load %arg13[%c0_44, %c0_45, %c0_46, %c0_47] : memref<1x16x16x4xf32, #tpu.memory_space<vmem>>, vector<1x16x16x4xf32>
      %87 = arith.addf %86, %79 : vector<1x16x16x4xf32>
      %c0_48 = arith.constant 0 : index
      %c0_49 = arith.constant 0 : index
      %c0_50 = arith.constant 0 : index
      %c0_51 = arith.constant 0 : index
      %88 = vector.load %arg13[%c0_48, %c0_49, %c0_50, %c0_51] : memref<1x16x16x4xf32, #tpu.memory_space<vmem>>, vector<1x16x16x4xf32>
      tpu.vector_store %arg13[%c0_48, %c0_49, %c0_50, %c0_51], %87 {strides = array<i32>} : memref<1x16x16x4xf32, #tpu.memory_space<vmem>>, vector<1x16x16x4xf32>,
    } else {
    }
    return
  }
  func.func @transform_0(%arg0: i32, %arg1: i32) -> (i32, i32) {
    %c0_i32 = arith.constant 0 : i32
    %c0_i32_0 = arith.constant 0 : i32
    %c0_i32_1 = arith.constant 0 : i32
    return %c0_i32, %c0_i32_0 : i32, i32
  }
  func.func @transform_1(%arg0: i32, %arg1: i32) -> i32 {
    %c0_i32 = arith.constant 0 : i32
    %c0_i32_0 = arith.constant 0 : i32
    return %c0_i32 : i32
  }
  func.func @transform_2(%arg0: i32, %arg1: i32) -> (i32, i32, i32, i32, i32) {
    %c0_i32 = arith.constant 0 : i32
    %c0_i32_0 = arith.constant 0 : i32
    %c0_i32_1 = arith.constant 0 : i32
    %c0_i32_2 = arith.constant 0 : i32
    return %arg1, %arg0, %c0_i32, %c0_i32_0, %c0_i32_1 : i32, i32, i32, i32, i32
  }
  func.func @transform_3(%arg0: i32, %arg1: i32) -> (i32, i32, i32, i32) {
    %c0_i32 = arith.constant 0 : i32
    %c0_i32_0 = arith.constant 0 : i32
    %c0_i32_1 = arith.constant 0 : i32
    %c0_i32_2 = arith.constant 0 : i32
    return %arg0, %c0_i32, %c0_i32_0, %c0_i32_1 : i32, i32, i32, i32
  }
  func.func @transform_4(%arg0: i32, %arg1: i32) -> (i32, i32, i32) {
    %c0_i32 = arith.constant 0 : i32
    %c0_i32_0 = arith.constant 0 : i32
    %c0_i32_1 = arith.constant 0 : i32
    return %arg1, %c0_i32, %c0_i32_0 : i32, i32, i32
  }
  func.func @transform_5(%arg0: i32, %arg1: i32) -> (i32, i32, i32) {
    %c0_i32 = arith.constant 0 : i32
    %c0_i32_0 = arith.constant 0 : i32
    %c0_i32_1 = arith.constant 0 : i32
    return %arg1, %c0_i32, %c0_i32_0 : i32, i32, i32
  }
  func.func @transform_6(%arg0: i32, %arg1: i32) -> (i32, i32, i32) {
    %c0_i32 = arith.constant 0 : i32
    %c0_i32_0 = arith.constant 0 : i32
    %c0_i32_1 = arith.constant 0 : i32
    return %arg1, %c0_i32, %c0_i32_0 : i32, i32, i32
  }
  func.func @transform_7(%arg0: i32, %arg1: i32) -> (i32, i32, i32) {
    %c0_i32 = arith.constant 0 : i32
    %c0_i32_0 = arith.constant 0 : i32
    %c0_i32_1 = arith.constant 0 : i32
    return %arg1, %c0_i32, %c0_i32_0 : i32, i32, i32
  }
  func.func @transform_8(%arg0: i32, %arg1: i32) -> (i32, i32, i32) {
    %c0_i32 = arith.constant 0 : i32
    %c0_i32_0 = arith.constant 0 : i32
    %c0_i32_1 = arith.constant 0 : i32
    return %arg1, %c0_i32, %c0_i32_0 : i32, i32, i32
  }
  func.func @transform_9(%arg0: i32, %arg1: i32) -> (i32, i32, i32) {
    %c0_i32 = arith.constant 0 : i32
    %c0_i32_0 = arith.constant 0 : i32
    %c0_i32_1 = arith.constant 0 : i32
    return %arg1, %c0_i32, %c0_i32_0 : i32, i32, i32
  }
  func.func @transform_10(%arg0: i32, %arg1: i32) -> (i32, i32, i32, i32, i32) {
    %c0_i32 = arith.constant 0 : i32
    %c0_i32_0 = arith.constant 0 : i32
    %c0_i32_1 = arith.constant 0 : i32
    %c0_i32_2 = arith.constant 0 : i32
    return %arg1, %arg0, %c0_i32, %c0_i32_0, %c0_i32_1 : i32, i32, i32, i32, i32
  }
  func.func @transform_11(%arg0: i32, %arg1: i32) -> (i32, i32, i32, i32) {
    %c0_i32 = arith.constant 0 : i32
    %c0_i32_0 = arith.constant 0 : i32
    %c0_i32_1 = arith.constant 0 : i32
    %c0_i32_2 = arith.constant 0 : i32
    return %arg0, %c0_i32, %c0_i32_0, %c0_i32_1 : i32, i32, i32, i32
  }
}

</mosaic_0001>

<bundles_post_ra>
// kernel: basic_block_quant_forward.1
= control target key start
LH: loop header
LB: loop body
LE: loop exit
PB: predicated region body
PF: predicated region fallthrough
CT: control target
= control target key end

     0   :  { %s9816_s0 = inlined_call_operand.<no memory space> [shape: f32[1,1], index: 0, kind: input, shape index: {}]   ;;  %s9817_s1 = inlined_call_operand.vmem [shape: f32[2], index: 1, kind: input, shape index: {}]   ;;  %s9818_s2 = inlined_call_operand.vmem [shape: f32[2,2,16,16,4], index: 2, kind: input, shape index: {}]   ;;  %s9819_s3 = inlined_call_operand.vmem [shape: f32[2,16,16,4], index: 3, kind: input, shape index: {}]   ;;  %s9820_s4 = inlined_call_operand.vmem [shape: f32[2,36,4], index: 4, kind: input, shape index: {}]   ;;  %s9821_s5 = inlined_call_operand.vmem [shape: f32[2,36,4], index: 5, kind: input, shape index: {}]   ;;  %s9822_s6 = inlined_call_operand.vmem [shape: f32[2,1,4], index: 6, kind: input, shape index: {}]   ;;  %s9823_s7 = inlined_call_operand.vmem [shape: f32[2,1,4], index: 7, kind: input, shape index: {}]   ;;  %s9824_s8 = inlined_call_operand.vmem [shape: f32[2,1,4], index: 8, kind: input, shape index: {}]   ;;  %s9825_s9 = inlined_call_operand.vmem [shape: f32[2,1,4], index: 9, kind: input, shape index: {}]   ;;  %s9826_s10 = inlined_call_operand.vmem [shape: f32[2,2,16,16,4], index: 10, kind: output, shape index: {0}]   ;;  %s9827_s11 = inlined_call_operand.vmem [shape: f32[2,16,16,4], index: 11, kind: output, shape index: {1}]  }
   0x1   :  { %17 = sst [smem:[#allocation2]] %s9816_s0 }
   0x2   :  { %18 = vsyncpa [#allocation4], 0  ;;  %s5493_s19 = smov 0   ;;  %s5495_s20 = smov 0  }
   0x3   :  { %s5497_s21 = smov 0   ;;  %s5499_s22 = smov 0  }
   0x4   :  { %s5501_s23 = smov 0  }
   0x5 LB: > { %s4869_s0 = sadd.s32 4294967295, %s5418_s23   ;;  %s33_s24 = sadd.s32 1, %s5410_s21  ;;  %s5418_s23 = sphi %s5501_s23, %s24_s23   ;;  %s5414_s22 = sphi %s5499_s22, %s10903_s22   ;;  %s5410_s21 = sphi %s5497_s21, %s10902_s21   ;;  %s5406_s20 = sphi %s5495_s20, %s10901_s20   ;;  %s5402_s19 = sphi %s5493_s19, %s10900_s19  }
   0x6   : > { %p34_p0 = scmp.ge.s32.totalorder %s33_s24, 2  ;;  %s36_s25 = sadd.s32 1, %s5414_s22 }
   0x7   : > { %p4871_p1 = scmp.ge.s32.totalorder %s5418_s23, 1  ;;  %p347_p2 = scmp.lt.s32.totalorder %s5418_s23, 5 }
   0x8   : > { %s10905_s24 = smov (%p34_p0, %s33_s24), 0  ;;  %s10907_s25 = smov (!%p34_p0, %s36_s25), %s5414_s22 }
   0x9   : > { %p5526_p3 = pnand %p4871_p1, %p347_p2  ;;  %p38_p4 = scmp.ge.s32.totalorder %s10907_s25, 2 }
   0xa   : > { %p5530_p5 = scmp.eq.s32.totalorder %s4869_s0, 0  ;;  %s363_s30 = sshll.u32 %s9817_s1, 4  ;;  %s364_s30 = int_to_ptr.vmem [resolvable:$true] %s363_s30 }
   0xb   : > { %p5175_p6 = pneg %p5526_p3  ;;  %s10909_s25 = smov (%p38_p4, %s10907_s25), 0 }
   0xc   : > { %s5361_s12 = scalar_lea.vmem %s364_s30, 16  ;;  %p5369_p12 = scmp.lt.s32.totalorder %s364_s30, %s364_s30 }
   0xd   : > { %p5176_p7 = pnand %p5530_p5, %p5175_p6  ;;  %p5362_p8 = scmp.ne.s32.totalorder %s364_s30, %s5361_s12 }
   0xe   : > { %p5370_p13 = scmp.lt.s32.totalorder %s5361_s12, %s5361_s12 }
   0xf   : > { %p5363_p9 = pneg %p5176_p7 }
  0x10   : > { %p5371_p0 = por %p5370_p13, %p5369_p12 }
  0x11   : > { %p5364_p10 = pnand %p5363_p9, %p5362_p8 }
  0x13   : > { %p5365_p11 = pneg %p5364_p10 }
  0x15   : > { %p5372_p1 = pnand %p5371_p0, %p5365_p11 }
  0x17   : > { %5375 = shalt.err (!%p5372_p1)
}
  0x18   : > { %s5420_s13 = smov [#allocation3]   ;;  %436 = sbr.rel (%p5526_p3) target bundleno = 1710 (0x6ae), region = 60 }
  0x19   : > { %5178 = dma.vmem_to_smem (!%p5176_p7), %s364_s30, 16, %s5420_s13, [#allocation4]  }
  0x1f   : > { %5397 = dma.done.wait (%p5530_p5), [#allocation4], 16  }
  0x20   : > { %5399 = vsyncadd (%p5530_p5), [#allocation4], 4294967280 }
  0x21   : > { %442 = sfence }
  0x22   : > { %p517_p2 = scmp.lt.s32.totalorder %s5402_s19, 1  ;;  %v9828_v0 = vmov 0.0   ;;  %p519_p4 = scmp.lt.s32.totalorder %s5406_s20, 1  ;;  %vm802_vm0 = vcmask 1040384   ;;  %vm961_vm1 = vcmask 1046528   ;;  %vm1132_vm2 = vcmask 1045504  }
  0x23   : > { %v5551_v1 = vrot.slane %v9828_v0, 1  ;;  %s567_s14 = sld [smem:[#allocation2]]  ;;  %s5422_s16 = smov 4   ;;  %vm2241_vm3 = vcmask 1043456   ;;  %vm1882_vm4 = vcmask 31744   ;;  %vm1914_vm5 = vcmask 64512  }
  0x24   : > { %s5555_s15 = scalar_select %p517_p2, %s5402_s19, 1  ;;  %vm1946_vm6 = vcmask 97280   ;;  %vm1979_vm7 = vcmask 130048   ;;  %vm2012_vm8 = vcmask 162816   ;;  %vm2045_vm9 = vcmask 195584  }
  0x25   : > { %10123 = vst [vmem:[#allocation6_spill] sm:$0xff] %v5551_v1  ;;  %1039 = vrot.lane.b32.xlu0 %v5551_v1, %s5422_s16  ;;  %s10911_s20 = smov (!%p519_p4, %s5406_s20), 1  ;;  %s9987_s12 = smov 20   ;;  %vm2078_vm10 = vcmask 228352   ;;  %vm2111_vm11 = vcmask 261120   ;;  %vm2144_vm12 = vcmask 293888  }
  0x26   : > { %s4877_s17 = sshll.u32 %s5555_s15, 6  ;;  %s4876_s18 = sshll.u32 %s10911_s20, 5 }
  0x27   : > { %s4962_s0 = sshll.u32 %s10911_s20, 8  ;;  %s5561_s26 = sadd.s32 %s4877_s17, %s4876_s18 }
  0x28   : > { %s5566_s29 = scalar_lea.vmem %s9819_s3, %s4962_s0  ;;  %s9980_s30 = sshll.u32 %s5561_s26, 3 }
  0x29   : > { %s5572_s20 = scalar_lea.vmem %s9827_s11, %s4962_s0  ;;  %v5574_v2 = vstv %s567_s14  ;;  %v634_v3 = vld [vmem:[%s5566_s29] sm:$0xff]  ;;  %v635_v4 = vld [vmem:[%s5566_s29 + $0x8] sm:$0xff]  ;;  %v636_v5 = vld [vmem:[%s5566_s29 + $0x10] sm:$0xff]  ;;  %s5584_s27 = scalar_lea.vmem %s9818_s2, %s9980_s30 }
  0x2a   : > { %s633_s28 = ssub.f32 1.0, %s567_s14  ;;  %v637_v6 = vld [vmem:[%s5566_s29 + $0x18] sm:$0xff]  ;;  %v638_v7 = vld [vmem:[%s5566_s29 + $0x20] sm:$0xff]  ;;  %v639_v8 = vld [vmem:[%s5566_s29 + $0x28] sm:$0xff]  ;;  %s5423_s14 = smov 8  }
  0x2b   : > { %v568_v9 = vld [vmem:[%s5584_s27] sm:$0xff]  ;;  %v569_v10 = vld [vmem:[%s5584_s27 + $0x8] sm:$0xff]  ;;  %v570_v11 = vld [vmem:[%s5584_s27 + $0x10] sm:$0xff]  ;;  %s5424_s0 = smov 12   ;;  %s9985_s13 = smov 24  }
  0x2c   : > { %v601_v12 = vmul.f32 %v5574_v2, %v568_v9  ;;  %v602_v13 = vmul.f32 %v5574_v2, %v569_v10  ;;  %v5594_v14 = vstv %s633_s28  ;;  %v571_v15 = vld [vmem:[%s5584_s27 + $0x18] sm:$0xff]  ;;  %v603_v16 = vmul.f32 %v5574_v2, %v570_v11  ;;  %v572_v17 = vld [vmem:[%s5584_s27 + $0x20] sm:$0xff]  ;;  %v573_v18 = vld [vmem:[%s5584_s27 + $0x28] sm:$0xff]  ;;  %s5170_s17 = smul.u32 40, %s5555_s15  ;;  %s9983_s18 = smov 28  }
  0x2d   : > { %v667_v19 = vmul.f32 %v5594_v14, %v634_v3  ;;  %v668_v20 = vmul.f32 %v5594_v14, %v635_v4  ;;  %v604_v21 = vmul.f32 %v5574_v2, %v571_v15  ;;  %v669_v22 = vmul.f32 %v5594_v14, %v636_v5  ;;  %v574_v23 = vld [vmem:[%s5584_s27 + $0x30] sm:$0xff]  ;;  %v575_v24 = vld [vmem:[%s5584_s27 + $0x38] sm:$0xff]  ;;  %v576_v35 = vld [vmem:[%s5584_s27 + $0x40] sm:$0xff]  ;;  %p4958_p3 = scmp.ne.s32.totalorder %s5402_s19, 0 }
  0x2e   : > { %v670_v25 = vmul.f32 %v5594_v14, %v637_v6  ;;  %v605_v26 = vmul.f32 %v5574_v2, %v572_v17  ;;  %v606_v27 = vmul.f32 %v5574_v2, %v573_v18  ;;  %v671_v28 = vmul.f32 %v5594_v14, %v638_v7  ;;  %v640_v29 = vld [vmem:[%s5566_s29 + $0x30] sm:$0xff]  ;;  %v641_v30 = vld [vmem:[%s5566_s29 + $0x38] sm:$0xff]  ;;  %v577_v36 = vld [vmem:[%s5584_s27 + $0x48] sm:$0xff]  ;;  %s535_s28 = scalar_lea.vmem %s9820_s4, %s5170_s17 }
  0x2f   : > { %v5612_v31 = vadd.f32 %v667_v19, %v601_v12  ;;  %v5614_v32 = vadd.f32 %v668_v20, %v602_v13  ;;  %v5616_v33 = vadd.f32 %v669_v22, %v603_v16  ;;  %v672_v34 = vmul.f32 %v5594_v14, %v639_v8  ;;  %v642_v37 = vld [vmem:[%s5566_s29 + $0x40] sm:$0xff]  ;;  %v643_v42 = vld [vmem:[%s5566_s29 + $0x48] sm:$0xff]  ;;  %v578_v46 = vld [vmem:[%s5584_s27 + $0x50] sm:$0xff] }
  0x30   : > { %v5622_v38 = vadd.f32 %v670_v25, %v604_v21  ;;  %v5624_v39 = vadd.f32 %v671_v28, %v605_v26  ;;  %v607_v40 = vmul.f32 %v5574_v2, %v574_v23  ;;  %v608_v41 = vmul.f32 %v5574_v2, %v575_v24  ;;  %v579_v47 = vld [vmem:[%s5584_s27 + $0x58] sm:$0xff]  ;;  %v644_v51 = vld [vmem:[%s5566_s29 + $0x50] sm:$0xff]  ;;  %v580_v56 = vld [vmem:[%s5584_s27 + $0x60] sm:$0xff] }
  0x31   : > { %10124 = vst [vmem:[#allocation7_spill] sm:$0xff] %v5612_v31  ;;  %10125 = vst [vmem:[#allocation8_spill] sm:$0xff] %v5614_v32  ;;  %5231 = vtanh.f32 %v5612_v31  ;;  %v5630_v43 = vadd.f32 %v672_v34, %v606_v27  ;;  %v673_v44 = vmul.f32 %v5594_v14, %v640_v29  ;;  %v674_v45 = vmul.f32 %v5594_v14, %v641_v30  ;;  %v645_v52 = vld [vmem:[%s5566_s29 + $0x58] sm:$0xff]  ;;  %v581_v57 = vld [vmem:[%s5584_s27 + $0x68] sm:$0xff] }
  0x32   : > { %10126 = vst [vmem:[#allocation9_spill] sm:$0xff] %v5616_v33  ;;  %10127 = vst [vmem:[#allocation10_spill] sm:$0xff] %v5622_v38  ;;  %5233 = vtanh.f32 %v5614_v32  ;;  %v609_v48 = vmul.f32 %v5574_v2, %v576_v35  ;;  %v610_v49 = vmul.f32 %v5574_v2, %v577_v36  ;;  %v675_v50 = vmul.f32 %v5594_v14, %v642_v37  ;;  %v646_v58 = vld [vmem:[%s5566_s29 + $0x60] sm:$0xff]  ;;  %v647_v62 = vld [vmem:[%s5566_s29 + $0x68] sm:$0xff] }
  0x33   : > { %10128 = vst [vmem:[#allocation11_spill] sm:$0xff] %v5624_v39  ;;  %10129 = vst [vmem:[#allocation12_spill] sm:$0xff] %v5630_v43  ;;  %5235 = vtanh.f32 %v5616_v33  ;;  %v5643_v53 = vadd.f32 %v673_v44, %v607_v40  ;;  %v5645_v54 = vadd.f32 %v674_v45, %v608_v41  ;;  %v676_v55 = vmul.f32 %v5594_v14, %v643_v42  ;;  %v582_v5 = vld [vmem:[%s5584_s27 + $0x70] sm:$0xff]  ;;  %v583_v6 = vld [vmem:[%s5584_s27 + $0x78] sm:$0xff] }
  0x34   : > { %5237 = vtanh.f32 %v5622_v38  ;;  %v5652_v59 = vadd.f32 %v675_v50, %v609_v48  ;;  %v611_v60 = vmul.f32 %v5574_v2, %v578_v46  ;;  %v612_v61 = vmul.f32 %v5574_v2, %v579_v47  ;;  %v648_v10 = vld [vmem:[%s5566_s29 + $0x70] sm:$0xff]  ;;  %v649_v11 = vld [vmem:[%s5566_s29 + $0x78] sm:$0xff]  ;;  %v584_v16 = vld [vmem:[%s5584_s27 + $0x80] sm:$0xff] }
  0x35   : > { %10130 = vst [vmem:[#allocation13_spill] sm:$0xff] %v5643_v53  ;;  %10131 = vst [vmem:[#allocation14_spill] sm:$0xff] %v5645_v54  ;;  %5239 = vtanh.f32 %v5624_v39  ;;  %v5658_v63 = vadd.f32 %v676_v55, %v610_v49  ;;  %v677_v3 = vmul.f32 %v5594_v14, %v644_v51  ;;  %v678_v4 = vmul.f32 %v5594_v14, %v645_v52  ;;  %v585_v17 = vld [vmem:[%s5584_s27 + $0x88] sm:$0xff]  ;;  %v650_v18 = vld [vmem:[%s5566_s29 + $0x80] sm:$0xff] }
  0x36   : > { %10132 = vst [vmem:[#allocation15_spill] sm:$0xff] %v5652_v59  ;;  %5241 = vtanh.f32 %v5630_v43  ;;  %v613_v7 = vmul.f32 %v5574_v2, %v580_v56  ;;  %v614_v8 = vmul.f32 %v5574_v2, %v581_v57  ;;  %v679_v9 = vmul.f32 %v5594_v14, %v646_v58  ;;  %v651_v22 = vld [vmem:[%s5566_s29 + $0x88] sm:$0xff]  ;;  %v586_v29 = vld [vmem:[%s5584_s27 + $0x90] sm:$0xff]  ;;  %v661_v31 = vld [vmem:[%s5566_s29 + $0xd8] sm:$0xff] }
  0x37   : > { %10133 = vst [vmem:[#allocation16_spill] sm:$0xff] %v5658_v63  ;;  %5243 = vtanh.f32 %v5643_v53  ;;  %v5671_v12 = vadd.f32 %v677_v3, %v611_v60  ;;  %v5673_v13 = vadd.f32 %v678_v4, %v612_v61  ;;  %v680_v15 = vmul.f32 %v5594_v14, %v647_v62  ;;  %v660_v38 = vld [vmem:[%s5566_s29 + $0xd0] sm:$0xff] }
  0x38   : > { %5245 = vtanh.f32 %v5645_v54  ;;  %v5680_v19 = vadd.f32 %v679_v9, %v613_v7  ;;  %v615_v20 = vmul.f32 %v5574_v2, %v582_v5  ;;  %v616_v21 = vmul.f32 %v5574_v2, %v583_v6  ;;  %v659_v54 = vld [vmem:[%s5566_s29 + $0xc8] sm:$0xff] }
  0x39   : > { %10134 = vst [vmem:[#allocation17_spill] sm:$0xff] %v5671_v12  ;;  %10135 = vst [vmem:[#allocation18_spill] sm:$0xff] %v5673_v13  ;;  %5247 = vtanh.f32 %v5652_v59  ;;  %v5686_v23 = vadd.f32 %v680_v15, %v614_v8  ;;  %v681_v24 = vmul.f32 %v5594_v14, %v648_v10  ;;  %v682_v25 = vmul.f32 %v5594_v14, %v649_v11 }
  0x3a   : > { %10136 = vst [vmem:[#allocation19_spill] sm:$0xff] %v5680_v19  ;;  %5249 = vtanh.f32 %v5658_v63  ;;  %v617_v26 = vmul.f32 %v5574_v2, %v584_v16  ;;  %v618_v27 = vmul.f32 %v5574_v2, %v585_v17  ;;  %v683_v28 = vmul.f32 %v5594_v14, %v650_v18  ;;  %v593_v63 = vld [vmem:[%s5584_s27 + $0xc8] sm:$0xff] }
  0x3b   : > { %10137 = vst [vmem:[#allocation20_spill] sm:$0xff] %v5686_v23  ;;  %v5232_v30 = vpop.eup %5231  ;;  %5251 = vtanh.f32 %v5671_v12  ;;  %v684_v34 = vmul.f32 %v5594_v14, %v651_v22  ;;  %v5698_v37 = vadd.f32 %v681_v24, %v615_v20  ;;  %v5700_v40 = vadd.f32 %v682_v25, %v616_v21 }
  0x3c   : > { %v5234_v35 = vpop.eup %5233  ;;  %v803_v36 = vrot.slane %v5232_v30, 7  ;;  %5253 = vtanh.f32 %v5673_v13  ;;  %v5703_v44 = vadd.f32 %v683_v28, %v617_v26  ;;  %v5706_v45 = vmul.f32 %v5574_v2, %v586_v29  ;;  %v655_v13 = vld [vmem:[%s5566_s29 + $0xa8] sm:$0xff] }
  0x3d   : > { %10138 = vst [vmem:[#allocation21_spill] sm:$0xff] %v5698_v37  ;;  %10139 = vst [vmem:[#allocation22_spill] sm:$0xff] %v5700_v40  ;;  %v5236_v41 = vpop.eup %5235  ;;  %v804_v42 = vrot.slane %v5234_v35, 7  ;;  %5255 = vtanh.f32 %v5680_v19  ;;  %v5712_v49 = vadd.f32 %v684_v34, %v618_v27  ;;  %v626_v43 = vmul.f32 %v5574_v2, %v593_v63 }
  0x3e   : > { %10140 = vst [vmem:[#allocation23_spill] sm:$0xff] %v5703_v44  ;;  %v5238_v46 = vpop.eup %5237  ;;  %v5709_v47 = vsel %vm802_vm0, 0.0, %v803_v36  ;;  %v806_v48 = vrot.slane %v5236_v41, 7  ;;  %5257 = vtanh.f32 %v5686_v23 }
  0x3f   : > { %10141 = vst [vmem:[#allocation24_spill] sm:$0xff] %v5709_v47  ;;  %10142 = vst [vmem:[#allocation25_spill] sm:$0xff] %v5712_v49  ;;  %v5240_v50 = vpop.eup %5239  ;;  %v5715_v51 = vsel %vm802_vm0, %v803_v36, %v804_v42  ;;  %v5718_v52 = vsel %vm802_vm0, %v804_v42, 0.0  ;;  %v964_v55 = vrot.slane %v5709_v47, 1  ;;  %v807_v56 = vrot.slane %v5238_v46, 7 }
  0x40   : > { %10143 = vst [vmem:[#allocation26_spill] sm:$0xff] %v5715_v51  ;;  %v5242_v57 = vpop.eup %5241  ;;  %v965_v58 = vrot.slane %v5715_v51, 1  ;;  %v967_v60 = vrot.slane %v5718_v52, 1  ;;  %v5724_v61 = vsel %vm802_vm0, 0.0, %v806_v48  ;;  %v809_v62 = vrot.slane %v5240_v50, 7 }
  0x41   : > { %v5244_v3 = vpop.eup %5243  ;;  %v5727_v4 = vsel %vm802_vm0, %v806_v48, %v807_v56  ;;  %v969_v5 = vrot.slane %v5724_v61, 1  ;;  %v5731_v6 = vsel %vm802_vm0, %v807_v56, 0.0  ;;  %v810_v7 = vrot.slane %v5242_v57, 7 }
  0x42   : > { %v5246_v8 = vpop.eup %5245  ;;  %v5734_v9 = vsel %vm961_vm1, %v965_v58, %v967_v60  ;;  %v5737_v10 = vsel %vm961_vm1, %v964_v55, %v965_v58  ;;  %v970_v11 = vrot.slane %v5727_v4, 1  ;;  %v972_v15 = vrot.slane %v5731_v6, 1  ;;  %v587_v60 = vld [vmem:[%s5584_s27 + $0x98] sm:$0xff] }
  0x43   : > { %v5248_v16 = vpop.eup %5247  ;;  %1043 = vrot.lane.b32.xlu1 %v5734_v9, %s5422_s16  ;;  %1041 = vrot.lane.b32.xlu0 %v5737_v10, %s5422_s16  ;;  %v5746_v17 = vsel %vm802_vm0, %v809_v62, %v810_v7  ;;  %v5749_v18 = vsel %vm802_vm0, 0.0, %v809_v62  ;;  %v5752_v20 = vsel %vm802_vm0, %v810_v7, 0.0  ;;  %v812_v21 = vrot.slane %v5244_v3, 7  ;;  %v652_v62 = vld [vmem:[%s5566_s29 + $0x90] sm:$0xff] }
  0x44   : > { %v5250_v22 = vpop.eup %5249  ;;  %v5755_v24 = vsel %vm961_vm1, %v969_v5, %v970_v11  ;;  %v5758_v25 = vsel %vm961_vm1, %v970_v11, %v972_v15  ;;  %v974_v26 = vrot.slane %v5749_v18, 1  ;;  %v975_v27 = vrot.slane %v5746_v17, 1 }
  0x45   : > { %10144 = vst [vmem:[#allocation27_spill] sm:$0xff] %v5755_v24  ;;  %10145 = vst [vmem:[#allocation28_spill] sm:$0xff] %v5758_v25  ;;  %v5252_v28 = vpop.eup %5251  ;;  %v977_v29 = vrot.slane %v5752_v20, 1  ;;  %v813_v30 = vrot.slane %v5246_v8, 7  ;;  %v5764_v34 = vsel %vm802_vm0, 0.0, %v812_v21  ;;  %v815_v35 = vrot.slane %v5248_v16, 7 }
  0x46   : > { %10146 = vst [vmem:[#allocation29_spill] sm:$0xff] %v5764_v34  ;;  %v5254_v36 = vpop.eup %5253  ;;  %v5767_v41 = vsel %vm961_vm1, %v974_v26, %v975_v27  ;;  %v979_v42 = vrot.slane %v5764_v34, 1  ;;  %v816_v46 = vrot.slane %v5250_v22, 7  ;;  %v818_v48 = vrot.slane %v5252_v28, 7 }
  0x47   : > { %10147 = vst [vmem:[#allocation30_spill] sm:$0xff] %v5767_v41  ;;  %v5256_v50 = vpop.eup %5255  ;;  %1045 = vrot.lane.b32.xlu1 %v5755_v24, %s5422_s16  ;;  %1047 = vrot.lane.b32.xlu0 %v5758_v25, %s5422_s16  ;;  %v5775_v55 = vsel %vm961_vm1, %v975_v27, %v977_v29  ;;  %v5778_v56 = vsel %vm802_vm0, %v812_v21, %v813_v30  ;;  %v5781_v57 = vsel %vm802_vm0, %v813_v30, 0.0  ;;  %v5784_v58 = vsel %vm802_vm0, 0.0, %v815_v35  ;;  %v653_v29 = vld [vmem:[%s5566_s29 + $0x98] sm:$0xff] }
  0x48   : > { %10148 = vst [vmem:[#allocation31_spill] sm:$0xff] %v5775_v55  ;;  %10149 = vst [vmem:[#allocation32_spill] sm:$0xff] %v5778_v56  ;;  %v5258_v3 = vpop.eup %5257  ;;  %v980_v5 = vrot.slane %v5778_v56, 1  ;;  %v982_v7 = vrot.slane %v5781_v57, 1  ;;  %v5791_v8 = vsel %vm802_vm0, %v815_v35, %v816_v46  ;;  %v984_v11 = vrot.slane %v5784_v58, 1 }
  0x49   : > { %10150 = vst [vmem:[#allocation33_spill] sm:$0xff] %v5784_v58  ;;  %10151 = vst [vmem:[#allocation34_spill] sm:$0xff] %v5791_v8  ;;  %v985_v15 = vrot.slane %v5791_v8, 1  ;;  %v5796_v16 = vsel %vm802_vm0, %v816_v46, 0.0  ;;  %v819_v21 = vrot.slane %v5254_v36, 7  ;;  %v5799_v22 = vsel %vm802_vm0, 0.0, %v818_v48 }
  0x4a   : > { %10152 = vst [vmem:[#allocation35_spill] sm:$0xff] %v5799_v22  ;;  %v987_v26 = vrot.slane %v5796_v16, 1  ;;  %v989_v27 = vrot.slane %v5799_v22, 1  ;;  %v620_v28 = vmul.f32 %v5574_v2, %v587_v60  ;;  %v685_v30 = vmul.f32 %v5594_v14, %v652_v62 }
  0x4b   : > { %1049 = vrot.lane.b32.xlu1 %v5767_v41, %s5422_s16  ;;  %1051 = vrot.lane.b32.xlu0 %v5775_v55, %s5422_s16  ;;  %v5811_v35 = vsel %vm961_vm1, %v979_v42, %v980_v5  ;;  %v5814_v36 = vsel %vm802_vm0, %v818_v48, %v819_v21  ;;  %v5817_v46 = vsel %vm802_vm0, %v819_v21, 0.0  ;;  %v821_v60 = vrot.slane %v5256_v50, 7  ;;  %v588_v21 = vld [vmem:[%s5584_s27 + $0xa0] sm:$0xff] }
  0x4c   : > { %10153 = vst [vmem:[#allocation36_spill] sm:$0xff] %v5811_v35  ;;  %v5820_v62 = vsel %vm961_vm1, %v980_v5, %v982_v7  ;;  %v990_v0 = vrot.slane %v5814_v36, 1  ;;  %v992_v19 = vrot.slane %v5817_v46, 1  ;;  %v822_v23 = vrot.slane %v5258_v3, 7  ;;  %v589_v5 = vld [vmem:[%s5584_s27 + $0xa8] sm:$0xff] }
  0x4d   : > { %10154 = vst [vmem:[#allocation37_spill] sm:$0xff] %v5820_v62  ;;  %v5825_v42 = vsel %vm961_vm1, %v984_v11, %v985_v15  ;;  %v5828_v48 = vsel %vm802_vm0, 0.0, %v821_v60  ;;  %5259 = vtanh.f32 %v5698_v37  ;;  %v686_v50 = vmul.f32 %v5594_v14, %v653_v29  ;;  %v654_v37 = vld [vmem:[%s5566_s29 + $0xa0] sm:$0xff]  ;;  %v591_v29 = vld [vmem:[%s5584_s27 + $0xb8] sm:$0xff] }
  0x4e   : > { %10155 = vst [vmem:[#allocation38_spill] sm:$0xff] %v5825_v42  ;;  %v5835_v7 = vsel %vm961_vm1, %v985_v15, %v987_v26  ;;  %v5838_v12 = vsel %vm961_vm1, %v989_v27, %v990_v0  ;;  %v5841_v3 = vsel %vm802_vm0, %v821_v60, %v822_v23  ;;  %v5844_v11 = vadd.f32 %v685_v30, %v5706_v45  ;;  %v590_v27 = vld [vmem:[%s5584_s27 + $0xb0] sm:$0xff]  ;;  %v657_v60 = vld [vmem:[%s5566_s29 + $0xb8] sm:$0xff] }
  0x4f   : > { %10156 = vst [vmem:[#allocation39_spill] sm:$0xff] %v5835_v7  ;;  %10157 = vst [vmem:[#allocation40_spill] sm:$0xff] %v5838_v12  ;;  %1053 = vrot.lane.b32.xlu1 %v5811_v35, %s5422_s16  ;;  %1055 = vrot.lane.b32.xlu0 %v5820_v62, %s5422_s16  ;;  %v5853_v15 = vsel %vm961_vm1, %v990_v0, %v992_v19  ;;  %v5856_v26 = vsel %vm802_vm0, %v822_v23, 0.0  ;;  %5261 = vtanh.f32 %v5700_v40  ;;  %v994_v30 = vrot.slane %v5828_v48, 1  ;;  %v656_v23 = vld [vmem:[%s5566_s29 + $0xb0] sm:$0xff]  ;;  %v592_v40 = vld [vmem:[%s5584_s27 + $0xc0] sm:$0xff] }
  0x50   : > { %10158 = vst [vmem:[#allocation41_spill] sm:$0xff] %v5844_v11  ;;  %10159 = vst [vmem:[#allocation42_spill] sm:$0xff] %v5853_v15  ;;  %v5859_v45 = vadd.f32 %v686_v50, %v620_v28  ;;  %5263 = vtanh.f32 %v5703_v44  ;;  %v621_v0 = vmul.f32 %v5574_v2, %v588_v21  ;;  %v622_v19 = vmul.f32 %v5574_v2, %v589_v5  ;;  %v658_v44 = vld [vmem:[%s5566_s29 + $0xc0] sm:$0xff] }
  0x51   : > { %v995_v59 = vrot.slane %v5841_v3, 1  ;;  %5265 = vtanh.f32 %v5712_v49  ;;  %v687_v28 = vmul.f32 %v5594_v14, %v654_v37  ;;  %v688_v50 = vmul.f32 %v5594_v14, %v655_v13  ;;  %v594_v49 = vld [vmem:[%s5584_s27 + $0xd0] sm:$0xff] }
  0x52   : > { %10160 = vst [vmem:[#allocation43_spill] sm:$0xff] %v5859_v45  ;;  %v997_v53 = vrot.slane %v5856_v26, 1  ;;  %5267 = vtanh.f32 %v5844_v11  ;;  %v623_v21 = vmul.f32 %v5574_v2, %v590_v27  ;;  %v624_v5 = vmul.f32 %v5574_v2, %v591_v29  ;;  %v595_v27 = vld [vmem:[%s5584_s27 + $0xd8] sm:$0xff] }
  0x53   : > { %1057 = vrot.lane.b32.xlu1 %v5825_v42, %s5422_s16  ;;  %1059 = vrot.lane.b32.xlu0 %v5835_v7, %s5422_s16  ;;  %5269 = vtanh.f32 %v5859_v45  ;;  %v5887_v13 = vadd.f32 %v687_v28, %v621_v0  ;;  %v5889_v37 = vadd.f32 %v688_v50, %v622_v19  ;;  %v689_v11 = vmul.f32 %v5594_v14, %v656_v23 }
  0x54   : > { %v690_v39 = vmul.f32 %v5594_v14, %v657_v60  ;;  %v625_v29 = vmul.f32 %v5574_v2, %v592_v40  ;;  %v691_v33 = vmul.f32 %v5594_v14, %v658_v44  ;;  %v692_v19 = vmul.f32 %v5594_v14, %v659_v54 }
  0x55   : > { %10161 = vst [vmem:[#allocation44_spill] sm:$0xff] %v5887_v13  ;;  %10162 = vst [vmem:[#allocation45_spill] sm:$0xff] %v5889_v37  ;;  %5271 = vtanh.f32 %v5887_v13  ;;  %v5900_v0 = vadd.f32 %v689_v11, %v623_v21  ;;  %v627_v23 = vmul.f32 %v5574_v2, %v594_v49  ;;  %v628_v63 = vmul.f32 %v5574_v2, %v595_v27  ;;  %v596_v11 = vld [vmem:[%s5584_s27 + $0xe0] sm:$0xff]  ;;  %v663_v13 = vld [vmem:[%s5566_s29 + $0xe8] sm:$0xff] }
  0x56   : > { %5273 = vtanh.f32 %v5889_v37  ;;  %v5905_v60 = vadd.f32 %v690_v39, %v624_v5  ;;  %v5907_v40 = vadd.f32 %v691_v33, %v625_v29  ;;  %v5915_v54 = vadd.f32 %v692_v19, %v626_v43  ;;  %v662_v21 = vld [vmem:[%s5566_s29 + $0xe0] sm:$0xff] }
  0x57   : > { %10163 = vst [vmem:[#allocation46_spill] sm:$0xff] %v5900_v0  ;;  %v5260_v44 = vpop.eup %5259  ;;  %1061 = vrot.lane.b32.xlu1 %v5838_v12, %s5422_s16  ;;  %1063 = vrot.lane.b32.xlu0 %v5853_v15, %s5422_s16  ;;  %5275 = vtanh.f32 %v5900_v0  ;;  %v693_v49 = vmul.f32 %v5594_v14, %v660_v38  ;;  %v694_v39 = vmul.f32 %v5594_v14, %v661_v31  ;;  %v1141_v55 = vrot.slane %v5727_v4, 2 }
  0x58   : > { %10164 = vst [vmem:[#allocation47_spill] sm:$0xff] %v5905_v60  ;;  %10165 = vst [vmem:[#allocation48_spill] sm:$0xff] %v5907_v40  ;;  %v5921_v33 = vsel %vm961_vm1, %v994_v30, %v995_v59  ;;  %v5924_v28 = vsel %vm961_vm1, %v995_v59, %v997_v53  ;;  %v824_v50 = vrot.slane %v5260_v44, 7  ;;  %5277 = vtanh.f32 %v5905_v60 }
  0x59   : > { %10166 = vst [vmem:[#allocation49_spill] sm:$0xff] %v5915_v54  ;;  %10167 = vst [vmem:[#allocation50_spill] sm:$0xff] %v5921_v33  ;;  %v5262_v5 = vpop.eup %5261  ;;  %5279 = vtanh.f32 %v5907_v40  ;;  %v5929_v43 = vadd.f32 %v693_v49, %v627_v23  ;;  %v5931_v27 = vadd.f32 %v694_v39, %v628_v63  ;;  %v5938_v53 = vmul.f32 %v5574_v2, %v596_v11 }
  0x5a   : > { %10168 = vst [vmem:[#allocation51_spill] sm:$0xff] %v5924_v28  ;;  %v5264_v38 = vpop.eup %5263  ;;  %v825_v31 = vrot.slane %v5262_v5, 7  ;;  %v5934_v29 = vsel %vm802_vm0, 0.0, %v824_v50  ;;  %5281 = vtanh.f32 %v5915_v54  ;;  %v695_v23 = vmul.f32 %v5594_v14, %v662_v21 }
  0x5b   : > { %10169 = vst [vmem:[#allocation52_spill] sm:$0xff] %v5929_v43  ;;  %10170 = vst [vmem:[#allocation53_spill] sm:$0xff] %v5931_v27  ;;  %v5266_v59 = vpop.eup %5265  ;;  %1065 = vrot.lane.b32.xlu1 %v5921_v33, %s5422_s16  ;;  %1067 = vrot.lane.b32.xlu0 %v5924_v28, %s5422_s16  ;;  %v999_v30 = vrot.slane %v5934_v29, 1  ;;  %v827_v19 = vrot.slane %v5264_v38, 7  ;;  %5283 = vtanh.f32 %v5929_v43  ;;  %v1145_v41 = vrot.slane %v5749_v18, 2 }
  0x5c   : > { %v5268_v63 = vpop.eup %5267  ;;  %v5948_v44 = vsel %vm802_vm0, %v824_v50, %v825_v31  ;;  %v5951_v49 = vsel %vm802_vm0, %v825_v31, 0.0  ;;  %v828_v39 = vrot.slane %v5266_v59, 7  ;;  %5285 = vtanh.f32 %v5931_v27 }
  0x5d   : > { %v5270_v11 = vpop.eup %5269  ;;  %v1000_v5 = vrot.slane %v5948_v44, 1  ;;  %v1002_v40 = vrot.slane %v5951_v49, 1  ;;  %v5957_v38 = vsel %vm802_vm0, 0.0, %v827_v19  ;;  %v830_v43 = vrot.slane %v5268_v63, 7 }
  0x5e   : > { %10171 = vst [vmem:[#allocation54_spill] sm:$0xff] %v5957_v38  ;;  %v5960_v21 = vsel %vm802_vm0, %v827_v19, %v828_v39  ;;  %v1004_v50 = vrot.slane %v5957_v38, 1  ;;  %v5964_v31 = vsel %vm802_vm0, %v828_v39, 0.0  ;;  %v831_v59 = vrot.slane %v5270_v11, 7 }
  0x5f   : > { %10172 = vst [vmem:[#allocation55_spill] sm:$0xff] %v5960_v21  ;;  %v5272_v27 = vpop.eup %5271  ;;  %v5967_v54 = vsel %vm961_vm1, %v999_v30, %v1000_v5  ;;  %v5970_v0 = vsel %vm961_vm1, %v1000_v5, %v1002_v40  ;;  %v1005_v63 = vrot.slane %v5960_v21, 1  ;;  %v1007_v19 = vrot.slane %v5964_v31, 1  ;;  %v597_v5 = vld [vmem:[%s5584_s27 + $0xe8] sm:$0xff] }
  0x60   : > { %10173 = vst [vmem:[#allocation56_spill] sm:$0xff] %v5967_v54  ;;  %10174 = vst [vmem:[#allocation57_spill] sm:$0xff] %v5970_v0  ;;  %v5274_v60 = vpop.eup %5273  ;;  %1069 = vrot.lane.b32.xlu1 %v5967_v54, %s5422_s16  ;;  %1071 = vrot.lane.b32.xlu0 %v5970_v0, %s5422_s16  ;;  %v5979_v39 = vsel %vm802_vm0, %v830_v43, %v831_v59  ;;  %v5982_v30 = vsel %vm802_vm0, 0.0, %v830_v43  ;;  %v5985_v40 = vsel %vm802_vm0, %v831_v59, 0.0  ;;  %v833_v11 = vrot.slane %v5272_v27, 7 }
  0x61   : > { %10175 = vst [vmem:[#allocation58_spill] sm:$0xff] %v5979_v39  ;;  %10176 = vst [vmem:[#allocation59_spill] sm:$0xff] %v5982_v30  ;;  %v5276_v37 = vpop.eup %5275  ;;  %v5990_v45 = vsel %vm961_vm1, %v1004_v50, %v1005_v63  ;;  %v5993_v32 = vsel %vm961_vm1, %v1005_v63, %v1007_v19  ;;  %v1009_v1 = vrot.slane %v5982_v30, 1  ;;  %v1010_v0 = vrot.slane %v5979_v39, 1 }
  0x62   : > { %10177 = vst [vmem:[#allocation60_spill] sm:$0xff] %v5990_v45  ;;  %10178 = vst [vmem:[#allocation61_spill] sm:$0xff] %v5993_v32  ;;  %v5278_v54 = vpop.eup %5277  ;;  %v1012_v43 = vrot.slane %v5985_v40, 1  ;;  %v834_v28 = vrot.slane %v5274_v60, 7  ;;  %v5999_v59 = vsel %vm802_vm0, 0.0, %v833_v11  ;;  %v836_v27 = vrot.slane %v5276_v37, 7 }
  0x63   : > { %10179 = vst [vmem:[#allocation62_spill] sm:$0xff] %v5999_v59  ;;  %v5280_v33 = vpop.eup %5279  ;;  %v6002_v15 = vsel %vm961_vm1, %v1009_v1, %v1010_v0  ;;  %v837_v50 = vrot.slane %v5278_v54, 7  ;;  %v630_v63 = vmul.f32 %v5574_v2, %v597_v5  ;;  %v696_v19 = vmul.f32 %v5594_v14, %v663_v13 }
  0x64   : > { %10180 = vst [vmem:[#allocation63_spill] sm:$0xff] %v6002_v15  ;;  %v5282_v12 = vpop.eup %5281  ;;  %1073 = vrot.lane.b32.xlu1 %v5990_v45, %s5422_s16  ;;  %1075 = vrot.lane.b32.xlu0 %v5993_v32, %s5422_s16  ;;  %v6011_v60 = vsel %vm961_vm1, %v1010_v0, %v1012_v43  ;;  %v6014_v37 = vsel %vm802_vm0, %v833_v11, %v834_v28  ;;  %v1014_v1 = vrot.slane %v5999_v59, 1  ;;  %v6018_v54 = vsel %vm802_vm0, %v834_v28, 0.0 }
  0x65   : > { %10181 = vst [vmem:[#allocation64_spill] sm:$0xff] %v6011_v60  ;;  %10182 = vst [vmem:[#allocation65_spill] sm:$0xff] %v6014_v37  ;;  %v5284_v5 = vpop.eup %5283  ;;  %v1015_v13 = vrot.slane %v6014_v37, 1  ;;  %v1017_v7 = vrot.slane %v6018_v54, 1  ;;  %v6023_v45 = vsel %vm802_vm0, %v836_v27, %v837_v50  ;;  %v6026_v32 = vsel %vm802_vm0, 0.0, %v836_v27 }
  0x66   : > { %10183 = vst [vmem:[#allocation66_spill] sm:$0xff] %v6023_v45  ;;  %10184 = vst [vmem:[#allocation67_spill] sm:$0xff] %v6026_v32  ;;  %v5286_v0 = vpop.eup %5285  ;;  %v6029_v11 = vsel %vm802_vm0, %v837_v50, 0.0  ;;  %v839_v43 = vrot.slane %v5280_v33, 7  ;;  %v840_v42 = vrot.slane %v5282_v12, 7  ;;  %v6032_v28 = vadd.f32 %v695_v23, %v5938_v53 }
  0x67   : > { %v6034_v62 = vadd.f32 %v696_v19, %v630_v63  ;;  %v6041_v27 = vsel %vm961_vm1, %v1014_v1, %v1015_v13  ;;  %v1019_v35 = vrot.slane %v6026_v32, 1  ;;  %v1020_v50 = vrot.slane %v6023_v45, 1 }
  0x68   : > { %10185 = vst [vmem:[#allocation68_spill] sm:$0xff] %v6032_v28  ;;  %1077 = vrot.lane.b32.xlu1 %v6002_v15, %s5422_s16  ;;  %1079 = vrot.lane.b32.xlu0 %v6011_v60, %s5422_s16  ;;  %10187 = vst [vmem:[#allocation70_spill] sm:$0xff] %v6041_v27  ;;  %v6046_v12 = vsel %vm961_vm1, %v1015_v13, %v1017_v7  ;;  %v1022_v33 = vrot.slane %v6029_v11, 1  ;;  %v6050_v53 = vsel %vm802_vm0, %v839_v43, %v840_v42 }
  0x69   : > { %10186 = vst [vmem:[#allocation69_spill] sm:$0xff] %v6034_v62  ;;  %10188 = vst [vmem:[#allocation71_spill] sm:$0xff] %v6046_v12  ;;  %v6053_v23 = vsel %vm802_vm0, 0.0, %v839_v43  ;;  %v6056_v63 = vsel %vm802_vm0, %v840_v42, 0.0  ;;  %v842_v19 = vrot.slane %v5284_v5, 7  ;;  %v843_v1 = vrot.slane %v5286_v0, 7 }
  0x6a   : > { %10189 = vst [vmem:[#allocation72_spill] sm:$0xff] %v6050_v53  ;;  %10190 = vst [vmem:[#allocation73_spill] sm:$0xff] %v6053_v23  ;;  %5287 = vtanh.f32 %v6032_v28  ;;  %v1024_v7 = vrot.slane %v6053_v23, 1  ;;  %v1025_v13 = vrot.slane %v6050_v53, 1  ;;  %v6067_v43 = vsel %vm961_vm1, %v1019_v35, %v1020_v50 }
  0x6b   : > { %5289 = vtanh.f32 %v6034_v62  ;;  %10191 = vst [vmem:[#allocation74_spill] sm:$0xff] %v6067_v43  ;;  %v6070_v42 = vsel %vm961_vm1, %v1020_v50, %v1022_v33  ;;  %v1027_v5 = vrot.slane %v6056_v63, 1  ;;  %v6074_v0 = vsel %vm802_vm0, %v842_v19, %v843_v1 }
  0x6c   : > { %1081 = vrot.lane.b32.xlu1 %v6041_v27, %s5422_s16  ;;  %1083 = vrot.lane.b32.xlu0 %v6046_v12, %s5422_s16  ;;  %10192 = vst [vmem:[#allocation75_spill] sm:$0xff] %v6070_v42  ;;  %10193 = vst [vmem:[#allocation76_spill] sm:$0xff] %v6074_v0  ;;  %v6077_v28 = vsel %vm802_vm0, 0.0, %v842_v19  ;;  %v6080_v62 = vsel %vm802_vm0, %v843_v1, 0.0  ;;  %v6087_v35 = vsel %vm961_vm1, %v1024_v7, %v1025_v13  ;;  %v1030_v19 = vrot.slane %v6074_v0, 1 }
  0x6d   : > { %10194 = vst [vmem:[#allocation77_spill] sm:$0xff] %v6077_v28  ;;  %10195 = vst [vmem:[#allocation78_spill] sm:$0xff] %v6087_v35  ;;  %v6090_v50 = vsel %vm961_vm1, %v1025_v13, %v1027_v5  ;;  %v1029_v33 = vrot.slane %v6077_v28, 1  ;;  %v1032_v12 = vrot.slane %v6080_v62, 1  ;;  %v1138_v15 = vrot.slane %v5718_v52, 2 }
  0x6e   : > { %10196 = vst [vmem:[#allocation79_spill] sm:$0xff] %v6090_v50  ;;  %v1146_v25 = vrot.slane %v5746_v17, 2 }
  0x6f   : > { %v6100_v7 = vsel %vm961_vm1, %v1029_v33, %v1030_v19  ;;  %v6103_v13 = vsel %vm961_vm1, %v1030_v19, %v1032_v12 }
  0x70   : > { %1085 = vrot.lane.b32.xlu1 %v6067_v43, %s5422_s16  ;;  %1087 = vrot.lane.b32.xlu0 %v6070_v42, %s5422_s16  ;;  %10197 = vst [vmem:[#allocation80_spill] sm:$0xff] %v6100_v7  ;;  %10198 = vst [vmem:[#allocation81_spill] sm:$0xff] %v6103_v13 }
  0x74   : > { %v5288_v1 = vpop.eup %5287  ;;  %1089 = vrot.lane.b32.xlu1 %v6087_v35, %s5422_s16  ;;  %1091 = vrot.lane.b32.xlu0 %v6090_v50, %s5422_s16 }
  0x75   : > { %v5290_v42 = vpop.eup %5289  ;;  %v845_v5 = vrot.slane %v5288_v1, 7  ;;  %v1135_v1 = vrot.slane %v5709_v47, 2 }
  0x76   : > { %v846_v43 = vrot.slane %v5290_v42, 7 }
  0x77   : > { %v6106_v27 = vsel %vm802_vm0, 0.0, %v845_v5 }
  0x78   : > { %10199 = vst [vmem:[#allocation82_spill] sm:$0xff] %v6106_v27  ;;  %1093 = vrot.lane.b32.xlu1 %v6100_v7, %s5422_s16  ;;  %1095 = vrot.lane.b32.xlu0 %v6103_v13, %s5422_s16  ;;  %v6113_v50 = vsel %vm802_vm0, %v845_v5, %v846_v43  ;;  %v1034_v33 = vrot.slane %v6106_v27, 1  ;;  %v6117_v12 = vsel %vm802_vm0, %v846_v43, 0.0  ;;  %v1136_v7 = vrot.slane %v5715_v51, 2 }
  0x79   : > { %10200 = vst [vmem:[#allocation83_spill] sm:$0xff] %v6113_v50  ;;  %v1035_v42 = vrot.slane %v6113_v50, 1  ;;  %v1037_v19 = vrot.slane %v6117_v12, 1  ;;  %v10203_v43 = vmov 0.0  }
  0x7a   : > { %v6134_v35 = vrot.slane %v10203_v43, 2  ;;  %v6137_v60 = vsel %vm1132_vm2, %v1135_v1, %v1136_v7  ;;  %v1143_v43 = vrot.slane %v5731_v6, 2  ;;  %v665_v1 = vld [vmem:[%s5566_s29 + $0xf8] sm:$0xff] }
  0x7b   : > { %v6124_v5 = vsel %vm961_vm1, %v1034_v33, %v1035_v42  ;;  %v6127_v13 = vsel %vm961_vm1, %v1035_v42, %v1037_v19  ;;  %10205 = vst [vmem:[#allocation87_spill] sm:$0xff] %v6137_v60  ;;  %v1140_v33 = vrot.slane %v5724_v61, 2  ;;  %v598_v42 = vld [vmem:[%s5584_s27 + $0xf0] sm:$0xff]  ;;  %v698_v6 = vmul.f32 %v5594_v14, %v665_v1 }
  0x7c   : > { %10201 = vst [vmem:[#allocation84_spill] sm:$0xff] %v6124_v5  ;;  %10202 = vst [vmem:[#allocation85_spill] sm:$0xff] %v6127_v13  ;;  %1097 = vrot.lane.b32.xlu1 %v6124_v5, %s5422_s16  ;;  %1099 = vrot.lane.b32.xlu0 %v6127_v13, %s5422_s16  ;;  %v664_v19 = vld [vmem:[%s5566_s29 + $0xf0] sm:$0xff]  ;;  %v599_v13 = vld [vmem:[%s5584_s27 + $0xf8] sm:$0xff]  ;;  %v6152_v5 = vsel %vm1132_vm2, %v1136_v7, %v1138_v15  ;;  %v631_v24 = vmul.f32 %v5574_v2, %v598_v42  ;;  %v1148_v7 = vrot.slane %v5752_v20, 2  ;;  %s5425_s29 = smov 16  }
  0x7d   : > { %10204 = vst [vmem:[#allocation86_spill] sm:$0xff] %v6134_v35  ;;  %v6155_v52 = vsel %vm1132_vm2, %v1140_v33, %v1141_v55  ;;  %v6168_v15 = vsel %vm1132_vm2, %v1141_v55, %v1143_v43  ;;  %v6174_v42 = vsel %vm1132_vm2, %v1145_v41, %v1146_v25  ;;  %v1153_v55 = vrot.slane %v5781_v57, 2  ;;  %s9981_s27 = smov 32  }
  0x7e   : > { %v6186_v20 = vsel %vm1132_vm2, %v1146_v25, %v1148_v7  ;;  %v1155_v41 = vrot.slane %v5784_v58, 2  ;;  %v1160_v43 = vrot.slane %v5799_v22, 2  ;;  %v1163_v1 = vrot.slane %v5817_v46, 2 }
  0x7f   : > { %v1165_v7 = vrot.slane %v5828_v48, 2 }
  0x80   : > { %1210 = vrot.lane.b32.xlu1 %v6134_v35, %s5423_s14  ;;  %1212 = vrot.lane.b32.xlu0 %v6137_v60, %s5423_s14  ;;  %v697_v35 = vmul.f32 %v5594_v14, %v664_v19  ;;  %v632_v60 = vmul.f32 %v5574_v2, %v599_v13  ;;  %v1150_v2 = vrot.slane %v5764_v34, 2  ;;  %v1151_v14 = vrot.slane %v5778_v56, 2 }
  0x81   : > { %v1161_v19 = vrot.slane %v5814_v36, 2 }
  0x82   : > { %v6171_v33 = vadd.f32 %v697_v35, %v631_v24  ;;  %v6178_v13 = vadd.f32 %v698_v6, %v632_v60  ;;  %v6189_v24 = vsel %vm1132_vm2, %v1150_v2, %v1151_v14  ;;  %v1156_v35 = vrot.slane %v5791_v8, 2 }
  0x83   : > { %v1158_v60 = vrot.slane %v5796_v16, 2  ;;  %v6199_v57 = vsel %vm1132_vm2, %v1151_v14, %v1153_v55  ;;  %v6215_v6 = vsel %vm1132_vm2, %v1160_v43, %v1161_v19  ;;  %v1166_v2 = vrot.slane %v5841_v3, 2 }
  0x84   : > { %1214 = vrot.lane.b32.xlu1 %v6152_v5, %s5423_s14  ;;  %1216 = vrot.lane.b32.xlu0 %v6155_v52, %s5423_s14  ;;  %10206 = vst [vmem:[#allocation88_spill] sm:$0xff] %v6171_v33  ;;  %10207 = vst [vmem:[#allocation89_spill] sm:$0xff] %v6178_v13  ;;  %v6202_v25 = vsel %vm1132_vm2, %v1155_v41, %v1156_v35  ;;  %v1168_v14 = vrot.slane %v5856_v26, 2  ;;  %v6225_v46 = vsel %vm1132_vm2, %v1161_v19, %v1163_v1 }
  0x85   : > { %v6212_v16 = vsel %vm1132_vm2, %v1156_v35, %v1158_v60  ;;  %v6228_v55 = vsel %vm1132_vm2, %v1165_v7, %v1166_v2  ;;  %v1170_v41 = vrot.slane %v5934_v29, 2  ;;  %v1171_v35 = vrot.slane %v5948_v44, 2 }
  0x86   : > { %v1173_v60 = vrot.slane %v5951_v49, 2  ;;  %v6238_v26 = vsel %vm1132_vm2, %v1166_v2, %v1168_v14  ;;  %v1175_v19 = vrot.slane %v5957_v38, 2  ;;  %v1176_v1 = vrot.slane %v5960_v21, 2 }
  0x87   : > { %v6241_v43 = vsel %vm1132_vm2, %v1170_v41, %v1171_v35  ;;  %v1178_v2 = vrot.slane %v5964_v31, 2  ;;  %v1180_v14 = vrot.slane %v5982_v30, 2  ;;  %v1181_v41 = vrot.slane %v5979_v39, 2 }
  0x88   : > { %1218 = vrot.lane.b32.xlu1 %v6168_v15, %s5423_s14  ;;  %1220 = vrot.lane.b32.xlu0 %v6174_v42, %s5423_s14  ;;  %10208 = vst [vmem:[#allocation90_spill] sm:$0xff] %v6241_v43  ;;  %v6250_v7 = vsel %vm1132_vm2, %v1171_v35, %v1173_v60  ;;  %v6253_v49 = vsel %vm1132_vm2, %v1175_v19, %v1176_v1  ;;  %v1185_v31 = vrot.slane %v5999_v59, 2  ;;  %v1186_v19 = vrot.slane %v6014_v37, 2 }
  0x89   : > { %10209 = vst [vmem:[#allocation91_spill] sm:$0xff] %v6253_v49  ;;  %v6264_v35 = vsel %vm1132_vm2, %v1176_v1, %v1178_v2  ;;  %v6267_v60 = vsel %vm1132_vm2, %v1180_v14, %v1181_v41  ;;  %v1188_v1 = vrot.slane %v6018_v54, 2  ;;  %v1190_v2 = vrot.slane %v6026_v32, 2 }
  0x8a   : > { %10210 = vst [vmem:[#allocation92_spill] sm:$0xff] %v6267_v60  ;;  %v1191_v14 = vrot.slane %v6023_v45, 2  ;;  %v1195_v54 = vrot.slane %v6053_v23, 2  ;;  %5291 = vtanh.f32 %v6171_v33 }
  0x8b   : > { %5293 = vtanh.f32 %v6178_v13 }
  0x8c   : > { %1222 = vrot.lane.b32.xlu1 %v6186_v20, %s5423_s14  ;;  %1224 = vrot.lane.b32.xlu0 %v6189_v24, %s5423_s14 }
  0x90   : > { %1226 = vrot.lane.b32.xlu1 %v6199_v57, %s5423_s14  ;;  %1228 = vrot.lane.b32.xlu0 %v6202_v25, %s5423_s14 }
  0x94   : > { %1230 = vrot.lane.b32.xlu1 %v6212_v16, %s5423_s14  ;;  %1232 = vrot.lane.b32.xlu0 %v6215_v6, %s5423_s14  ;;  %v5292_v33 = vpop.eup %5291 }
  0x95   : > { %v848_v13 = vrot.slane %v5292_v33, 7 }
  0x98   : > { %1234 = vrot.lane.b32.xlu1 %v6225_v46, %s5423_s14  ;;  %1236 = vrot.lane.b32.xlu0 %v6228_v55, %s5423_s14 }
  0x9c   : > { %1238 = vrot.lane.b32.xlu1 %v6238_v26, %s5423_s14  ;;  %1240 = vrot.lane.b32.xlu0 %v6241_v43, %s5423_s14  ;;  %v1183_v43 = vrot.slane %v5985_v40, 2  ;;  %v6279_v40 = vsel %vm1132_vm2, %v1185_v31, %v1186_v19  ;;  %v1196_v31 = vrot.slane %v6050_v53, 2 }
  0x9d   : > { %10212 = vst [vmem:[#allocation94_spill] sm:$0xff] %v6279_v40 }
  0xa0   : > { %1242 = vrot.lane.b32.xlu1 %v6250_v7, %s5423_s14  ;;  %1244 = vrot.lane.b32.xlu0 %v6253_v49, %s5423_s14  ;;  %v6276_v49 = vsel %vm1132_vm2, %v1181_v41, %v1183_v43  ;;  %v6290_v43 = vsel %vm1132_vm2, %v1186_v19, %v1188_v1  ;;  %v6293_v41 = vsel %vm1132_vm2, %v1190_v2, %v1191_v14  ;;  %v1198_v19 = vrot.slane %v6056_v63, 2 }
  0xa1   : > { %10211 = vst [vmem:[#allocation93_spill] sm:$0xff] %v6276_v49  ;;  %10213 = vst [vmem:[#allocation95_spill] sm:$0xff] %v6293_v41  ;;  %v1200_v1 = vrot.slane %v6077_v28, 2  ;;  %v1201_v2 = vrot.slane %v6074_v0, 2  ;;  %v1205_v63 = vrot.slane %v6106_v27, 2 }
  0xa4   : > { %1246 = vrot.lane.b32.xlu1 %v6264_v35, %s5423_s14  ;;  %1248 = vrot.lane.b32.xlu0 %v6267_v60, %s5423_s14  ;;  %v1193_v60 = vrot.slane %v6029_v11, 2  ;;  %v6305_v11 = vsel %vm1132_vm2, %v1195_v54, %v1196_v31  ;;  %v6321_v54 = vsel %vm1132_vm2, %v1200_v1, %v1201_v2 }
  0xa5   : > { %10215 = vst [vmem:[#allocation97_spill] sm:$0xff] %v6305_v11  ;;  %10217 = vst [vmem:[#allocation99_spill] sm:$0xff] %v6321_v54 }
  0xa8   : > { %1250 = vrot.lane.b32.xlu1 %v6276_v49, %s5423_s14  ;;  %1252 = vrot.lane.b32.xlu0 %v6279_v40, %s5423_s14  ;;  %v6302_v40 = vsel %vm1132_vm2, %v1191_v14, %v1193_v60  ;;  %v6310_v49 = vpop.permute.xlu0 %1039  ;;  %v1203_v60 = vrot.slane %v6080_v62, 2  ;;  %v6318_v14 = vsel %vm1132_vm2, %v1196_v31, %v1198_v19  ;;  %v1208_v19 = vrot.slane %v6117_v12, 2 }
  0xa9   : > { %10214 = vst [vmem:[#allocation96_spill] sm:$0xff] %v6302_v40  ;;  %10216 = vst [vmem:[#allocation98_spill] sm:$0xff] %v6310_v49 }
  0xaa   : > { %v6334_v62 = vsel %vm1132_vm2, %v1201_v2, %v1203_v60 }
  0xac   : > { %1254 = vrot.lane.b32.xlu1 %v6290_v43, %s5423_s14  ;;  %1256 = vrot.lane.b32.xlu0 %v6293_v41, %s5423_s14  ;;  %v1206_v41 = vrot.slane %v6113_v50, 2 }
  0xae   : > { %v6337_v31 = vsel %vm1132_vm2, %v1205_v63, %v1206_v41 }
  0xaf   : > { %10220 = vst [vmem:[#allocation102_spill] sm:$0xff] %v6337_v31 }
  0xb0   : > { %1258 = vrot.lane.b32.xlu1 %v6302_v40, %s5423_s14  ;;  %1260 = vrot.lane.b32.xlu0 %v6305_v11, %s5423_s14 }
  0xb4   : > { %1262 = vrot.lane.b32.xlu1 %v6318_v14, %s5423_s14  ;;  %1264 = vrot.lane.b32.xlu0 %v6321_v54, %s5423_s14 }
  0xb5   : > { %v6329_v49 = vpop.permute.xlu1 %1043  ;;  %v6331_v11 = vpop.permute.xlu0 %1041 }
  0xb6   : > { %10218 = vst [vmem:[#allocation100_spill] sm:$0xff] %v6329_v49  ;;  %10219 = vst [vmem:[#allocation101_spill] sm:$0xff] %v6331_v11  ;;  %v6349_v11 = vsel %vm1132_vm2, %v1206_v41, %v1208_v19  ;;  %v10275_v49 = vld [vmem:[#allocation40_spill] sm:$0xff] }
  0xb8   : > { %1266 = vrot.lane.b32.xlu1 %v6334_v62, %s5423_s14  ;;  %1268 = vrot.lane.b32.xlu0 %v6337_v31, %s5423_s14 }
  0xb9   : > { %v6344_v1 = vpop.permute.xlu1 %1045  ;;  %v6346_v54 = vpop.permute.xlu0 %1047 }
  0xba   : > { %10221 = vst [vmem:[#allocation103_spill] sm:$0xff] %v6344_v1  ;;  %10222 = vst [vmem:[#allocation104_spill] sm:$0xff] %v6346_v54 }
  0xbc   : > { %1270 = vrot.lane.b32.xlu1 %v6349_v11, %s5423_s14  ;;  %1304 = vrot.lane.b32.xlu0 %v5709_v47, %s5424_s0  ;;  %v10271_v47 = vld [vmem:[#allocation38_spill] sm:$0xff] }
  0xbd   : > { %v6355_v12 = vpop.permute.xlu1 %1049  ;;  %v6357_v2 = vpop.permute.xlu0 %1051 }
  0xbe   : > { %10223 = vst [vmem:[#allocation105_spill] sm:$0xff] %v6355_v12  ;;  %10224 = vst [vmem:[#allocation106_spill] sm:$0xff] %v6357_v2 }
  0xc0   : > { %1306 = vrot.lane.b32.xlu1 %v5715_v51, %s5424_s0  ;;  %1308 = vrot.lane.b32.xlu0 %v5724_v61, %s5424_s0 }
  0xc1   : > { %v6363_v60 = vpop.permute.xlu1 %1053  ;;  %v6365_v41 = vpop.permute.xlu0 %1055 }
  0xc2   : > { %10225 = vst [vmem:[#allocation107_spill] sm:$0xff] %v6363_v60  ;;  %10226 = vst [vmem:[#allocation108_spill] sm:$0xff] %v6365_v41 }
  0xc4   : > { %1310 = vrot.lane.b32.xlu1 %v5727_v4, %s5424_s0  ;;  %1312 = vrot.lane.b32.xlu0 %v5749_v18, %s5424_s0 }
  0xc5   : > { %v6371_v63 = vpop.permute.xlu1 %1057  ;;  %v6373_v19 = vpop.permute.xlu0 %1059 }
  0xc6   : > { %10227 = vst [vmem:[#allocation109_spill] sm:$0xff] %v6371_v63  ;;  %10228 = vst [vmem:[#allocation110_spill] sm:$0xff] %v6373_v19 }
  0xc8   : > { %1314 = vrot.lane.b32.xlu1 %v5746_v17, %s5424_s0  ;;  %1316 = vrot.lane.b32.xlu0 %v5764_v34, %s5424_s0 }
  0xc9   : > { %v6379_v2 = vpop.permute.xlu1 %1061  ;;  %v6381_v60 = vpop.permute.xlu0 %1063 }
  0xca   : > { %10229 = vst [vmem:[#allocation111_spill] sm:$0xff] %v6379_v2  ;;  %10230 = vst [vmem:[#allocation112_spill] sm:$0xff] %v6381_v60 }
  0xcc   : > { %1318 = vrot.lane.b32.xlu1 %v5778_v56, %s5424_s0  ;;  %1320 = vrot.lane.b32.xlu0 %v5784_v58, %s5424_s0 }
  0xcd   : > { %v6387_v41 = vpop.permute.xlu1 %1065  ;;  %v6389_v63 = vpop.permute.xlu0 %1067 }
  0xce   : > { %10231 = vst [vmem:[#allocation113_spill] sm:$0xff] %v6387_v41  ;;  %10232 = vst [vmem:[#allocation114_spill] sm:$0xff] %v6389_v63 }
  0xd0   : > { %1322 = vrot.lane.b32.xlu1 %v5791_v8, %s5424_s0  ;;  %1324 = vrot.lane.b32.xlu0 %v5799_v22, %s5424_s0 }
  0xd2   : > { %v6395_v19 = vpop.permute.xlu1 %1069  ;;  %v6397_v2 = vpop.permute.xlu0 %1071 }
  0xd3   : > { %10233 = vst [vmem:[#allocation115_spill] sm:$0xff] %v6395_v19  ;;  %10234 = vst [vmem:[#allocation116_spill] sm:$0xff] %v6397_v2 }
  0xd4   : > { %1326 = vrot.lane.b32.xlu1 %v5814_v36, %s5424_s0  ;;  %1328 = vrot.lane.b32.xlu0 %v5828_v48, %s5424_s0 }
  0xd6   : > { %v6403_v60 = vpop.permute.xlu1 %1073  ;;  %v6405_v41 = vpop.permute.xlu0 %1075 }
  0xd7   : > { %10235 = vst [vmem:[#allocation117_spill] sm:$0xff] %v6403_v60  ;;  %10236 = vst [vmem:[#allocation118_spill] sm:$0xff] %v6405_v41 }
  0xd8   : > { %1330 = vrot.lane.b32.xlu1 %v5841_v3, %s5424_s0  ;;  %1332 = vrot.lane.b32.xlu0 %v5934_v29, %s5424_s0 }
  0xda   : > { %v6411_v63 = vpop.permute.xlu1 %1077  ;;  %v6413_v19 = vpop.permute.xlu0 %1079 }
  0xdb   : > { %10237 = vst [vmem:[#allocation119_spill] sm:$0xff] %v6411_v63  ;;  %10238 = vst [vmem:[#allocation120_spill] sm:$0xff] %v6413_v19 }
  0xdc   : > { %1334 = vrot.lane.b32.xlu1 %v5948_v44, %s5424_s0  ;;  %1336 = vrot.lane.b32.xlu0 %v5957_v38, %s5424_s0 }
  0xde   : > { %v6419_v2 = vpop.permute.xlu1 %1081  ;;  %v6421_v60 = vpop.permute.xlu0 %1083 }
  0xdf   : > { %10239 = vst [vmem:[#allocation121_spill] sm:$0xff] %v6419_v2  ;;  %10240 = vst [vmem:[#allocation122_spill] sm:$0xff] %v6421_v60 }
  0xe0   : > { %1338 = vrot.lane.b32.xlu1 %v5960_v21, %s5424_s0  ;;  %1340 = vrot.lane.b32.xlu0 %v5982_v30, %s5424_s0 }
  0xe2   : > { %v6427_v41 = vpop.permute.xlu1 %1085  ;;  %v6429_v63 = vpop.permute.xlu0 %1087 }
  0xe3   : > { %10241 = vst [vmem:[#allocation123_spill] sm:$0xff] %v6427_v41  ;;  %10242 = vst [vmem:[#allocation124_spill] sm:$0xff] %v6429_v63 }
  0xe4   : > { %1342 = vrot.lane.b32.xlu1 %v5979_v39, %s5424_s0  ;;  %1344 = vrot.lane.b32.xlu0 %v5999_v59, %s5424_s0  ;;  %v10295_v39 = vld [vmem:[#allocation70_spill] sm:$0xff] }
  0xe6   : > { %v6436_v2 = vpop.permute.xlu1 %1089  ;;  %v6438_v60 = vpop.permute.xlu0 %1091 }
  0xe7   : > { %10243 = vst [vmem:[#allocation125_spill] sm:$0xff] %v6436_v2  ;;  %10244 = vst [vmem:[#allocation126_spill] sm:$0xff] %v6438_v60 }
  0xe8   : > { %1346 = vrot.lane.b32.xlu1 %v6014_v37, %s5424_s0  ;;  %1348 = vrot.lane.b32.xlu0 %v6026_v32, %s5424_s0  ;;  %v10291_v37 = vld [vmem:[#allocation63_spill] sm:$0xff] }
  0xea   : > { %v6445_v63 = vpop.permute.xlu1 %1093  ;;  %v6447_v41 = vpop.permute.xlu0 %1095 }
  0xeb   : > { %10245 = vst [vmem:[#allocation127_spill] sm:$0xff] %v6445_v63  ;;  %10246 = vst [vmem:[#allocation128_spill] sm:$0xff] %v6447_v41  ;;  %v6461_v63 = vpop.eup %5293 }
  0xec   : > { %1350 = vrot.lane.b32.xlu1 %v6023_v45, %s5424_s0  ;;  %1352 = vrot.lane.b32.xlu0 %v6053_v23, %s5424_s0  ;;  %v10287_v45 = vld [vmem:[#allocation60_spill] sm:$0xff] }
  0xee   : > { %v6453_v60 = vpop.permute.xlu1 %1097  ;;  %v6455_v2 = vpop.permute.xlu0 %1099 }
  0xef   : > { %10247 = vst [vmem:[#allocation129_spill] sm:$0xff] %v6453_v60  ;;  %10248 = vst [vmem:[#allocation130_spill] sm:$0xff] %v6455_v2  ;;  %v6472_v2 = vsel %vm802_vm0, 0.0, %v848_v13  ;;  %v9939_v60 = vrot.slane %v6461_v63, 7 }
  0xf0   : > { %1354 = vrot.lane.b32.xlu1 %v6050_v53, %s5424_s0  ;;  %1356 = vrot.lane.b32.xlu0 %v6077_v28, %s5424_s0  ;;  %10251 = vst [vmem:[#allocation133_spill] sm:$0xff] %v6472_v2  ;;  %v10283_v53 = vld [vmem:[#allocation56_spill] sm:$0xff] }
  0xf1   : > { %v6486_v54 = vsel %vm802_vm0, %v848_v13, %v9939_v60  ;;  %v10259_v13 = vld [vmem:[#allocation27_spill] sm:$0xff] }
  0xf2   : > { %v6463_v41 = vpop.permute.xlu1 %1210  ;;  %v6465_v19 = vpop.permute.xlu0 %1212  ;;  %10254 = vst [vmem:[#allocation136_spill] sm:$0xff] %v6486_v54 }
  0xf3   : > { %10249 = vst [vmem:[#allocation131_spill] sm:$0xff] %v6463_v41  ;;  %10250 = vst [vmem:[#allocation132_spill] sm:$0xff] %v6465_v19 }
  0xf4   : > { %1358 = vrot.lane.b32.xlu1 %v6074_v0, %s5424_s0  ;;  %1360 = vrot.lane.b32.xlu0 %v6106_v27, %s5424_s0  ;;  %v10279_v0 = vld [vmem:[#allocation50_spill] sm:$0xff] }
  0xf6   : > { %v6475_v12 = vpop.permute.xlu1 %1214  ;;  %v6477_v33 = vpop.permute.xlu0 %1216 }
  0xf7   : > { %10252 = vst [vmem:[#allocation134_spill] sm:$0xff] %v6475_v12  ;;  %10253 = vst [vmem:[#allocation135_spill] sm:$0xff] %v6477_v33  ;;  %v10263_v12 = vld [vmem:[#allocation30_spill] sm:$0xff] }
  0xf8   : > { %1362 = vrot.lane.b32.xlu1 %v6113_v50, %s5424_s0  ;;  %1364 = vrot.lane.b32.xlu0 %v6472_v2, %s5424_s0 }
  0xfa   : > { %v6488_v1 = vpop.permute.xlu1 %1218  ;;  %v6490_v19 = vpop.permute.xlu0 %1220 }
  0xfb   : > { %10255 = vst [vmem:[#allocation137_spill] sm:$0xff] %v6488_v1  ;;  %10256 = vst [vmem:[#allocation138_spill] sm:$0xff] %v6490_v19  ;;  %v10262_v1 = vld [vmem:[#allocation28_spill] sm:$0xff] }
  0xfc   : > { %1366 = vrot.lane.b32.xlu1 %v6486_v54, %s5424_s0  ;;  %1406 = vrot.lane.b32.xlu0 %v5737_v10, %s5425_s29 }
  0xfe   : > { %v6496_v33 = vpop.permute.xlu1 %1222  ;;  %v6498_v50 = vpop.permute.xlu0 %1224 }
  0xff   : > { %10257 = vst [vmem:[#allocation139_spill] sm:$0xff] %v6496_v33  ;;  %10258 = vst [vmem:[#allocation140_spill] sm:$0xff] %v6498_v50  ;;  %v10266_v50 = vld [vmem:[#allocation31_spill] sm:$0xff] }
 0x100   : > { %1408 = vrot.lane.b32.xlu1 %v5734_v9, %s5425_s29  ;;  %1410 = vrot.lane.b32.xlu0 %v10259_v13, %s5425_s29  ;;  %v10267_v9 = vld [vmem:[#allocation36_spill] sm:$0xff] }
 0x102   : > { %v6504_v60 = vpop.permute.xlu1 %1226  ;;  %v6506_v19 = vpop.permute.xlu0 %1228 }
 0x103   : > { %10260 = vst [vmem:[#allocation27_spill] sm:$0xff] %v6504_v60  ;;  %10261 = vst [vmem:[#allocation141_spill] sm:$0xff] %v6506_v19  ;;  %v10270_v19 = vld [vmem:[#allocation37_spill] sm:$0xff] }
 0x104   : > { %1412 = vrot.lane.b32.xlu1 %v10262_v1, %s5425_s29  ;;  %1414 = vrot.lane.b32.xlu0 %v10263_v12, %s5425_s29 }
 0x106   : > { %v6512_v10 = vpop.permute.xlu1 %1230  ;;  %v6514_v33 = vpop.permute.xlu0 %1232 }
 0x107   : > { %10264 = vst [vmem:[#allocation28_spill] sm:$0xff] %v6512_v10  ;;  %10265 = vst [vmem:[#allocation30_spill] sm:$0xff] %v6514_v33  ;;  %v10274_v33 = vld [vmem:[#allocation39_spill] sm:$0xff] }
 0x108   : > { %1416 = vrot.lane.b32.xlu1 %v10266_v50, %s5425_s29  ;;  %1418 = vrot.lane.b32.xlu0 %v10267_v9, %s5425_s29 }
 0x10a   : > { %v6520_v27 = vpop.permute.xlu1 %1234  ;;  %v6522_v60 = vpop.permute.xlu0 %1236 }
 0x10b   : > { %10268 = vst [vmem:[#allocation31_spill] sm:$0xff] %v6520_v27  ;;  %10269 = vst [vmem:[#allocation36_spill] sm:$0xff] %v6522_v60  ;;  %v10278_v60 = vld [vmem:[#allocation42_spill] sm:$0xff] }
 0x10c   : > { %1420 = vrot.lane.b32.xlu1 %v10270_v19, %s5425_s29  ;;  %1422 = vrot.lane.b32.xlu0 %v10271_v47, %s5425_s29 }
 0x10e   : > { %v6528_v51 = vpop.permute.xlu1 %1238  ;;  %v6530_v10 = vpop.permute.xlu0 %1240 }
 0x10f   : > { %10272 = vst [vmem:[#allocation37_spill] sm:$0xff] %v6528_v51  ;;  %10273 = vst [vmem:[#allocation38_spill] sm:$0xff] %v6530_v10  ;;  %v10282_v10 = vld [vmem:[#allocation51_spill] sm:$0xff] }
 0x110   : > { %1424 = vrot.lane.b32.xlu1 %v10274_v33, %s5425_s29  ;;  %1426 = vrot.lane.b32.xlu0 %v10275_v49, %s5425_s29 }
 0x112   : > { %v6536_v41 = vpop.permute.xlu1 %1242  ;;  %v6538_v27 = vpop.permute.xlu0 %1244 }
 0x113   : > { %10276 = vst [vmem:[#allocation39_spill] sm:$0xff] %v6536_v41  ;;  %10277 = vst [vmem:[#allocation40_spill] sm:$0xff] %v6538_v27  ;;  %v10286_v27 = vld [vmem:[#allocation57_spill] sm:$0xff] }
 0x114   : > { %1428 = vrot.lane.b32.xlu1 %v10278_v60, %s5425_s29  ;;  %1430 = vrot.lane.b32.xlu0 %v10279_v0, %s5425_s29 }
 0x116   : > { %v6544_v28 = vpop.permute.xlu1 %1246  ;;  %v6546_v51 = vpop.permute.xlu0 %1248 }
 0x117   : > { %10280 = vst [vmem:[#allocation42_spill] sm:$0xff] %v6544_v28  ;;  %10281 = vst [vmem:[#allocation50_spill] sm:$0xff] %v6546_v51  ;;  %v10290_v51 = vld [vmem:[#allocation61_spill] sm:$0xff] }
 0x118   : > { %1432 = vrot.lane.b32.xlu1 %v10282_v10, %s5425_s29  ;;  %1434 = vrot.lane.b32.xlu0 %v10283_v53, %s5425_s29 }
 0x11a   : > { %v6552_v23 = vpop.permute.xlu1 %1250  ;;  %v6554_v41 = vpop.permute.xlu0 %1252 }
 0x11b   : > { %10284 = vst [vmem:[#allocation51_spill] sm:$0xff] %v6552_v23  ;;  %10285 = vst [vmem:[#allocation142_spill] sm:$0xff] %v6554_v41  ;;  %v10294_v41 = vld [vmem:[#allocation64_spill] sm:$0xff] }
 0x11c   : > { %1436 = vrot.lane.b32.xlu1 %v10286_v27, %s5425_s29  ;;  %1438 = vrot.lane.b32.xlu0 %v10287_v45, %s5425_s29 }
 0x11e   : > { %v6560_v32 = vpop.permute.xlu1 %1254  ;;  %v6562_v28 = vpop.permute.xlu0 %1256 }
 0x11f   : > { %10288 = vst [vmem:[#allocation143_spill] sm:$0xff] %v6560_v32  ;;  %10289 = vst [vmem:[#allocation144_spill] sm:$0xff] %v6562_v28  ;;  %v10298_v28 = vld [vmem:[#allocation71_spill] sm:$0xff] }
 0x120   : > { %1440 = vrot.lane.b32.xlu1 %v10290_v51, %s5425_s29  ;;  %1442 = vrot.lane.b32.xlu0 %v10291_v37, %s5425_s29  ;;  %v10299_v51 = vld [vmem:[#allocation74_spill] sm:$0xff] }
 0x122   : > { %v6568_v59 = vpop.permute.xlu1 %1258  ;;  %v6570_v23 = vpop.permute.xlu0 %1260 }
 0x123   : > { %10292 = vst [vmem:[#allocation145_spill] sm:$0xff] %v6568_v59  ;;  %10293 = vst [vmem:[#allocation146_spill] sm:$0xff] %v6570_v23  ;;  %v10302_v23 = vld [vmem:[#allocation75_spill] sm:$0xff] }
 0x124   : > { %1444 = vrot.lane.b32.xlu1 %v10294_v41, %s5425_s29  ;;  %1446 = vrot.lane.b32.xlu0 %v10295_v39, %s5425_s29  ;;  %v10303_v41 = vld [vmem:[#allocation78_spill] sm:$0xff] }
 0x126   : > { %v6576_v45 = vpop.permute.xlu1 %1262  ;;  %v6578_v32 = vpop.permute.xlu0 %1264 }
 0x127   : > { %10296 = vst [vmem:[#allocation147_spill] sm:$0xff] %v6576_v45  ;;  %10297 = vst [vmem:[#allocation148_spill] sm:$0xff] %v6578_v32  ;;  %v10306_v32 = vld [vmem:[#allocation79_spill] sm:$0xff] }
 0x128   : > { %1448 = vrot.lane.b32.xlu1 %v10298_v28, %s5425_s29  ;;  %1450 = vrot.lane.b32.xlu0 %v10299_v51, %s5425_s29  ;;  %v10307_v28 = vld [vmem:[#allocation80_spill] sm:$0xff] }
 0x12a   : > { %v6584_v37 = vpop.permute.xlu1 %1266  ;;  %v6586_v59 = vpop.permute.xlu0 %1268 }
 0x12b   : > { %10300 = vst [vmem:[#allocation149_spill] sm:$0xff] %v6584_v37  ;;  %10301 = vst [vmem:[#allocation150_spill] sm:$0xff] %v6586_v59  ;;  %v1401_v37 = vrot.slane %v6472_v2, 1  ;;  %v1402_v59 = vrot.slane %v6486_v54, 1 }
 0x12c   : > { %1452 = vrot.lane.b32.xlu1 %v10302_v23, %s5425_s29  ;;  %1454 = vrot.lane.b32.xlu0 %v10303_v41, %s5425_s29  ;;  %v10310_v41 = vrot.slane %v6461_v63, 7  ;;  %v10316_v63 = vld [vmem:[#allocation85_spill] sm:$0xff] }
 0x12e   : > { %v6592_v39 = vpop.permute.xlu1 %1270  ;;  %v6594_v45 = vpop.permute.xlu0 %1304 }
 0x12f   : > { %10304 = vst [vmem:[#allocation151_spill] sm:$0xff] %v6592_v39  ;;  %10305 = vst [vmem:[#allocation152_spill] sm:$0xff] %v6594_v45  ;;  %v6609_v39 = vsel %vm802_vm0, %v10310_v41, 0.0  ;;  %v10311_v45 = vld [vmem:[#allocation81_spill] sm:$0xff] }
 0x130   : > { %1456 = vrot.lane.b32.xlu1 %v10306_v32, %s5425_s29  ;;  %1458 = vrot.lane.b32.xlu0 %v10307_v28, %s5425_s29  ;;  %v10312_v32 = vld [vmem:[#allocation84_spill] sm:$0xff]  ;;  %v6616_v28 = vsel %vm961_vm1, %v1401_v37, %v1402_v59  ;;  %v1404_v27 = vrot.slane %v6609_v39, 1  ;;  %v10320_v37 = vld [vmem:[#allocation87_spill] sm:$0xff] }
 0x131   : > { %10313 = vst [vmem:[#allocation155_spill] sm:$0xff] %v6616_v28 }
 0x132   : > { %v6602_v51 = vpop.permute.xlu1 %1306  ;;  %v6604_v23 = vpop.permute.xlu0 %1308  ;;  %v6628_v41 = vsel %vm961_vm1, %v1402_v59, %v1404_v27 }
 0x133   : > { %10308 = vst [vmem:[#allocation153_spill] sm:$0xff] %v6602_v51  ;;  %10309 = vst [vmem:[#allocation154_spill] sm:$0xff] %v6604_v23 }
 0x134   : > { %1460 = vrot.lane.b32.xlu1 %v10311_v45, %s5425_s29  ;;  %1462 = vrot.lane.b32.xlu0 %v10312_v32, %s5425_s29  ;;  %10317 = vst [vmem:[#allocation158_spill] sm:$0xff] %v6628_v41 }
 0x136   : > { %v6619_v53 = vpop.permute.xlu1 %1310  ;;  %v6621_v51 = vpop.permute.xlu0 %1312 }
 0x137   : > { %10314 = vst [vmem:[#allocation156_spill] sm:$0xff] %v6619_v53  ;;  %10315 = vst [vmem:[#allocation157_spill] sm:$0xff] %v6621_v51 }
 0x138   : > { %1464 = vrot.lane.b32.xlu1 %v10316_v63, %s5425_s29  ;;  %1466 = vrot.lane.b32.xlu0 %v6616_v28, %s5425_s29  ;;  %v10345_v28 = vld [vmem:[#allocation94_spill] sm:$0xff] }
 0x13a   : > { %v6630_v23 = vpop.permute.xlu1 %1314  ;;  %v6632_v32 = vpop.permute.xlu0 %1316 }
 0x13b   : > { %10318 = vst [vmem:[#allocation159_spill] sm:$0xff] %v6630_v23  ;;  %10319 = vst [vmem:[#allocation160_spill] sm:$0xff] %v6632_v32 }
 0x13c   : > { %1468 = vrot.lane.b32.xlu1 %v6628_v41, %s5425_s29  ;;  %1507 = vrot.lane.b32.xlu0 %v10320_v37, %s9987_s12 }
 0x13e   : > { %v6638_v51 = vpop.permute.xlu1 %1318  ;;  %v6640_v63 = vpop.permute.xlu0 %1320 }
 0x13f   : > { %10321 = vst [vmem:[#allocation87_spill] sm:$0xff] %v6638_v51  ;;  %10322 = vst [vmem:[#allocation161_spill] sm:$0xff] %v6640_v63 }
 0x140   : > { %1509 = vrot.lane.b32.xlu1 %v6152_v5, %s9987_s12  ;;  %1511 = vrot.lane.b32.xlu0 %v6155_v52, %s9987_s12 }
 0x142   : > { %v6646_v59 = vpop.permute.xlu1 %1322  ;;  %v6648_v27 = vpop.permute.xlu0 %1324 }
 0x143   : > { %10323 = vst [vmem:[#allocation162_spill] sm:$0xff] %v6646_v59  ;;  %10324 = vst [vmem:[#allocation163_spill] sm:$0xff] %v6648_v27 }
 0x144   : > { %1513 = vrot.lane.b32.xlu1 %v6168_v15, %s9987_s12  ;;  %1515 = vrot.lane.b32.xlu0 %v6174_v42, %s9987_s12 }
 0x146   : > { %v6654_v37 = vpop.permute.xlu1 %1326  ;;  %v6656_v41 = vpop.permute.xlu0 %1328 }
 0x147   : > { %10325 = vst [vmem:[#allocation164_spill] sm:$0xff] %v6654_v37  ;;  %10326 = vst [vmem:[#allocation165_spill] sm:$0xff] %v6656_v41 }
 0x148   : > { %1517 = vrot.lane.b32.xlu1 %v6186_v20, %s9987_s12  ;;  %1519 = vrot.lane.b32.xlu0 %v6189_v24, %s9987_s12 }
 0x14a   : > { %v6662_v5 = vpop.permute.xlu1 %1330  ;;  %v6664_v59 = vpop.permute.xlu0 %1332 }
 0x14b   : > { %10327 = vst [vmem:[#allocation166_spill] sm:$0xff] %v6662_v5  ;;  %10328 = vst [vmem:[#allocation167_spill] sm:$0xff] %v6664_v59 }
 0x14c   : > { %1521 = vrot.lane.b32.xlu1 %v6199_v57, %s9987_s12  ;;  %1523 = vrot.lane.b32.xlu0 %v6202_v25, %s9987_s12 }
 0x14e   : > { %v6670_v27 = vpop.permute.xlu1 %1334  ;;  %v6672_v37 = vpop.permute.xlu0 %1336 }
 0x14f   : > { %10329 = vst [vmem:[#allocation168_spill] sm:$0xff] %v6670_v27  ;;  %10330 = vst [vmem:[#allocation169_spill] sm:$0xff] %v6672_v37  ;;  %v10335_v37 = vld [vmem:[#allocation90_spill] sm:$0xff] }
 0x150   : > { %1525 = vrot.lane.b32.xlu1 %v6212_v16, %s9987_s12  ;;  %1527 = vrot.lane.b32.xlu0 %v6215_v6, %s9987_s12 }
 0x152   : > { %v6678_v41 = vpop.permute.xlu1 %1338  ;;  %v6680_v5 = vpop.permute.xlu0 %1340 }
 0x153   : > { %10331 = vst [vmem:[#allocation170_spill] sm:$0xff] %v6678_v41  ;;  %10332 = vst [vmem:[#allocation171_spill] sm:$0xff] %v6680_v5  ;;  %v10338_v5 = vld [vmem:[#allocation91_spill] sm:$0xff] }
 0x154   : > { %1529 = vrot.lane.b32.xlu1 %v6225_v46, %s9987_s12  ;;  %1531 = vrot.lane.b32.xlu0 %v6228_v55, %s9987_s12 }
 0x156   : > { %v6686_v59 = vpop.permute.xlu1 %1342  ;;  %v6688_v27 = vpop.permute.xlu0 %1344 }
 0x157   : > { %10333 = vst [vmem:[#allocation172_spill] sm:$0xff] %v6686_v59  ;;  %10334 = vst [vmem:[#allocation173_spill] sm:$0xff] %v6688_v27  ;;  %v10341_v27 = vld [vmem:[#allocation92_spill] sm:$0xff] }
 0x158   : > { %1533 = vrot.lane.b32.xlu1 %v6238_v26, %s9987_s12  ;;  %1535 = vrot.lane.b32.xlu0 %v10335_v37, %s9987_s12 }
 0x15a   : > { %v6694_v63 = vpop.permute.xlu1 %1346  ;;  %v6696_v41 = vpop.permute.xlu0 %1348 }
 0x15b   : > { %10336 = vst [vmem:[#allocation90_spill] sm:$0xff] %v6694_v63  ;;  %10337 = vst [vmem:[#allocation174_spill] sm:$0xff] %v6696_v41  ;;  %v10344_v41 = vld [vmem:[#allocation93_spill] sm:$0xff] }
 0x15c   : > { %1537 = vrot.lane.b32.xlu1 %v6250_v7, %s9987_s12  ;;  %1539 = vrot.lane.b32.xlu0 %v10338_v5, %s9987_s12 }
 0x15e   : > { %v6702_v51 = vpop.permute.xlu1 %1350  ;;  %v6704_v59 = vpop.permute.xlu0 %1352 }
 0x15f   : > { %10339 = vst [vmem:[#allocation91_spill] sm:$0xff] %v6702_v51  ;;  %10340 = vst [vmem:[#allocation175_spill] sm:$0xff] %v6704_v59  ;;  %v10348_v59 = vld [vmem:[#allocation95_spill] sm:$0xff] }
 0x160   : > { %1541 = vrot.lane.b32.xlu1 %v6264_v35, %s9987_s12  ;;  %1543 = vrot.lane.b32.xlu0 %v10341_v27, %s9987_s12 }
 0x162   : > { %v6710_v32 = vpop.permute.xlu1 %1354  ;;  %v6712_v63 = vpop.permute.xlu0 %1356 }
 0x163   : > { %10342 = vst [vmem:[#allocation92_spill] sm:$0xff] %v6710_v32  ;;  %10343 = vst [vmem:[#allocation176_spill] sm:$0xff] %v6712_v63  ;;  %v10351_v63 = vld [vmem:[#allocation97_spill] sm:$0xff] }
 0x164   : > { %1545 = vrot.lane.b32.xlu1 %v10344_v41, %s9987_s12  ;;  %1547 = vrot.lane.b32.xlu0 %v10345_v28, %s9987_s12 }
 0x166   : > { %v6718_v23 = vpop.permute.xlu1 %1358  ;;  %v6720_v51 = vpop.permute.xlu0 %1360 }
 0x167   : > { %10346 = vst [vmem:[#allocation93_spill] sm:$0xff] %v6718_v23  ;;  %10347 = vst [vmem:[#allocation94_spill] sm:$0xff] %v6720_v51  ;;  %v10354_v51 = vld [vmem:[#allocation99_spill] sm:$0xff] }
 0x168   : > { %1549 = vrot.lane.b32.xlu1 %v6290_v43, %s9987_s12  ;;  %1551 = vrot.lane.b32.xlu0 %v10348_v59, %s9987_s12 }
 0x16a   : > { %v6726_v53 = vpop.permute.xlu1 %1362  ;;  %v6728_v32 = vpop.permute.xlu0 %1364 }
 0x16b   : > { %10349 = vst [vmem:[#allocation177_spill] sm:$0xff] %v6726_v53  ;;  %10350 = vst [vmem:[#allocation178_spill] sm:$0xff] %v6728_v32  ;;  %v1502_v53 = vrot.slane %v6472_v2, 2  ;;  %v1503_v32 = vrot.slane %v6486_v54, 2 }
 0x16c   : > { %1553 = vrot.lane.b32.xlu1 %v6302_v40, %s9987_s12  ;;  %1555 = vrot.lane.b32.xlu0 %v10351_v63, %s9987_s12 }
 0x16e   : > { %v6734_v45 = vpop.permute.xlu1 %1366  ;;  %v6736_v23 = vpop.permute.xlu0 %1406 }
 0x16f   : > { %10352 = vst [vmem:[#allocation97_spill] sm:$0xff] %v6734_v45  ;;  %10353 = vst [vmem:[#allocation179_spill] sm:$0xff] %v6736_v23  ;;  %v6753_v45 = vsel %vm1132_vm2, %v1502_v53, %v1503_v32  ;;  %v1505_v23 = vrot.slane %v6609_v39, 2 }
 0x170   : > { %1557 = vrot.lane.b32.xlu1 %v6318_v14, %s9987_s12  ;;  %1559 = vrot.lane.b32.xlu0 %v10354_v51, %s9987_s12  ;;  %10356 = vst [vmem:[#allocation181_spill] sm:$0xff] %v6753_v45 }
 0x171   : > { %v6765_v54 = vsel %vm1132_vm2, %v1503_v32, %v1505_v23 }
 0x172   : > { %v6744_v59 = vpop.permute.xlu1 %1408  ;;  %v6746_v40 = vpop.permute.xlu0 %1410  ;;  %10357 = vst [vmem:[#allocation182_spill] sm:$0xff] %v6765_v54 }
 0x173   : > { %10355 = vst [vmem:[#allocation180_spill] sm:$0xff] %v6746_v40 }
 0x174   : > { %1561 = vrot.lane.b32.xlu1 %v6334_v62, %s9987_s12  ;;  %1563 = vrot.lane.b32.xlu0 %v6337_v31, %s9987_s12 }
 0x176   : > { %v6756_v51 = vpop.permute.xlu1 %1412  ;;  %v6758_v2 = vpop.permute.xlu0 %1414 }
 0x178   : > { %1565 = vrot.lane.b32.xlu1 %v6349_v11, %s9987_s12  ;;  %1567 = vrot.lane.b32.xlu0 %v6753_v45, %s9987_s12 }
 0x17a   : > { %v6767_v40 = vpop.permute.xlu1 %1416  ;;  %v6769_v31 = vpop.permute.xlu0 %1418 }
 0x17c   : > { %1569 = vrot.lane.b32.xlu1 %v6765_v54, %s9987_s12  ;;  %1603 = vrot.lane.b32.xlu0 %v5724_v61, %s9985_s13  ;;  %s7626_s12 = scalar_lea.vmem %s9823_s7, %s5555_s15 }
 0x17e   : > { %v6775_v39 = vpop.permute.xlu1 %1420  ;;  %v6777_v53 = vpop.permute.xlu0 %1422 }
 0x17f   : > { %10358 = vst [vmem:[#allocation183_spill] sm:$0xff] %v6777_v53 }
 0x180   : > { %1605 = vrot.lane.b32.xlu1 %v5727_v4, %s9985_s13  ;;  %1607 = vrot.lane.b32.xlu0 %v5749_v18, %s9985_s13 }
 0x182   : > { %v6783_v32 = vpop.permute.xlu1 %1424  ;;  %v6785_v23 = vpop.permute.xlu0 %1426 }
 0x183   : > { %10359 = vst [vmem:[#allocation184_spill] sm:$0xff] %v6783_v32  ;;  %10360 = vst [vmem:[#allocation185_spill] sm:$0xff] %v6785_v23 }
 0x184   : > { %1609 = vrot.lane.b32.xlu1 %v5746_v17, %s9985_s13  ;;  %1611 = vrot.lane.b32.xlu0 %v5764_v34, %s9985_s13 }
 0x186   : > { %v6791_v54 = vpop.permute.xlu1 %1428  ;;  %v6793_v45 = vpop.permute.xlu0 %1430 }
 0x187   : > { %10361 = vst [vmem:[#allocation186_spill] sm:$0xff] %v6791_v54  ;;  %10362 = vst [vmem:[#allocation187_spill] sm:$0xff] %v6793_v45  ;;  %v763_v45 = vld [vmem:[%s535_s28] sm:$0xff]  ;;  %v764_v54 = vld [vmem:[%s535_s28 + $0x8] sm:$0xff] }
 0x188   : > { %1613 = vrot.lane.b32.xlu1 %v5778_v56, %s9985_s13  ;;  %1615 = vrot.lane.b32.xlu0 %v5784_v58, %s9985_s13  ;;  %v5154_v53 = vpack.c.bf16 %v764_v54, %v763_v45 }
 0x18a   : > { %v6800_v32 = vpop.permute.xlu1 %1432  ;;  %v6802_v23 = vpop.permute.xlu0 %1434  ;;  %5155 = vmatprep.subr.bf16.mxu0 %v5154_v53 }
 0x18b   : > { %10363 = vst [vmem:[#allocation188_spill] sm:$0xff] %v6800_v32  ;;  %10364 = vst [vmem:[#allocation189_spill] sm:$0xff] %v6802_v23  ;;  %v765_v23 = vld [vmem:[%s535_s28 + $0x10] sm:$0xff]  ;;  %v766_v32 = vld [vmem:[%s535_s28 + $0x18] sm:$0xff]  ;;  %5157 = vmatpush3.bf16.msra.mxu0 %v5154_v53 }
 0x18c   : > { %1617 = vrot.lane.b32.xlu1 %v5791_v8, %s9985_s13  ;;  %1619 = vrot.lane.b32.xlu0 %v5799_v22, %s9985_s13  ;;  %v5158_v8 = vpack.c.bf16 %v766_v32, %v765_v23 }
 0x18e   : > { %v6813_v58 = vpop.permute.xlu1 %1436  ;;  %v6815_v56 = vpop.permute.xlu0 %1438  ;;  %5159 = vmatprep.subr.bf16.mxu0 %v5158_v8 }
 0x18f   : > { %10365 = vst [vmem:[#allocation190_spill] sm:$0xff] %v6815_v56  ;;  %5161 = vmatpush3.bf16.msra.mxu0 %v5158_v8  ;;  %v767_v56 = vld [vmem:[%s535_s28 + $0x20] sm:$0xf]  ;;  %s10731_s28 = smov 32  }
 0x190   : > { %1621 = vrot.lane.b32.xlu1 %v5814_v36, %s9985_s13  ;;  %1623 = vrot.lane.b32.xlu0 %v5828_v48, %s9985_s13 }
 0x191   : > { %5046 = vmatprep.subr.msk.mxu0 %vm2241_vm3, %v767_v56 }
 0x192   : > { %v6821_v34 = vpop.permute.xlu1 %1440  ;;  %v6823_v22 = vpop.permute.xlu0 %1442 }
 0x193   : > { %10366 = vst [vmem:[#allocation191_spill] sm:$0xff] %v6821_v34  ;;  %10367 = vst [vmem:[#allocation192_spill] sm:$0xff] %v6823_v22  ;;  %5047 = vmatpush3.msk.msra.mxu0 %vm2241_vm3, %v767_v56  ;;  %v10426_v22 = vld [vmem:[#allocation153_spill] sm:$0xff] }
 0x194   : > { %1625 = vrot.lane.b32.xlu1 %v5841_v3, %s9985_s13  ;;  %1627 = vrot.lane.b32.xlu0 %v5934_v29, %s9985_s13 }
 0x196   : > { %v6829_v45 = vpop.permute.xlu1 %1444  ;;  %v6831_v54 = vpop.permute.xlu0 %1446 }
 0x197   : > { %10368 = vst [vmem:[#allocation193_spill] sm:$0xff] %v6829_v45  ;;  %10369 = vst [vmem:[#allocation194_spill] sm:$0xff] %v6831_v54  ;;  %v10417_v54 = vld [vmem:[#allocation79_spill] sm:$0xff]  ;;  %v10422_v45 = vld [vmem:[#allocation80_spill] sm:$0xff] }
 0x198   : > { %1629 = vrot.lane.b32.xlu1 %v5948_v44, %s9985_s13  ;;  %1631 = vrot.lane.b32.xlu0 %v5957_v38, %s9985_s13 }
 0x19a   : > { %v6839_v53 = vpop.permute.xlu1 %1448  ;;  %v6841_v32 = vpop.permute.xlu0 %1450 }
 0x19b   : > { %10370 = vst [vmem:[#allocation195_spill] sm:$0xff] %v6839_v53  ;;  %10371 = vst [vmem:[#allocation196_spill] sm:$0xff] %v6841_v32 }
 0x19c   : > { %1633 = vrot.lane.b32.xlu1 %v5960_v21, %s9985_s13  ;;  %1635 = vrot.lane.b32.xlu0 %v5982_v30, %s9985_s13 }
 0x19e   : > { %v6847_v8 = vpop.permute.xlu1 %1452  ;;  %v6849_v23 = vpop.permute.xlu0 %1454 }
 0x19f   : > { %10372 = vst [vmem:[#allocation197_spill] sm:$0xff] %v6847_v8  ;;  %10373 = vst [vmem:[#allocation198_spill] sm:$0xff] %v6849_v23 }
 0x1a0   : > { %1696 = vrot.lane.b32.xlu1 %v10259_v13, %s9983_s18  ;;  %1698 = vrot.lane.b32.xlu0 %v10262_v1, %s9983_s18 }
 0x1a2   : > { %v6855_v56 = vpop.permute.xlu1 %1456  ;;  %v6857_v32 = vpop.permute.xlu0 %1458 }
 0x1a3   : > { %10374 = vst [vmem:[#allocation199_spill] sm:$0xff] %v6855_v56  ;;  %10375 = vst [vmem:[#allocation200_spill] sm:$0xff] %v6857_v32  ;;  %v10398_v56 = vld [vmem:[#allocation64_spill] sm:$0xff] }
 0x1a4   : > { %1789 = vrot.lane.b32.xlu1 %v6155_v52, %s9981_s27  ;;  %1791 = vrot.lane.b32.xlu0 %v6168_v15, %s9981_s27 }
 0x1a6   : > { %v6863_v8 = vpop.permute.xlu1 %1460  ;;  %v6865_v23 = vpop.permute.xlu0 %1462 }
 0x1a7   : > { %10376 = vst [vmem:[#allocation201_spill] sm:$0xff] %v6863_v8  ;;  %10377 = vst [vmem:[#allocation202_spill] sm:$0xff] %v6865_v23  ;;  %v10394_v8 = vld [vmem:[#allocation58_spill] sm:$0xff] }
 0x1a8   : > { %1700 = vrot.lane.b32.xlu1 %v10263_v12, %s9983_s18  ;;  %1702 = vrot.lane.b32.xlu0 %v10266_v50, %s9983_s18 }
 0x1aa   : > { %v6871_v1 = vpop.permute.xlu1 %1464  ;;  %v6873_v13 = vpop.permute.xlu0 %1466 }
 0x1ab   : > { %10378 = vst [vmem:[#allocation203_spill] sm:$0xff] %v6871_v1  ;;  %10379 = vst [vmem:[#allocation204_spill] sm:$0xff] %v6873_v13  ;;  %v10388_v1 = vld [vmem:[#allocation60_spill] sm:$0xff] }
 0x1ac   : > { %1793 = vrot.lane.b32.xlu1 %v6174_v42, %s9981_s27  ;;  %1795 = vrot.lane.b32.xlu0 %v6186_v20, %s9981_s27 }
 0x1ae   : > { %v6879_v52 = vpop.permute.xlu1 %1468  ;;  %v6881_v15 = vpop.permute.xlu0 %1507 }
 0x1af   : > { %10380 = vst [vmem:[#allocation205_spill] sm:$0xff] %v6879_v52  ;;  %v10382_v52 = vld [vmem:[#allocation56_spill] sm:$0xff] }
 0x1b0   : > { %1704 = vrot.lane.b32.xlu1 %v10267_v9, %s9983_s18  ;;  %1706 = vrot.lane.b32.xlu0 %v10270_v19, %s9983_s18 }
 0x1b2   : > { %v6887_v50 = vpop.permute.xlu1 %1509  ;;  %v6889_v12 = vpop.permute.xlu0 %1511 }
 0x1b4   : > { %1797 = vrot.lane.b32.xlu1 %v6189_v24, %s9981_s27  ;;  %1799 = vrot.lane.b32.xlu0 %v6199_v57, %s9981_s27 }
 0x1b6   : > { %v6895_v42 = vpop.permute.xlu1 %1513  ;;  %v6897_v20 = vpop.permute.xlu0 %1515 }
 0x1b8   : > { %1708 = vrot.lane.b32.xlu1 %v10271_v47, %s9983_s18  ;;  %1710 = vrot.lane.b32.xlu0 %v10274_v33, %s9983_s18 }
 0x1ba   : > { %v6903_v19 = vpop.permute.xlu1 %1517  ;;  %v6905_v9 = vpop.permute.xlu0 %1519 }
 0x1bc   : > { %1801 = vrot.lane.b32.xlu1 %v6202_v25, %s9981_s27  ;;  %1803 = vrot.lane.b32.xlu0 %v6212_v16, %s9981_s27 }
 0x1be   : > { %v6911_v24 = vpop.permute.xlu1 %1521  ;;  %v6913_v57 = vpop.permute.xlu0 %1523 }
 0x1c0   : > { %1712 = vrot.lane.b32.xlu1 %v10275_v49, %s9983_s18  ;;  %1714 = vrot.lane.b32.xlu0 %v10278_v60, %s9983_s18 }
 0x1c2   : > { %v6919_v47 = vpop.permute.xlu1 %1525  ;;  %v6921_v33 = vpop.permute.xlu0 %1527 }
 0x1c4   : > { %1805 = vrot.lane.b32.xlu1 %v6215_v6, %s9981_s27  ;;  %1807 = vrot.lane.b32.xlu0 %v6225_v46, %s9981_s27 }
 0x1c6   : > { %v6927_v25 = vpop.permute.xlu1 %1529  ;;  %v6929_v16 = vpop.permute.xlu0 %1531 }
 0x1c8   : > { %1716 = vrot.lane.b32.xlu1 %v10279_v0, %s9983_s18  ;;  %1718 = vrot.lane.b32.xlu0 %v10282_v10, %s9983_s18  ;;  %v10383_v0 = vld [vmem:[#allocation57_spill] sm:$0xff] }
 0x1ca   : > { %v6935_v49 = vpop.permute.xlu1 %1533  ;;  %v6937_v60 = vpop.permute.xlu0 %1535 }
 0x1cc   : > { %1809 = vrot.lane.b32.xlu1 %v6228_v55, %s9981_s27  ;;  %1811 = vrot.lane.b32.xlu0 %v6238_v26, %s9981_s27 }
 0x1ce   : > { %v6943_v6 = vpop.permute.xlu1 %1537  ;;  %v6945_v46 = vpop.permute.xlu0 %1539 }
 0x1cf   : > { %10381 = vst [vmem:[#allocation206_spill] sm:$0xff] %v6945_v46  ;;  %v10433_v46 = vld [vmem:[#allocation24_spill] sm:$0xff] }
 0x1d0   : > { %1720 = vrot.lane.b32.xlu1 %v10382_v52, %s9983_s18  ;;  %1722 = vrot.lane.b32.xlu0 %v10383_v0, %s9983_s18  ;;  %v10389_v52 = vld [vmem:[#allocation61_spill] sm:$0xff] }
 0x1d2   : > { %v6951_v10 = vpop.permute.xlu1 %1541  ;;  %v6953_v13 = vpop.permute.xlu0 %1543 }
 0x1d3   : > { %10384 = vst [vmem:[#allocation56_spill] sm:$0xff] %v6951_v10  ;;  %10385 = vst [vmem:[#allocation57_spill] sm:$0xff] %v6953_v13  ;;  %v10425_v13 = vld [vmem:[#allocation152_spill] sm:$0xff] }
 0x1d4   : > { %1813 = vrot.lane.b32.xlu1 %v10335_v37, %s9981_s27  ;;  %1815 = vrot.lane.b32.xlu0 %v6250_v7, %s9981_s27 }
 0x1d6   : > { %v6959_v55 = vpop.permute.xlu1 %1545  ;;  %v6961_v26 = vpop.permute.xlu0 %1547 }
 0x1d7   : > { %10386 = vst [vmem:[#allocation207_spill] sm:$0xff] %v6959_v55  ;;  %10387 = vst [vmem:[#allocation208_spill] sm:$0xff] %v6961_v26  ;;  %v10415_v26 = vld [vmem:[#allocation72_spill] sm:$0xff] }
 0x1d8   : > { %1724 = vrot.lane.b32.xlu1 %v10388_v1, %s9983_s18  ;;  %1726 = vrot.lane.b32.xlu0 %v10389_v52, %s9983_s18  ;;  %v10395_v1 = vld [vmem:[#allocation63_spill] sm:$0xff]  ;;  %v10421_v55 = vld [vmem:[#allocation76_spill] sm:$0xff] }
 0x1da   : > { %v6967_v0 = vpop.permute.xlu1 %1549  ;;  %v6969_v23 = vpop.permute.xlu0 %1551 }
 0x1db   : > { %10390 = vst [vmem:[#allocation60_spill] sm:$0xff] %v6967_v0  ;;  %10391 = vst [vmem:[#allocation61_spill] sm:$0xff] %v6969_v23  ;;  %v10413_v0 = vld [vmem:[#allocation96_spill] sm:$0xff] }
 0x1dc   : > { %1817 = vrot.lane.b32.xlu1 %v10338_v5, %s9981_s27  ;;  %1819 = vrot.lane.b32.xlu0 %v6264_v35, %s9981_s27 }
 0x1de   : > { %v6975_v7 = vpop.permute.xlu1 %1553  ;;  %v6977_v37 = vpop.permute.xlu0 %1555 }
 0x1df   : > { %10392 = vst [vmem:[#allocation209_spill] sm:$0xff] %v6975_v7  ;;  %10393 = vst [vmem:[#allocation210_spill] sm:$0xff] %v6977_v37  ;;  %v10401_v37 = vld [vmem:[#allocation62_spill] sm:$0xff] }
 0x1e0   : > { %1637 = vrot.lane.b32.xlu1 %v10394_v8, %s9985_s13  ;;  %1728 = vrot.lane.b32.xlu0 %v10395_v1, %s9983_s18 }
 0x1e2   : > { %v6983_v52 = vpop.permute.xlu1 %1557  ;;  %v6985_v32 = vpop.permute.xlu0 %1559 }
 0x1e3   : > { %10396 = vst [vmem:[#allocation63_spill] sm:$0xff] %v6983_v52  ;;  %10397 = vst [vmem:[#allocation211_spill] sm:$0xff] %v6985_v32  ;;  %v10404_v32 = vld [vmem:[#allocation65_spill] sm:$0xff] }
 0x1e4   : > { %1730 = vrot.lane.b32.xlu1 %v10398_v56, %s9983_s18  ;;  %1821 = vrot.lane.b32.xlu0 %v10341_v27, %s9981_s27  ;;  %v10405_v56 = vld [vmem:[#allocation70_spill] sm:$0xff] }
 0x1e6   : > { %v6991_v35 = vpop.permute.xlu1 %1561  ;;  %v6993_v5 = vpop.permute.xlu0 %1563 }
 0x1e7   : > { %10399 = vst [vmem:[#allocation64_spill] sm:$0xff] %v6991_v35  ;;  %10400 = vst [vmem:[#allocation212_spill] sm:$0xff] %v6993_v5  ;;  %v10407_v5 = vld [vmem:[#allocation71_spill] sm:$0xff] }
 0x1e8   : > { %1823 = vrot.lane.b32.xlu1 %v10344_v41, %s9981_s27  ;;  %1639 = vrot.lane.b32.xlu0 %v10401_v37, %s9985_s13 }
 0x1ea   : > { %v6999_v1 = vpop.permute.xlu1 %1565  ;;  %v7001_v52 = vpop.permute.xlu0 %1567 }
 0x1eb   : > { %10402 = vst [vmem:[#allocation213_spill] sm:$0xff] %v6999_v1  ;;  %10403 = vst [vmem:[#allocation214_spill] sm:$0xff] %v7001_v52  ;;  %v10408_v52 = vld [vmem:[#allocation67_spill] sm:$0xff] }
 0x1ec   : > { %1641 = vrot.lane.b32.xlu1 %v10404_v32, %s9985_s13  ;;  %1732 = vrot.lane.b32.xlu0 %v10405_v56, %s9983_s18  ;;  %v10411_v32 = vld [vmem:[#allocation75_spill] sm:$0xff] }
 0x1ee   : > { %v7007_v27 = vpop.permute.xlu1 %1569  ;;  %v1604_v35 = vpop.permute.xlu0 %1603 }
 0x1ef   : > { %10406 = vst [vmem:[#allocation70_spill] sm:$0xff] %v7007_v27  ;;  %v10409_v27 = vld [vmem:[#allocation66_spill] sm:$0xff] }
 0x1f0   : > { %1734 = vrot.lane.b32.xlu1 %v10407_v5, %s9983_s18  ;;  %1825 = vrot.lane.b32.xlu0 %v10345_v28, %s9981_s27  ;;  %v10410_v5 = vld [vmem:[#allocation74_spill] sm:$0xff] }
 0x1f2   : > { %v1606_v41 = vpop.permute.xlu1 %1605  ;;  %v7013_v7 = vpop.permute.xlu0 %1607 }
 0x1f4   : > { %1827 = vrot.lane.b32.xlu1 %v6290_v43, %s9981_s27  ;;  %1643 = vrot.lane.b32.xlu0 %v10408_v52, %s9985_s13  ;;  %v10412_v43 = vld [vmem:[#allocation95_spill] sm:$0xff] }
 0x1f6   : > { %v7019_v1 = vpop.permute.xlu1 %1609  ;;  %v7021_v56 = vpop.permute.xlu0 %1611 }
 0x1f8   : > { %1645 = vrot.lane.b32.xlu1 %v10409_v27, %s9985_s13  ;;  %1736 = vrot.lane.b32.xlu0 %v10410_v5, %s9983_s18  ;;  %v10414_v27 = vld [vmem:[#allocation73_spill] sm:$0xff] }
 0x1fa   : > { %v7027_v28 = vpop.permute.xlu1 %1613  ;;  %v7029_v23 = vpop.permute.xlu0 %1615 }
 0x1fc   : > { %1738 = vrot.lane.b32.xlu1 %v10411_v32, %s9983_s18  ;;  %1829 = vrot.lane.b32.xlu0 %v10412_v43, %s9981_s27  ;;  %v10416_v32 = vld [vmem:[#allocation78_spill] sm:$0xff] }
 0x1fe   : > { %v7035_v52 = vpop.permute.xlu1 %1617  ;;  %v7037_v37 = vpop.permute.xlu0 %1619 }
 0x200   : > { %1831 = vrot.lane.b32.xlu1 %v10413_v0, %s9981_s27  ;;  %1647 = vrot.lane.b32.xlu0 %v10414_v27, %s9985_s13 }
 0x202   : > { %v7043_v5 = vpop.permute.xlu1 %1621  ;;  %v7045_v53 = vpop.permute.xlu0 %1623 }
 0x204   : > { %1649 = vrot.lane.b32.xlu1 %v10415_v26, %s9985_s13  ;;  %1740 = vrot.lane.b32.xlu0 %v10416_v32, %s9983_s18  ;;  %v10418_v26 = vld [vmem:[#allocation77_spill] sm:$0xff] }
 0x206   : > { %v7051_v43 = vpop.permute.xlu1 %1625  ;;  %v7053_v8 = vpop.permute.xlu0 %1627 }
 0x208   : > { %1742 = vrot.lane.b32.xlu1 %v10417_v54, %s9983_s18  ;;  %1833 = vrot.lane.b32.xlu0 %v10351_v63, %s9981_s27  ;;  %v10420_v54 = vld [vmem:[#allocation98_spill] sm:$0xff] }
 0x209   : > { %v1883_v63 = vsel %vm1882_vm4, 0.0, %v10420_v54 }
 0x20a   : > { %v7059_v0 = vpop.permute.xlu1 %1629  ;;  %v7061_v27 = vpop.permute.xlu0 %1631 }
 0x20c   : > { %1835 = vrot.lane.b32.xlu1 %v6318_v14, %s9981_s27  ;;  %1651 = vrot.lane.b32.xlu0 %v10418_v26, %s9985_s13  ;;  %v10423_v14 = vld [vmem:[#allocation131_spill] sm:$0xff] }
 0x20d   : > { %v7079_v26 = vsel %vm1914_vm5, %v1883_v63, %v10423_v14  ;;  %v10428_v14 = vld [vmem:[#allocation81_spill] sm:$0xff] }
 0x20e   : > { %v7067_v32 = vpop.permute.xlu1 %1633  ;;  %v7069_v30 = vpop.permute.xlu0 %1635  ;;  %10424 = vst [vmem:[#allocation74_spill] sm:$0xff] %v7079_v26  ;;  %v1947_v21 = vsel %vm1946_vm6, %v7079_v26, %v10425_v13  ;;  %v1948_v54 = vsel %vm1946_vm6, %v7079_v26, %v10426_v22  ;;  %v10429_v22 = vld [vmem:[#allocation99_spill] sm:$0xff] }
 0x20f   : > { %10419 = vst [vmem:[#allocation71_spill] sm:$0xff] %v7069_v30  ;;  %v10432_v30 = vld [vmem:[#allocation101_spill] sm:$0xff] }
 0x210   : > { %1653 = vrot.lane.b32.xlu1 %v10421_v55, %s9985_s13  ;;  %1744 = vrot.lane.b32.xlu0 %v10422_v45, %s9983_s18  ;;  %v10427_v55 = vld [vmem:[#allocation179_spill] sm:$0xff]  ;;  %v1981_v45 = vsel %vm1979_vm7, %v1948_v54, %v6744_v59 }
 0x211   : > { %v1980_v34 = vsel %vm1979_vm7, %v1947_v21, %v10427_v55  ;;  %v2014_v13 = vsel %vm2012_vm8, %v1981_v45, %v6887_v50  ;;  %v10430_v45 = vld [vmem:[#allocation100_spill] sm:$0xff] }
 0x212   : > { %v1697_v38 = vpop.permute.xlu1 %1696  ;;  %v1699_v10 = vpop.permute.xlu0 %1698  ;;  %v2013_v63 = vsel %vm2012_vm8, %v1980_v34, %v6881_v15  ;;  %v2047_v21 = vsel %vm2045_vm9, %v2014_v13, %v1606_v41  ;;  %v10436_v41 = vld [vmem:[#allocation134_spill] sm:$0xff] }
 0x213   : > { %v2046_v26 = vsel %vm2045_vm9, %v2013_v63, %v1604_v35  ;;  %v2080_v55 = vsel %vm2078_vm10, %v2047_v21, %v1699_v10  ;;  %v1884_v35 = vsel %vm1882_vm4, %v10433_v46, %v10432_v30  ;;  %v10435_v10 = vld [vmem:[#allocation132_spill] sm:$0xff]  ;;  %v10437_v13 = vld [vmem:[#allocation154_spill] sm:$0xff] }
 0x214   : > { %1746 = vrot.lane.b32.xlu1 %v10428_v14, %s9983_s18  ;;  %1837 = vrot.lane.b32.xlu0 %v10429_v22, %s9981_s27  ;;  %v2079_v59 = vsel %vm2078_vm10, %v2046_v26, %v1697_v38  ;;  %v10431_v14 = vld [vmem:[#allocation26_spill] sm:$0xff]  ;;  %v1916_v26 = vsel %vm1914_vm5, %v1884_v35, %v10435_v10 }
 0x215   : > { %v1885_v22 = vsel %vm1882_vm4, %v10431_v14, %v10430_v45  ;;  %v10434_v38 = vld [vmem:[#allocation82_spill] sm:$0xff]  ;;  %v1949_v21 = vsel %vm1946_vm6, %v1916_v26, %v10437_v13  ;;  %v10440_v14 = vld [vmem:[#allocation83_spill] sm:$0xff] }
 0x216   : > { %v1790_v54 = vpop.permute.xlu1 %1789  ;;  %v1792_v34 = vpop.permute.xlu0 %1791  ;;  %v1917_v63 = vsel %vm1914_vm5, %v1885_v22, %v10436_v41  ;;  %v10441_v22 = vld [vmem:[#allocation84_spill] sm:$0xff] }
 0x217   : > { %v2113_v15 = vsel %vm2111_vm11, %v2080_v55, %v1792_v34  ;;  %v2112_v50 = vsel %vm2111_vm11, %v2079_v59, %v1790_v54  ;;  %v10438_v59 = vld [vmem:[#allocation156_spill] sm:$0xff] }
 0x218   : > { %1839 = vrot.lane.b32.xlu1 %v6334_v62, %s9981_s27  ;;  %1655 = vrot.lane.b32.xlu0 %v10434_v38, %s9985_s13  ;;  %v1950_v30 = vsel %vm1946_vm6, %v1917_v63, %v10438_v59  ;;  %v10439_v55 = vld [vmem:[#allocation180_spill] sm:$0xff]  ;;  %v10442_v63 = vld [vmem:[#allocation103_spill] sm:$0xff]  ;;  %v10445_v59 = vld [vmem:[#allocation102_spill] sm:$0xff] }
 0x219   : > { %5048 = vmatprep.mubr.msk.f32.mxu0 %vm2144_vm12, %v2112_v50  ;;  %v1982_v54 = vsel %vm1979_vm7, %v1949_v21, %v10439_v55  ;;  %v1983_v34 = vsel %vm1979_vm7, %v1950_v30, %v6756_v51  ;;  %v1886_v13 = vsel %vm1882_vm4, %v5724_v61, %v10442_v63  ;;  %v10443_v21 = vld [vmem:[#allocation104_spill] sm:$0xff]  ;;  %v10446_v30 = vld [vmem:[#allocation135_spill] sm:$0xff] }
 0x21a   : > { %5049 = vmatmul.mubr.msk.f32.vlgmr.msra.gmra.mrb[0].mxu0 %vm2144_vm12, %v2113_v15  ;;  %v1701_v62 = vpop.permute.xlu1 %1700  ;;  %v1703_v46 = vpop.permute.xlu0 %1702  ;;  %v2015_v45 = vsel %vm2012_vm8, %v1982_v54, %v6889_v12  ;;  %v2016_v50 = vsel %vm2012_vm8, %v1983_v34, %v6895_v42  ;;  %v10448_v54 = vld [vmem:[#allocation157_spill] sm:$0xff]  ;;  %v10449_v34 = vld [vmem:[#allocation159_spill] sm:$0xff] }
 0x21b   : > { %v2048_v15 = vsel %vm2045_vm9, %v2015_v45, %v7013_v7  ;;  %v2049_v35 = vsel %vm2045_vm9, %v2016_v50, %v7019_v1  ;;  %v1887_v7 = vsel %vm1882_vm4, %v5727_v4, %v10443_v21  ;;  %v10444_v1 = vld [vmem:[#allocation85_spill] sm:$0xff]  ;;  %v10454_v21 = vld [vmem:[#allocation155_spill] sm:$0xff] }
 0x21c   : > { %1657 = vrot.lane.b32.xlu1 %v10440_v14, %s9985_s13  ;;  %1748 = vrot.lane.b32.xlu0 %v10441_v22, %s9983_s18  ;;  %v2081_v51 = vsel %vm2078_vm10, %v2048_v15, %v1701_v62  ;;  %v2082_v10 = vsel %vm2078_vm10, %v2049_v35, %v1703_v46  ;;  %v1918_v62 = vsel %vm1914_vm5, %v1886_v13, %v10446_v30  ;;  %v10447_v46 = vld [vmem:[#allocation137_spill] sm:$0xff]  ;;  %v10452_v13 = vld [vmem:[#allocation106_spill] sm:$0xff] }
 0x21d   : > { %v1919_v55 = vsel %vm1914_vm5, %v1887_v7, %v10447_v46  ;;  %v1951_v61 = vsel %vm1946_vm6, %v1918_v62, %v10448_v54  ;;  %v10455_v7 = vld [vmem:[#allocation138_spill] sm:$0xff]  ;;  %v10457_v62 = vld [vmem:[#allocation160_spill] sm:$0xff]  ;;  %v10458_v46 = vld [vmem:[#allocation87_spill] sm:$0xff] }
 0x21e   : > { %v1794_v12 = vpop.permute.xlu1 %1793  ;;  %v1796_v26 = vpop.permute.xlu0 %1795  ;;  %v1952_v4 = vsel %vm1946_vm6, %v1919_v55, %v10449_v34  ;;  %v1984_v22 = vsel %vm1979_vm7, %v1951_v61, %v6758_v2 }
 0x21f   : > { %v2114_v42 = vsel %vm2111_vm11, %v2081_v51, %v1794_v12  ;;  %v2115_v41 = vsel %vm2111_vm11, %v2082_v10, %v1796_v26  ;;  %v1985_v15 = vsel %vm1979_vm7, %v1952_v4, %v6767_v40  ;;  %v2017_v35 = vsel %vm2012_vm8, %v1984_v22, %v6897_v20  ;;  %v10450_v10 = vld [vmem:[#allocation133_spill] sm:$0xff] }
 0x220   : > { %1750 = vrot.lane.b32.xlu1 %v10444_v1, %s9983_s18  ;;  %1841 = vrot.lane.b32.xlu0 %v10445_v59, %s9981_s27  ;;  %v2018_v51 = vsel %vm2012_vm8, %v1985_v15, %v6903_v19  ;;  %v2050_v12 = vsel %vm2045_vm9, %v2017_v35, %v7021_v56  ;;  %v1889_v56 = vsel %vm1882_vm4, %v5746_v17, %v10452_v13  ;;  %v10456_v59 = vld [vmem:[#allocation139_spill] sm:$0xff]  ;;  %v10460_v22 = vld [vmem:[#allocation181_spill] sm:$0xff] }
 0x221   : > { %5051 = vmatprep.mubr.msk.f32.mxu0 %vm2144_vm12, %v2114_v42  ;;  %v2051_v2 = vsel %vm2045_vm9, %v2018_v51, %v7027_v28  ;;  %v10453_v28 = vld [vmem:[#allocation136_spill] sm:$0xff]  ;;  %v1921_v30 = vsel %vm1914_vm5, %v1889_v56, %v10456_v59  ;;  %v10469_v13 = vld [vmem:[#allocation161_spill] sm:$0xff]  ;;  %v10471_v59 = vld [vmem:[#allocation183_spill] sm:$0xff] }
 0x222   : > { %5052 = vmatmul.mubr.msk.f32.gmra.mrb[2].mxu0 %vm2144_vm12, %v2115_v41  ;;  %v1705_v45 = vpop.permute.xlu1 %1704  ;;  %v1707_v50 = vpop.permute.xlu0 %1706  ;;  %v1954_v17 = vsel %vm1946_vm6, %v1921_v30, %v10458_v46 }
 0x223   : > { %v2083_v40 = vsel %vm2078_vm10, %v2050_v12, %v1705_v45  ;;  %v2084_v26 = vsel %vm2078_vm10, %v2051_v2, %v1707_v50  ;;  %v1987_v34 = vsel %vm1979_vm7, %v1954_v17, %v6775_v39  ;;  %v10459_v50 = vld [vmem:[#allocation158_spill] sm:$0xff]  ;;  %v10461_v12 = vld [vmem:[#allocation107_spill] sm:$0xff]  ;;  %v10462_v2 = vld [vmem:[#allocation29_spill] sm:$0xff] }
 0x224   : > { %1843 = vrot.lane.b32.xlu1 %v6349_v11, %s9981_s27  ;;  %1659 = vrot.lane.b32.xlu0 %v10450_v10, %s9985_s13  ;;  %v10451_v11 = vld [vmem:[#allocation105_spill] sm:$0xff]  ;;  %v2020_v45 = vsel %vm2012_vm8, %v1987_v34, %v6911_v24 }
 0x225   : > { %v1888_v63 = vsel %vm1882_vm4, %v5749_v18, %v10451_v11  ;;  %v10468_v11 = vld [vmem:[#allocation27_spill] sm:$0xff] }
 0x226   : > { %v1798_v20 = vpop.permute.xlu1 %1797  ;;  %v1800_v42 = vpop.permute.xlu0 %1799  ;;  %v1920_v1 = vsel %vm1914_vm5, %v1888_v63, %v10455_v7 }
 0x227   : > { %v2116_v19 = vsel %vm2111_vm11, %v2083_v40, %v1798_v20  ;;  %v2117_v41 = vsel %vm2111_vm11, %v2084_v26, %v1800_v42  ;;  %v1953_v18 = vsel %vm1946_vm6, %v1920_v1, %v10457_v62  ;;  %v1890_v40 = vsel %vm1882_vm4, %v10462_v2, %v10461_v12  ;;  %v10463_v26 = vld [vmem:[#allocation108_spill] sm:$0xff]  ;;  %v10481_v12 = vld [vmem:[#allocation163_spill] sm:$0xff] }
 0x228   : > { %1661 = vrot.lane.b32.xlu1 %v10453_v28, %s9985_s13  ;;  %1752 = vrot.lane.b32.xlu0 %v10454_v21, %s9983_s18  ;;  %v1986_v61 = vsel %vm1979_vm7, %v1953_v18, %v6769_v31  ;;  %v2053_v31 = vsel %vm2045_vm9, %v2020_v45, %v7035_v52  ;;  %v10464_v20 = vld [vmem:[#allocation32_spill] sm:$0xff]  ;;  %v10465_v52 = vld [vmem:[#allocation182_spill] sm:$0xff]  ;;  %v10466_v42 = vmov 0.0  }
 0x229   : > { %5054 = vmatprep.mubr.msk.f32.mxu0 %vm2144_vm12, %v2116_v19  ;;  %v2019_v4 = vsel %vm2012_vm8, %v1986_v61, %v6905_v9  ;;  %v10467_v19 = vld [vmem:[#allocation140_spill] sm:$0xff]  ;;  %v10470_v28 = vld [vmem:[#allocation162_spill] sm:$0xff] }
 0x22a   : > { %5055 = vmatmul.mubr.msk.f32.gmra.mrb[4].mxu0 %vm2144_vm12, %v2117_v41  ;;  %v1709_v55 = vpop.permute.xlu1 %1708  ;;  %v1711_v54 = vpop.permute.xlu0 %1710  ;;  %v2052_v15 = vsel %vm2045_vm9, %v2019_v4, %v7029_v23  ;;  %v1891_v23 = vsel %vm1882_vm4, %v10464_v20, %v10463_v26  ;;  %v1922_v41 = vsel %vm1914_vm5, %v1890_v40, %v10467_v19  ;;  %v10472_v62 = vld [vmem:[#allocation184_spill] sm:$0xff]  ;;  %v10484_v19 = vld [vmem:[#allocation186_spill] sm:$0xff] }
 0x22b   : > { %v2085_v39 = vsel %vm2078_vm10, %v2052_v15, %v1709_v55  ;;  %v2086_v35 = vsel %vm2078_vm10, %v2053_v31, %v1711_v54  ;;  %v1923_v63 = vsel %vm1914_vm5, %v1891_v23, %v10468_v11  ;;  %v1955_v56 = vsel %vm1946_vm6, %v1922_v41, %v10469_v13  ;;  %v10473_v55 = vld [vmem:[#allocation6_spill] sm:$0xff]  ;;  %v10475_v15 = vld [vmem:[#allocation109_spill] sm:$0xff]  ;;  %v10482_v40 = vld [vmem:[#allocation164_spill] sm:$0xff] }
 0x22c   : > { %1754 = vrot.lane.b32.xlu1 %v10459_v50, %s9983_s18  ;;  %1845 = vrot.lane.b32.xlu0 %v10460_v22, %s9981_s27  ;;  %v1956_v21 = vsel %vm1946_vm6, %v1923_v63, %v10470_v28  ;;  %v1988_v30 = vsel %vm1979_vm7, %v1955_v56, %v10471_v59  ;;  %v10474_v54 = vld [vmem:[#allocation86_spill] sm:$0xff]  ;;  %v10476_v31 = vld [vmem:[#allocation33_spill] sm:$0xff] }
 0x22d   : > { %v1989_v18 = vsel %vm1979_vm7, %v1956_v21, %v10472_v62  ;;  %v2021_v46 = vsel %vm2012_vm8, %v1988_v30, %v6913_v57  ;;  %v10486_v62 = vld [vmem:[#allocation35_spill] sm:$0xff] }
 0x22e   : > { %v1802_v9 = vpop.permute.xlu1 %1801  ;;  %v1804_v51 = vpop.permute.xlu0 %1803  ;;  %v2022_v17 = vsel %vm2012_vm8, %v1989_v18, %v6919_v47  ;;  %v2054_v61 = vsel %vm2045_vm9, %v2021_v46, %v7037_v37  ;;  %v10487_v18 = vld [vmem:[#allocation112_spill] sm:$0xff] }
 0x22f   : > { %v2118_v24 = vsel %vm2111_vm11, %v2085_v39, %v1802_v9  ;;  %v2119_v10 = vsel %vm2111_vm11, %v2086_v35, %v1804_v51  ;;  %v2055_v34 = vsel %vm2045_vm9, %v2022_v17, %v7043_v5  ;;  %v1892_v39 = vsel %vm1882_vm4, %v10476_v31, %v10475_v15  ;;  %v10477_v35 = vld [vmem:[#allocation110_spill] sm:$0xff]  ;;  %v10479_v5 = vld [vmem:[#allocation141_spill] sm:$0xff]  ;;  %v10489_v17 = vld [vmem:[#allocation31_spill] sm:$0xff] }
 0x230   : > { %1847 = vrot.lane.b32.xlu1 %v10465_v52, %s9981_s27  ;;  %1663 = vrot.lane.b32.xlu0 %v10466_v42, %s9985_s13  ;;  %v10478_v9 = vld [vmem:[#allocation34_spill] sm:$0xff]  ;;  %v1924_v51 = vsel %vm1914_vm5, %v1892_v39, %v10479_v5  ;;  %v10483_v52 = vld [vmem:[#allocation185_spill] sm:$0xff]  ;;  %s10722_s13 = smov 20  }
 0x231   : > { %5057 = vmatprep.mubr.msk.f32.mxu0 %vm2144_vm12, %v2118_v24  ;;  %v1893_v37 = vsel %vm1882_vm4, %v10478_v9, %v10477_v35  ;;  %v10480_v24 = vld [vmem:[#allocation28_spill] sm:$0xff]  ;;  %v1957_v2 = vsel %vm1946_vm6, %v1924_v51, %v10481_v12  ;;  %v10495_v12 = vld [vmem:[#allocation114_spill] sm:$0xff] }
 0x232   : > { %5058 = vmatmul.mubr.msk.f32.gmra.mrb[6].mxu0 %vm2144_vm12, %v2119_v10  ;;  %v1713_v7 = vpop.permute.xlu1 %1712  ;;  %v1715_v1 = vpop.permute.xlu0 %1714  ;;  %v1925_v10 = vsel %vm1914_vm5, %v1893_v37, %v10480_v24  ;;  %v1990_v42 = vsel %vm1979_vm7, %v1957_v2, %v10483_v52  ;;  %v10499_v52 = vld [vmem:[#allocation168_spill] sm:$0xff] }
 0x233   : > { %v2087_v4 = vsel %vm2078_vm10, %v2054_v61, %v1713_v7  ;;  %v2088_v45 = vsel %vm2078_vm10, %v2055_v34, %v1715_v1  ;;  %v1958_v26 = vsel %vm1946_vm6, %v1925_v10, %v10482_v40  ;;  %v2023_v11 = vsel %vm2012_vm8, %v1990_v42, %v6921_v33  ;;  %v10485_v33 = vld [vmem:[#allocation111_spill] sm:$0xff]  ;;  %v10491_v34 = vld [vmem:[#allocation166_spill] sm:$0xff]  ;;  %v10497_v40 = vld [vmem:[#allocation37_spill] sm:$0xff] }
 0x234   : > { %1756 = vrot.lane.b32.xlu1 %v10473_v55, %s9983_s18  ;;  %1849 = vrot.lane.b32.xlu0 %v10474_v54, %s9981_s27  ;;  %v1991_v41 = vsel %vm1979_vm7, %v1958_v26, %v10484_v19  ;;  %v2056_v13 = vsel %vm2045_vm9, %v2023_v11, %v7045_v53  ;;  %v1895_v53 = vsel %vm1882_vm4, %v5814_v36, %v10487_v18  ;;  %v10490_v54 = vld [vmem:[#allocation165_spill] sm:$0xff]  ;;  %s7620_s27 = scalar_lea.vmem %s9822_s6, %s5555_s15  ;;  %s10728_s18 = smov 28  }
 0x235   : > { %v2024_v63 = vsel %vm2012_vm8, %v1991_v41, %v6927_v25  ;;  %v1894_v25 = vsel %vm1882_vm4, %v10486_v62, %v10485_v33  ;;  %v1927_v55 = vsel %vm1914_vm5, %v1895_v53, %v10489_v17  ;;  %v10500_v41 = vld [vmem:[#allocation189_spill] sm:$0xff]  ;;  %v10504_v53 = vld [vmem:[#allocation190_spill] sm:$0xff] }
 0x236   : > { %v1806_v57 = vpop.permute.xlu1 %1805  ;;  %v1808_v50 = vpop.permute.xlu0 %1807  ;;  %v2057_v56 = vsel %vm2045_vm9, %v2024_v63, %v7051_v43  ;;  %v10488_v43 = vld [vmem:[#allocation30_spill] sm:$0xff] }
 0x237   : > { %v2120_v47 = vsel %vm2111_vm11, %v2087_v4, %v1806_v57  ;;  %v2121_v22 = vsel %vm2111_vm11, %v2088_v45, %v1808_v50  ;;  %v1926_v46 = vsel %vm1914_vm5, %v1894_v25, %v10488_v43  ;;  %v1960_v4 = vsel %vm1946_vm6, %v1927_v55, %v10491_v34  ;;  %v10492_v50 = vld [vmem:[#allocation187_spill] sm:$0xff] }
 0x238   : > { %5060 = vmatprep.mubr.msk.f32.mxu0 %vm2144_vm12, %v2120_v47  ;;  %v1959_v61 = vsel %vm1946_vm6, %v1926_v46, %v10490_v54  ;;  %v10493_v47 = vld [vmem:[#allocation188_spill] sm:$0xff]  ;;  %v10507_v54 = vld [vmem:[#allocation39_spill] sm:$0xff] }
 0x239   : > { %5061 = vmatmul.mubr.msk.f32.gmra.mrb[8].mxu0 %vm2144_vm12, %v2121_v22  ;;  %v1992_v36 = vsel %vm1979_vm7, %v1959_v61, %v10492_v50  ;;  %v1993_v22 = vsel %vm1979_vm7, %v1960_v4, %v10493_v47  ;;  %v10505_v46 = vld [vmem:[#allocation116_spill] sm:$0xff]  ;;  %v10508_v34 = vld [vmem:[#allocation71_spill] sm:$0xff] }
 0x23a   : > { %v1717_v20 = vpop.permute.xlu1 %1716  ;;  %v1719_v23 = vpop.permute.xlu0 %1718  ;;  %v2025_v15 = vsel %vm2012_vm8, %v1992_v36, %v6929_v16  ;;  %v2026_v31 = vsel %vm2012_vm8, %v1993_v22, %v6935_v49  ;;  %v10494_v16 = vld [vmem:[#allocation113_spill] sm:$0xff]  ;;  %v1899_v17 = vsel %vm1882_vm4, %v5948_v44, %v10505_v46  ;;  %v10510_v22 = vld [vmem:[#allocation191_spill] sm:$0xff] }
 0x23b   : > { %v2089_v28 = vsel %vm2078_vm10, %v2056_v13, %v1717_v20  ;;  %v2090_v21 = vsel %vm2078_vm10, %v2057_v56, %v1719_v23  ;;  %v2058_v39 = vsel %vm2045_vm9, %v2025_v15, %v7053_v8  ;;  %v2059_v35 = vsel %vm2045_vm9, %v2026_v31, %v7059_v0  ;;  %v10496_v0 = vld [vmem:[#allocation36_spill] sm:$0xff]  ;;  %v10498_v20 = vld [vmem:[#allocation167_spill] sm:$0xff]  ;;  %v10527_v46 = vld [vmem:[#allocation173_spill] sm:$0xff] }
 0x23c   : > { %v1896_v49 = vsel %vm1882_vm4, %v5828_v48, %v10494_v16  ;;  %v1897_v8 = vsel %vm1882_vm4, %v5841_v3, %v10495_v12  ;;  %v1931_v61 = vsel %vm1914_vm5, %v1899_v17, %v10507_v54  ;;  %v10511_v31 = vld [vmem:[#allocation56_spill] sm:$0xff]  ;;  %v10528_v54 = vld [vmem:[#allocation194_spill] sm:$0xff] }
 0x23d   : > { %v1928_v2 = vsel %vm1914_vm5, %v1896_v49, %v10496_v0  ;;  %v1929_v26 = vsel %vm1914_vm5, %v1897_v8, %v10497_v40  ;;  %v10514_v49 = vld [vmem:[#allocation40_spill] sm:$0xff]  ;;  %v10515_v8 = vld [vmem:[#allocation171_spill] sm:$0xff] }
 0x23e   : > { %v1810_v7 = vpop.permute.xlu1 %1809  ;;  %v1812_v1 = vpop.permute.xlu0 %1811  ;;  %v1961_v23 = vsel %vm1946_vm6, %v1928_v2, %v10498_v20  ;;  %v1962_v48 = vsel %vm1946_vm6, %v1929_v26, %v10499_v52  ;;  %v10516_v26 = vld [vmem:[#allocation192_spill] sm:$0xff]  ;;  %v10518_v52 = vld [vmem:[#allocation55_spill] sm:$0xff] }
 0x23f   : > { %v2122_v59 = vsel %vm2111_vm11, %v2089_v28, %v1810_v7  ;;  %v2123_v30 = vsel %vm2111_vm11, %v2090_v21, %v1812_v1  ;;  %v1994_v3 = vsel %vm1979_vm7, %v1961_v23, %v10500_v41  ;;  %v1995_v11 = vsel %vm1979_vm7, %v1962_v48, %v6813_v58  ;;  %v10517_v23 = vld [vmem:[#allocation118_spill] sm:$0xff] }
 0x240   : > { %5063 = vmatprep.mubr.msk.f32.mxu0 %vm2144_vm12, %v2122_v59  ;;  %v2027_v63 = vsel %vm2012_vm8, %v1994_v3, %v6937_v60  ;;  %v2028_v13 = vsel %vm2012_vm8, %v1995_v11, %v6943_v6  ;;  %v10501_v60 = vld [vmem:[#allocation115_spill] sm:$0xff]  ;;  %v1901_v48 = vsel %vm1882_vm4, %v10518_v52, %v10517_v23  ;;  %v10520_v41 = vld [vmem:[#allocation42_spill] sm:$0xff] }
 0x241   : > { %5064 = vmatmul.mubr.msk.f32.gmra.mrb[10].mxu0 %vm2144_vm12, %v2123_v30  ;;  %v2060_v56 = vsel %vm2045_vm9, %v2027_v63, %v7061_v27  ;;  %v2061_v28 = vsel %vm2045_vm9, %v2028_v13, %v7067_v32  ;;  %v1898_v6 = vsel %vm1882_vm4, %v5934_v29, %v10501_v60  ;;  %v10502_v27 = vld [vmem:[#allocation38_spill] sm:$0xff]  ;;  %v10503_v32 = vld [vmem:[#allocation169_spill] sm:$0xff]  ;;  %v1933_v3 = vsel %vm1914_vm5, %v1901_v48, %v10520_v41  ;;  %v10521_v63 = vld [vmem:[#allocation172_spill] sm:$0xff] }
 0x242   : > { %v1721_v45 = vpop.permute.xlu1 %1720  ;;  %v1723_v57 = vpop.permute.xlu0 %1722  ;;  %v1930_v33 = vsel %vm1914_vm5, %v1898_v6, %v10502_v27  ;;  %v10506_v29 = vld [vmem:[#allocation206_spill] sm:$0xff]  ;;  %v1966_v13 = vsel %vm1946_vm6, %v1933_v3, %v10521_v63 }
 0x243   : > { %v2091_v9 = vsel %vm2078_vm10, %v2058_v39, %v1721_v45  ;;  %v2092_v37 = vsel %vm2078_vm10, %v2059_v35, %v1723_v57  ;;  %v1963_v62 = vsel %vm1946_vm6, %v1930_v33, %v10503_v32  ;;  %v10509_v45 = vld [vmem:[#allocation170_spill] sm:$0xff] }
 0x244   : > { %v1996_v43 = vsel %vm1979_vm7, %v1963_v62, %v10504_v53  ;;  %v1964_v57 = vsel %vm1946_vm6, %v1931_v61, %v10509_v45  ;;  %v10524_v62 = vld [vmem:[#allocation119_spill] sm:$0xff]  ;;  %v10526_v53 = vld [vmem:[#allocation50_spill] sm:$0xff] }
 0x245   : > { %v2029_v55 = vsel %vm2012_vm8, %v1996_v43, %v10506_v29  ;;  %v1997_v15 = vsel %vm1979_vm7, %v1964_v57, %v10510_v22  ;;  %v10531_v57 = vld [vmem:[#allocation208_spill] sm:$0xff]  ;;  %v10539_v23 = vld [vmem:[#allocation174_spill] sm:$0xff] }
 0x246   : > { %v1814_v5 = vpop.permute.xlu1 %1813  ;;  %v1816_v51 = vpop.permute.xlu0 %1815  ;;  %v2062_v4 = vsel %vm2045_vm9, %v2029_v55, %v10508_v34  ;;  %v2030_v39 = vsel %vm2012_vm8, %v1997_v15, %v10511_v31  ;;  %v10529_v34 = vld [vmem:[#allocation120_spill] sm:$0xff]  ;;  %v10533_v15 = vld [vmem:[#allocation90_spill] sm:$0xff] }
 0x247   : > { %v2124_v24 = vsel %vm2111_vm11, %v2091_v9, %v1814_v5  ;;  %v2125_v10 = vsel %vm2111_vm11, %v2092_v37, %v1816_v51  ;;  %v10541_v3 = vld [vmem:[#allocation122_spill] sm:$0xff] }
 0x248   : > { %5066 = vmatprep.mubr.msk.f32.mxu0 %vm2144_vm12, %v2124_v24  ;;  %v10512_v24 = vld [vmem:[#allocation117_spill] sm:$0xff] }
 0x249   : > { %5067 = vmatmul.mubr.msk.f32.gmra.mrb[12].mxu0 %vm2144_vm12, %v2125_v10  ;;  %v10513_v10 = vld [vmem:[#allocation54_spill] sm:$0xff] }
 0x24a   : > { %v1725_v42 = vpop.permute.xlu1 %1724  ;;  %v1727_v19 = vpop.permute.xlu0 %1726  ;;  %v1900_v16 = vsel %vm1882_vm4, %v10513_v10, %v10512_v24 }
 0x24b   : > { %v2093_v21 = vsel %vm2078_vm10, %v2060_v56, %v1725_v42  ;;  %v2094_v7 = vsel %vm2078_vm10, %v2061_v28, %v1727_v19  ;;  %v1932_v12 = vsel %vm1914_vm5, %v1900_v16, %v10514_v49  ;;  %v10519_v42 = vld [vmem:[#allocation57_spill] sm:$0xff] }
 0x24c   : > { %v1965_v0 = vsel %vm1946_vm6, %v1932_v12, %v10515_v8 }
 0x24d   : > { %v1998_v20 = vsel %vm1979_vm7, %v1965_v0, %v10516_v26  ;;  %v10536_v0 = vld [vmem:[#allocation121_spill] sm:$0xff]  ;;  %v10538_v26 = vld [vmem:[#allocation142_spill] sm:$0xff] }
 0x24e   : > { %v1818_v1 = vpop.permute.xlu1 %1817  ;;  %v1820_v59 = vpop.permute.xlu0 %1819  ;;  %v2031_v19 = vsel %vm2012_vm8, %v1998_v20, %v10519_v42 }
 0x24f   : > { %v2126_v58 = vsel %vm2111_vm11, %v2093_v21, %v1818_v1  ;;  %v2127_v30 = vsel %vm2111_vm11, %v2094_v7, %v1820_v59  ;;  %v10522_v7 = vld [vmem:[#allocation193_spill] sm:$0xff] }
 0x250   : > { %5069 = vmatprep.mubr.msk.f32.mxu0 %vm2144_vm12, %v2126_v58  ;;  %v1999_v1 = vsel %vm1979_vm7, %v1966_v13, %v10522_v7  ;;  %v10523_v58 = vld [vmem:[#allocation207_spill] sm:$0xff]  ;;  %v10543_v13 = vld [vmem:[#allocation61_spill] sm:$0xff] }
 0x251   : > { %5070 = vmatmul.mubr.msk.f32.gmra.mrb[14].mxu0 %vm2144_vm12, %v2127_v30  ;;  %v2032_v30 = vsel %vm2012_vm8, %v1999_v1, %v10523_v58  ;;  %v10545_v1 = vld [vmem:[#allocation91_spill] sm:$0xff] }
 0x252   : > { %v1638_v25 = vpop.permute.xlu1 %1637  ;;  %v1729_v18 = vpop.permute.xlu0 %1728 }
 0x253   : > { %v2095_v50 = vsel %vm2078_vm10, %v2062_v4, %v1729_v18  ;;  %v2063_v35 = vsel %vm2045_vm9, %v2030_v39, %v1638_v25  ;;  %v10525_v25 = vld [vmem:[#allocation59_spill] sm:$0xff]  ;;  %v10530_v4 = vld [vmem:[#allocation58_spill] sm:$0xff] }
 0x254   : > { %v1902_v18 = vsel %vm1882_vm4, %v10525_v25, %v10524_v62  ;;  %v1903_v45 = vsel %vm1882_vm4, %v10530_v4, %v10529_v34  ;;  %v10551_v34 = vld [vmem:[#allocation175_spill] sm:$0xff] }
 0x255   : > { %v1934_v43 = vsel %vm1914_vm5, %v1902_v18, %v10526_v53 }
 0x256   : > { %v1731_v36 = vpop.permute.xlu1 %1730  ;;  %v1822_v47 = vpop.permute.xlu0 %1821  ;;  %v1967_v17 = vsel %vm1946_vm6, %v1934_v43, %v10527_v46 }
 0x257   : > { %v2128_v44 = vsel %vm2111_vm11, %v2095_v50, %v1822_v47  ;;  %v2096_v9 = vsel %vm2078_vm10, %v2063_v35, %v1731_v36  ;;  %v2000_v61 = vsel %vm1979_vm7, %v1967_v17, %v10528_v54  ;;  %v10532_v36 = vld [vmem:[#allocation51_spill] sm:$0xff]  ;;  %v10550_v54 = vld [vmem:[#allocation144_spill] sm:$0xff] }
 0x258   : > { %5072 = vmatprep.mubr.msk.f32.mxu0 %vm2144_vm12, %v2128_v44  ;;  %v2033_v50 = vsel %vm2012_vm8, %v2000_v61, %v10531_v57  ;;  %v1935_v47 = vsel %vm1914_vm5, %v1903_v45, %v10532_v36  ;;  %v10548_v17 = vld [vmem:[#allocation123_spill] sm:$0xff] }
 0x259   : > { %v1968_v44 = vsel %vm1946_vm6, %v1935_v47, %v10533_v15  ;;  %v10553_v47 = vld [vmem:[#allocation124_spill] sm:$0xff] }
 0x25a   : > { %v1824_v37 = vpop.permute.xlu1 %1823  ;;  %v1640_v5 = vpop.permute.xlu0 %1639 }
 0x25b   : > { %v2129_v51 = vsel %vm2111_vm11, %v2096_v9, %v1824_v37  ;;  %v2064_v11 = vsel %vm2045_vm9, %v2031_v19, %v1640_v5  ;;  %v10534_v9 = vld [vmem:[#allocation195_spill] sm:$0xff]  ;;  %v10540_v19 = vld [vmem:[#allocation196_spill] sm:$0xff] }
 0x25c   : > { %5073 = vmatmul.mubr.msk.f32.gmra.mrb[16].mxu0 %vm2144_vm12, %v2129_v51  ;;  %v2001_v37 = vsel %vm1979_vm7, %v1968_v44, %v10534_v9  ;;  %v10535_v51 = vld [vmem:[#allocation60_spill] sm:$0xff]  ;;  %v10555_v44 = vld [vmem:[#allocation210_spill] sm:$0xff] }
 0x25d   : > { %v2034_v24 = vsel %vm2012_vm8, %v2001_v37, %v10535_v51  ;;  %v10557_v37 = vld [vmem:[#allocation92_spill] sm:$0xff] }
 0x25e   : > { %v1642_v2 = vpop.permute.xlu1 %1641  ;;  %v1733_v40 = vpop.permute.xlu0 %1732 }
 0x25f   : > { %v2097_v56 = vsel %vm2078_vm10, %v2064_v11, %v1733_v40  ;;  %v2065_v60 = vsel %vm2045_vm9, %v2032_v30, %v1642_v2  ;;  %v10537_v2 = vld [vmem:[#allocation62_spill] sm:$0xff]  ;;  %v10542_v11 = vld [vmem:[#allocation65_spill] sm:$0xff] }
 0x260   : > { %v1904_v40 = vsel %vm1882_vm4, %v10537_v2, %v10536_v0  ;;  %v1905_v63 = vsel %vm1882_vm4, %v10542_v11, %v10541_v3  ;;  %v10563_v3 = vld [vmem:[#allocation176_spill] sm:$0xff] }
 0x261   : > { %v1936_v20 = vsel %vm1914_vm5, %v1904_v40, %v10538_v26 }
 0x262   : > { %v1735_v28 = vpop.permute.xlu1 %1734  ;;  %v1826_v21 = vpop.permute.xlu0 %1825  ;;  %v1969_v52 = vsel %vm1946_vm6, %v1936_v20, %v10539_v23 }
 0x263   : > { %v2130_v59 = vsel %vm2111_vm11, %v2097_v56, %v1826_v21  ;;  %v2098_v6 = vsel %vm2078_vm10, %v2065_v60, %v1735_v28  ;;  %v2002_v41 = vsel %vm1979_vm7, %v1969_v52, %v10540_v19  ;;  %v10544_v28 = vld [vmem:[#allocation143_spill] sm:$0xff]  ;;  %v10560_v52 = vld [vmem:[#allocation125_spill] sm:$0xff]  ;;  %v10562_v19 = vld [vmem:[#allocation146_spill] sm:$0xff] }
 0x264   : > { %5075 = vmatprep.mubr.msk.f32.mxu0 %vm2144_vm12, %v2130_v59  ;;  %v2035_v56 = vsel %vm2012_vm8, %v2002_v41, %v10543_v13  ;;  %v1937_v21 = vsel %vm1914_vm5, %v1905_v63, %v10544_v28 }
 0x265   : > { %v1970_v59 = vsel %vm1946_vm6, %v1937_v21, %v10545_v1  ;;  %v10565_v21 = vld [vmem:[#allocation126_spill] sm:$0xff] }
 0x266   : > { %v1828_v27 = vpop.permute.xlu1 %1827  ;;  %v1644_v33 = vpop.permute.xlu0 %1643 }
 0x267   : > { %v2131_v32 = vsel %vm2111_vm11, %v2098_v6, %v1828_v27  ;;  %v2066_v22 = vsel %vm2045_vm9, %v2033_v50, %v1644_v33  ;;  %v10546_v6 = vld [vmem:[#allocation197_spill] sm:$0xff]  ;;  %v10552_v50 = vld [vmem:[#allocation198_spill] sm:$0xff] }
 0x268   : > { %5076 = vmatmul.mubr.msk.f32.gmra.mrb[18].mxu0 %vm2144_vm12, %v2131_v32  ;;  %v2003_v27 = vsel %vm1979_vm7, %v1970_v59, %v10546_v6  ;;  %v10547_v32 = vld [vmem:[#allocation209_spill] sm:$0xff]  ;;  %v10567_v59 = vld [vmem:[#allocation211_spill] sm:$0xff] }
 0x269   : > { %v2036_v62 = vsel %vm2012_vm8, %v2003_v27, %v10547_v32  ;;  %v10569_v27 = vld [vmem:[#allocation93_spill] sm:$0xff] }
 0x26a   : > { %v1646_v29 = vpop.permute.xlu1 %1645  ;;  %v1737_v55 = vpop.permute.xlu0 %1736 }
 0x26b   : > { %v2099_v31 = vsel %vm2078_vm10, %v2066_v22, %v1737_v55  ;;  %v2067_v10 = vsel %vm2045_vm9, %v2034_v24, %v1646_v29  ;;  %v10549_v29 = vld [vmem:[#allocation67_spill] sm:$0xff]  ;;  %v10554_v22 = vld [vmem:[#allocation66_spill] sm:$0xff] }
 0x26c   : > { %v1906_v55 = vsel %vm1882_vm4, %v10549_v29, %v10548_v17  ;;  %v1907_v15 = vsel %vm1882_vm4, %v10554_v22, %v10553_v47  ;;  %v10575_v47 = vld [vmem:[#allocation94_spill] sm:$0xff] }
 0x26d   : > { %v1938_v61 = vsel %vm1914_vm5, %v1906_v55, %v10550_v54 }
 0x26e   : > { %v1739_v39 = vpop.permute.xlu1 %1738  ;;  %v1830_v35 = vpop.permute.xlu0 %1829  ;;  %v1971_v4 = vsel %vm1946_vm6, %v1938_v61, %v10551_v34 }
 0x26f   : > { %v2132_v5 = vsel %vm2111_vm11, %v2099_v31, %v1830_v35  ;;  %v2100_v16 = vsel %vm2078_vm10, %v2067_v10, %v1739_v39  ;;  %v2004_v36 = vsel %vm1979_vm7, %v1971_v4, %v10552_v50  ;;  %v10556_v39 = vld [vmem:[#allocation145_spill] sm:$0xff]  ;;  %v10572_v4 = vld [vmem:[#allocation127_spill] sm:$0xff]  ;;  %v10574_v50 = vld [vmem:[#allocation148_spill] sm:$0xff] }
 0x270   : > { %5078 = vmatprep.mubr.msk.f32.mxu0 %vm2144_vm12, %v2132_v5  ;;  %v2037_v31 = vsel %vm2012_vm8, %v2004_v36, %v10555_v44  ;;  %v1939_v35 = vsel %vm1914_vm5, %v1907_v15, %v10556_v39 }
 0x271   : > { %v1972_v5 = vsel %vm1946_vm6, %v1939_v35, %v10557_v37  ;;  %v10577_v35 = vld [vmem:[#allocation128_spill] sm:$0xff] }
 0x272   : > { %v1832_v49 = vpop.permute.xlu1 %1831  ;;  %v1648_v12 = vpop.permute.xlu0 %1647 }
 0x273   : > { %v2133_v8 = vsel %vm2111_vm11, %v2100_v16, %v1832_v49  ;;  %v2068_v7 = vsel %vm2045_vm9, %v2035_v56, %v1648_v12  ;;  %v10558_v16 = vld [vmem:[#allocation199_spill] sm:$0xff]  ;;  %v10564_v56 = vld [vmem:[#allocation200_spill] sm:$0xff] }
 0x274   : > { %5079 = vmatmul.mubr.msk.f32.gmra.mrb[20].mxu0 %vm2144_vm12, %v2133_v8  ;;  %v2005_v49 = vsel %vm1979_vm7, %v1972_v5, %v10558_v16  ;;  %v10559_v8 = vld [vmem:[#allocation63_spill] sm:$0xff]  ;;  %v10579_v5 = vld [vmem:[#allocation212_spill] sm:$0xff] }
 0x275   : > { %v2038_v0 = vsel %vm2012_vm8, %v2005_v49, %v10559_v8  ;;  %v10581_v49 = vld [vmem:[#allocation177_spill] sm:$0xff] }
 0x276   : > { %v1650_v48 = vpop.permute.xlu1 %1649  ;;  %v1741_v42 = vpop.permute.xlu0 %1740 }
 0x277   : > { %v2101_v58 = vsel %vm2078_vm10, %v2068_v7, %v1741_v42  ;;  %v2069_v25 = vsel %vm2045_vm9, %v2036_v62, %v1650_v48  ;;  %v10561_v48 = vld [vmem:[#allocation73_spill] sm:$0xff]  ;;  %v10566_v7 = vld [vmem:[#allocation72_spill] sm:$0xff] }
 0x278   : > { %v1908_v42 = vsel %vm1882_vm4, %v10561_v48, %v10560_v52  ;;  %v1909_v1 = vsel %vm1882_vm4, %v10566_v7, %v10565_v21  ;;  %v10584_v48 = vld [vmem:[#allocation129_spill] sm:$0xff] }
 0x279   : > { %v1940_v41 = vsel %vm1914_vm5, %v1908_v42, %v10562_v19  ;;  %v1912_v42 = vsel %vm1882_vm4, %v10434_v38, %v10584_v48  ;;  %v10585_v19 = vld [vmem:[#allocation130_spill] sm:$0xff] }
 0x27a   : > { %v1743_v30 = vpop.permute.xlu1 %1742  ;;  %v1834_v60 = vpop.permute.xlu0 %1833  ;;  %v1973_v11 = vsel %vm1946_vm6, %v1940_v41, %v10563_v3  ;;  %v1913_v41 = vsel %vm1882_vm4, %v10440_v14, %v10585_v19 }
 0x27b   : > { %v2134_v33 = vsel %vm2111_vm11, %v2101_v58, %v1834_v60  ;;  %v2102_v18 = vsel %vm2078_vm10, %v2069_v25, %v1743_v30  ;;  %v2006_v28 = vsel %vm1979_vm7, %v1973_v11, %v10564_v56  ;;  %v10568_v30 = vld [vmem:[#allocation147_spill] sm:$0xff]  ;;  %v10586_v11 = vld [vmem:[#allocation150_spill] sm:$0xff] }
 0x27c   : > { %5081 = vmatprep.mubr.msk.f32.mxu0 %vm2144_vm12, %v2134_v33  ;;  %v2039_v58 = vsel %vm2012_vm8, %v2006_v28, %v10567_v59  ;;  %v1941_v60 = vsel %vm1914_vm5, %v1909_v1, %v10568_v30  ;;  %v10589_v1 = vld [vmem:[#allocation178_spill] sm:$0xff]  ;;  %v10590_v59 = vld [vmem:[#allocation97_spill] sm:$0xff]  ;;  %v10591_v30 = vld [vmem:[#allocation204_spill] sm:$0xff] }
 0x27d   : > { %v1974_v33 = vsel %vm1946_vm6, %v1941_v60, %v10569_v27 }
 0x27e   : > { %v1836_v53 = vpop.permute.xlu1 %1835  ;;  %v1652_v43 = vpop.permute.xlu0 %1651 }
 0x27f   : > { %v2135_v46 = vsel %vm2111_vm11, %v2102_v18, %v1836_v53  ;;  %v2070_v9 = vsel %vm2045_vm9, %v2037_v31, %v1652_v43  ;;  %v10570_v18 = vld [vmem:[#allocation201_spill] sm:$0xff]  ;;  %v10576_v31 = vld [vmem:[#allocation202_spill] sm:$0xff] }
 0x280   : > { %5082 = vmatmul.mubr.msk.f32.gmra.mrb[22].mxu0 %vm2144_vm12, %v2135_v46  ;;  %v2007_v53 = vsel %vm1979_vm7, %v1974_v33, %v10570_v18  ;;  %v10571_v46 = vld [vmem:[#allocation64_spill] sm:$0xff]  ;;  %v10593_v33 = vld [vmem:[#allocation214_spill] sm:$0xff] }
 0x281   : > { %v2040_v17 = vsel %vm2012_vm8, %v2007_v53, %v10571_v46 }
 0x282   : > { %v1654_v45 = vpop.permute.xlu1 %1653  ;;  %v1745_v57 = vpop.permute.xlu0 %1744 }
 0x283   : > { %v2103_v51 = vsel %vm2078_vm10, %v2070_v9, %v1745_v57  ;;  %v2071_v2 = vsel %vm2045_vm9, %v2038_v0, %v1654_v45  ;;  %v10573_v45 = vld [vmem:[#allocation77_spill] sm:$0xff]  ;;  %v10578_v9 = vld [vmem:[#allocation76_spill] sm:$0xff] }
 0x284   : > { %v1910_v57 = vsel %vm1882_vm4, %v10573_v45, %v10572_v4  ;;  %v1911_v37 = vsel %vm1882_vm4, %v10578_v9, %v10577_v35 }
 0x285   : > { %v1942_v36 = vsel %vm1914_vm5, %v1910_v57, %v10574_v50  ;;  %v7632_v57 = vld [vmem:[%s7626_s12] ss:$0 sm:$0xff] }
 0x286   : > { %v1747_v24 = vpop.permute.xlu1 %1746  ;;  %v1838_v10 = vpop.permute.xlu0 %1837  ;;  %v1975_v22 = vsel %vm1946_vm6, %v1942_v36, %v10575_v47 }
 0x287   : > { %v2136_v12 = vsel %vm2111_vm11, %v2103_v51, %v1838_v10  ;;  %v2104_v40 = vsel %vm2078_vm10, %v2071_v2, %v1747_v24  ;;  %v2008_v39 = vsel %vm1979_vm7, %v1975_v22, %v10576_v31  ;;  %v10580_v24 = vld [vmem:[#allocation149_spill] sm:$0xff] }
 0x288   : > { %5084 = vmatprep.mubr.msk.f32.mxu0 %vm2144_vm12, %v2136_v12  ;;  %v2041_v51 = vsel %vm2012_vm8, %v2008_v39, %v10579_v5  ;;  %v1943_v10 = vsel %vm1914_vm5, %v1911_v37, %v10580_v24  ;;  %v10599_v39 = vld [vmem:[#allocation7_spill] sm:$0xff] }
 0x289   : > { %v1976_v12 = vsel %vm1946_vm6, %v1943_v10, %v10581_v49 }
 0x28a   : > { %v1840_v26 = vpop.permute.xlu1 %1839  ;;  %v1656_v20 = vpop.permute.xlu0 %1655 }
 0x28b   : > { %v2137_v23 = vsel %vm2111_vm11, %v2104_v40, %v1840_v26  ;;  %v2072_v6 = vsel %vm2045_vm9, %v2039_v58, %v1656_v20  ;;  %v10582_v40 = vld [vmem:[#allocation203_spill] sm:$0xff] }
 0x28c   : > { %5085 = vmatmul.mubr.msk.f32.gmra.mrb[24].mxu0 %vm2144_vm12, %v2137_v23  ;;  %v2009_v26 = vsel %vm1979_vm7, %v1976_v12, %v10582_v40  ;;  %v10583_v23 = vld [vmem:[#allocation213_spill] sm:$0xff]  ;;  %v10601_v12 = vld [vmem:[#allocation10_spill] sm:$0xff] }
 0x28d   : > { %v2042_v52 = vsel %vm2012_vm8, %v2009_v26, %v10583_v23 }
 0x28e   : > { %v1658_v63 = vpop.permute.xlu1 %1657  ;;  %v1749_v13 = vpop.permute.xlu0 %1748 }
 0x28f   : > { %v2105_v32 = vsel %vm2078_vm10, %v2072_v6, %v1749_v13  ;;  %v2073_v29 = vsel %vm2045_vm9, %v2040_v17, %v1658_v63  ;;  %v1944_v63 = vsel %vm1914_vm5, %v1912_v42, %v10586_v11  ;;  %v10587_v13 = vld [vmem:[#allocation151_spill] sm:$0xff]  ;;  %v10592_v6 = vld [vmem:[#allocation205_spill] sm:$0xff] }
 0x290   : > { %v1945_v56 = vsel %vm1914_vm5, %v1913_v41, %v10587_v13  ;;  %v1977_v38 = vsel %vm1946_vm6, %v1944_v63, %v10589_v1 }
 0x291   : > { %v1978_v58 = vsel %vm1946_vm6, %v1945_v56, %v10590_v59  ;;  %v2010_v60 = vsel %vm1979_vm7, %v1977_v38, %v10591_v30  ;;  %v10605_v56 = vld [vmem:[#allocation12_spill] sm:$0xff]  ;;  %v10607_v59 = vld [vmem:[#allocation11_spill] sm:$0xff] }
 0x292   : > { %v1751_v62 = vpop.permute.xlu1 %1750  ;;  %v1842_v25 = vpop.permute.xlu0 %1841  ;;  %v2011_v27 = vsel %vm1979_vm7, %v1978_v58, %v10592_v6 }
 0x293   : > { %v2138_v43 = vsel %vm2111_vm11, %v2105_v32, %v1842_v25  ;;  %v2106_v55 = vsel %vm2078_vm10, %v2073_v29, %v1751_v62  ;;  %v2043_v32 = vsel %vm2012_vm8, %v2010_v60, %v10593_v33  ;;  %v10594_v62 = vld [vmem:[#allocation70_spill] sm:$0xff] }
 0x294   : > { %5087 = vmatprep.mubr.msk.f32.mxu0 %vm2144_vm12, %v2138_v43  ;;  %v2044_v25 = vsel %vm2012_vm8, %v2011_v27, %v10594_v62 }
 0x296   : > { %v1844_v54 = vpop.permute.xlu1 %1843  ;;  %v1660_v61 = vpop.permute.xlu0 %1659 }
 0x297   : > { %v2139_v34 = vsel %vm2111_vm11, %v2106_v55, %v1844_v54  ;;  %v2074_v16 = vsel %vm2045_vm9, %v2041_v51, %v1660_v61  ;;  %v7629_v61 = vld [vmem:[%s7620_s27] ss:$0 sm:$0xff] }
 0x298   : > { %5088 = vmatmul.mubr.msk.f32.gmra.mrb[26].mxu0 %vm2144_vm12, %v2139_v34 }
 0x29a   : > { %v1662_v15 = vpop.permute.xlu1 %1661  ;;  %v1753_v44 = vpop.permute.xlu0 %1752 }
 0x29b   : > { %v2107_v8 = vsel %vm2078_vm10, %v2074_v16, %v1753_v44  ;;  %v2075_v3 = vsel %vm2045_vm9, %v2042_v52, %v1662_v15  ;;  %v10597_v44 = vld [vmem:[#allocation8_spill] sm:$0xff] }
 0x29e   : > { %v1755_v0 = vpop.permute.xlu1 %1754  ;;  %v1846_v2 = vpop.permute.xlu0 %1845 }
 0x29f   : > { %v2140_v20 = vsel %vm2111_vm11, %v2107_v8, %v1846_v2  ;;  %v2108_v28 = vsel %vm2078_vm10, %v2075_v3, %v1755_v0  ;;  %v10603_v0 = vld [vmem:[#allocation9_spill] sm:$0xff] }
 0x2a0   : > { %5090 = vmatprep.mubr.msk.f32.mxu0 %vm2144_vm12, %v2140_v20 }
 0x2a2   : > { %v1848_v21 = vpop.permute.xlu1 %1847  ;;  %v7582_v7 = vpop.permute.xlu0 %1663 }
 0x2a3   : > { %10588 = vst [vmem:[#allocation75_spill] sm:$0xff] %v7582_v7  ;;  %v2141_v14 = vsel %vm2111_vm11, %v2108_v28, %v1848_v21  ;;  %v2076_v43 = vsel %vm2045_vm9, %v2043_v32, %v7582_v7  ;;  %v2077_v46 = vsel %vm2045_vm9, %v2044_v25, %v7582_v7  ;;  %v10652_v7 = vld [vmem:[#allocation41_spill] sm:$0xff] }
 0x2a4   : > { %5091 = vmatmul.mubr.msk.f32.gmra.mrb[28].mxu0 %vm2144_vm12, %v2141_v14 }
 0x2a6   : > { %v7598_v18 = vpop.permute.xlu1 %1756  ;;  %v7600_v53 = vpop.permute.xlu0 %1849 }
 0x2a7   : > { %10595 = vst [vmem:[#allocation95_spill] sm:$0xff] %v7598_v18  ;;  %10596 = vst [vmem:[#allocation96_spill] sm:$0xff] %v7600_v53  ;;  %v2109_v17 = vsel %vm2078_vm10, %v2076_v43, %v7598_v18  ;;  %v2110_v29 = vsel %vm2078_vm10, %v2077_v46, %v7598_v18 }
 0x2a8   : > { %v2142_v55 = vsel %vm2111_vm11, %v2109_v17, %v7600_v53  ;;  %v2143_v54 = vsel %vm2111_vm11, %v2110_v29, %v7600_v53 }
 0x2a9   : > { %5093 = vmatprep.mubr.msk.f32.mxu0 %vm2144_vm12, %v2142_v55 }
 0x2aa   : > { %5094 = vmatmul.mubr.msk.f32.gmra.mrb[30].mxu0 %vm2144_vm12, %v2143_v54 }
 0x2ed   : > { %v5050_v34 = vpop.f32.mrb[0].mxu0 }
 0x2ee   : > { %v2471_v4 = vmax.f32 %v5050_v34, 0.0  ;;  %v2311_v45 = vpop.f32.mrb[1].mxu0 }
 0x2ef   : > { %v2470_v50 = vmax.f32 %v2311_v45, 0.0 }
 0x2f0   : > { %v2509_v36 = vmul.f32 %v7629_v61, %v2471_v4 }
 0x2f1   : > { %v2508_v47 = vmul.f32 %v7629_v61, %v2470_v50  ;;  %v10609_v50 = vld [vmem:[#allocation14_spill] sm:$0xff] }
 0x2f2   : > { %v2547_v22 = vadd.f32 %v7632_v57, %v2509_v36 }
 0x2f3   : > { %v2546_v15 = vadd.f32 %v7632_v57, %v2508_v47 }
 0x2f4   : > { %v7639_v31 = vadd.f32 %v2547_v22, %v10597_v44  ;;  %v10611_v44 = vld [vmem:[#allocation13_spill] sm:$0xff] }
 0x2f5   : > { %v7642_v35 = vadd.f32 %v2546_v15, %v10599_v39  ;;  %v5053_v9 = vpop.f32.mrb[2].mxu0 }
 0x2f6   : > { %10598 = vst [vmem:[#allocation78_spill] sm:$0xff] %v7639_v31  ;;  %5295 = vtanh.f32 %v7639_v31  ;;  %v2473_v37 = vmax.f32 %v5053_v9, 0.0  ;;  %v2321_v5 = vpop.f32.mrb[3].mxu0 }
 0x2f7   : > { %10600 = vst [vmem:[#allocation79_spill] sm:$0xff] %v7642_v35  ;;  %5297 = vtanh.f32 %v7642_v35  ;;  %v2472_v51 = vmax.f32 %v2321_v5, 0.0 }
 0x2f8   : > { %v2511_v24 = vmul.f32 %v7629_v61, %v2473_v37 }
 0x2f9   : > { %v2510_v10 = vmul.f32 %v7629_v61, %v2472_v51 }
 0x2fa   : > { %v2549_v16 = vadd.f32 %v7632_v57, %v2511_v24 }
 0x2fb   : > { %v2548_v49 = vadd.f32 %v7632_v57, %v2510_v10 }
 0x2fc   : > { %v7651_v8 = vadd.f32 %v2549_v16, %v10601_v12 }
 0x2fd   : > { %v7654_v2 = vadd.f32 %v2548_v49, %v10603_v0  ;;  %v5056_v40 = vpop.f32.mrb[4].mxu0 }
 0x2fe   : > { %10602 = vst [vmem:[#allocation98_spill] sm:$0xff] %v7651_v8  ;;  %5299 = vtanh.f32 %v7651_v8  ;;  %v2475_v26 = vmax.f32 %v5056_v40, 0.0  ;;  %v2331_v20 = vpop.f32.mrb[5].mxu0 }
 0x2ff   : > { %10604 = vst [vmem:[#allocation80_spill] sm:$0xff] %v7654_v2  ;;  %5301 = vtanh.f32 %v7654_v2  ;;  %v2474_v23 = vmax.f32 %v2331_v20, 0.0 }
 0x300   : > { %v5296_v52 = vpop.eup %5295  ;;  %v2513_v48 = vmul.f32 %v7629_v61, %v2475_v26 }
 0x301   : > { %v5298_v42 = vpop.eup %5297  ;;  %v2512_v19 = vmul.f32 %v7629_v61, %v2474_v23  ;;  %v2682_v41 = vrot.slane %v5296_v52, 7 }
 0x302   : > { %v2681_v3 = vrot.slane %v5298_v42, 7  ;;  %v2551_v11 = vadd.f32 %v7632_v57, %v2513_v48  ;;  %v10613_v48 = vld [vmem:[#allocation16_spill] sm:$0xff] }
 0x303   : > { %v2550_v63 = vadd.f32 %v7632_v57, %v2512_v19  ;;  %v7663_v13 = vsel %vm802_vm0, %v2682_v41, 0.0 }
 0x304   : > { %v7666_v28 = vadd.f32 %v2551_v11, %v10605_v56  ;;  %v7669_v21 = vsel %vm802_vm0, %v2681_v3, %v2682_v41  ;;  %v2841_v1 = vrot.slane %v7663_v13, 1  ;;  %v7673_v38 = vsel %vm802_vm0, 0.0, %v2681_v3  ;;  %v10615_v3 = vld [vmem:[#allocation15_spill] sm:$0xff] }
 0x305   : > { %v7676_v58 = vadd.f32 %v2550_v63, %v10607_v59  ;;  %v5059_v14 = vpop.f32.mrb[6].mxu0  ;;  %v2839_v30 = vrot.slane %v7669_v21, 1  ;;  %v2838_v60 = vrot.slane %v7673_v38, 1 }
 0x306   : > { %10606 = vst [vmem:[#allocation131_spill] sm:$0xff] %v7666_v28  ;;  %5303 = vtanh.f32 %v7666_v28  ;;  %v2477_v6 = vmax.f32 %v5059_v14, 0.0  ;;  %v2341_v27 = vpop.f32.mrb[7].mxu0 }
 0x307   : > { %10608 = vst [vmem:[#allocation152_spill] sm:$0xff] %v7676_v58  ;;  %5305 = vtanh.f32 %v7676_v58  ;;  %v2476_v33 = vmax.f32 %v2341_v27, 0.0  ;;  %v7683_v32 = vsel %vm961_vm1, %v2839_v30, %v2841_v1  ;;  %v7686_v62 = vsel %vm961_vm1, %v2838_v60, %v2839_v30 }
 0x308   : > { %v5300_v25 = vpop.eup %5299  ;;  %v2515_v43 = vmul.f32 %v7629_v61, %v2477_v6  ;;  %2915 = vrot.lane.b32.xlu0 %v7683_v32, %s5422_s16  ;;  %2913 = vrot.lane.b32.xlu1 %v7686_v62, %s5422_s16 }
 0x309   : > { %v5302_v46 = vpop.eup %5301  ;;  %v2514_v17 = vmul.f32 %v7629_v61, %v2476_v33  ;;  %v2685_v29 = vrot.slane %v5300_v25, 7 }
 0x30a   : > { %v2684_v55 = vrot.slane %v5302_v46, 7  ;;  %v2553_v54 = vadd.f32 %v7632_v57, %v2515_v43 }
 0x30b   : > { %v2552_v34 = vadd.f32 %v7632_v57, %v2514_v17  ;;  %v7697_v4 = vsel %vm802_vm0, %v2685_v29, 0.0 }
 0x30c   : > { %v7700_v45 = vsel %vm802_vm0, 0.0, %v2684_v55  ;;  %v7703_v36 = vadd.f32 %v2553_v54, %v10609_v50  ;;  %v5062_v47 = vpop.f32.mrb[8].mxu0  ;;  %v7706_v22 = vsel %vm802_vm0, %v2684_v55, %v2685_v29  ;;  %v2846_v15 = vrot.slane %v7697_v4, 1  ;;  %v10617_v50 = vld [vmem:[#allocation18_spill] sm:$0xff] }
 0x30d   : > { %v7710_v39 = vadd.f32 %v2552_v34, %v10611_v44  ;;  %v2479_v9 = vmax.f32 %v5062_v47, 0.0  ;;  %v2351_v37 = vpop.f32.mrb[9].mxu0  ;;  %v2844_v5 = vrot.slane %v7706_v22, 1  ;;  %v2843_v51 = vrot.slane %v7700_v45, 1 }
 0x30e   : > { %10610 = vst [vmem:[#allocation153_spill] sm:$0xff] %v7703_v36  ;;  %5307 = vtanh.f32 %v7703_v36  ;;  %v2478_v24 = vmax.f32 %v2351_v37, 0.0 }
 0x30f   : > { %10612 = vst [vmem:[#allocation179_spill] sm:$0xff] %v7710_v39  ;;  %5309 = vtanh.f32 %v7710_v39  ;;  %v2517_v10 = vmul.f32 %v7629_v61, %v2479_v9  ;;  %v7718_v16 = vsel %vm961_vm1, %v2844_v5, %v2846_v15  ;;  %v7721_v49 = vsel %vm961_vm1, %v2843_v51, %v2844_v5  ;;  %v10619_v9 = vld [vmem:[#allocation17_spill] sm:$0xff] }
 0x310   : > { %v5304_v12 = vpop.eup %5303  ;;  %v2516_v0 = vmul.f32 %v7629_v61, %v2478_v24  ;;  %2919 = vrot.lane.b32.xlu0 %v7718_v16, %s5422_s16  ;;  %2917 = vrot.lane.b32.xlu1 %v7721_v49, %s5422_s16 }
 0x311   : > { %v5306_v40 = vpop.eup %5305  ;;  %v2555_v26 = vadd.f32 %v7632_v57, %v2517_v10  ;;  %v2688_v20 = vrot.slane %v5304_v12, 7 }
 0x312   : > { %v2687_v23 = vrot.slane %v5306_v40, 7  ;;  %v2554_v52 = vadd.f32 %v7632_v57, %v2516_v0 }
 0x313   : > { %v7731_v42 = vadd.f32 %v2555_v26, %v10613_v48  ;;  %v7734_v19 = vsel %vm802_vm0, %v2688_v20, 0.0 }
 0x314   : > { %v7737_v41 = vsel %vm802_vm0, 0.0, %v2687_v23  ;;  %v7740_v11 = vadd.f32 %v2554_v52, %v10615_v3  ;;  %v5065_v63 = vpop.f32.mrb[10].mxu0  ;;  %v7743_v56 = vsel %vm802_vm0, %v2687_v23, %v2688_v20  ;;  %v2851_v1 = vrot.slane %v7734_v19, 1 }
 0x315   : > { %10614 = vst [vmem:[#allocation81_spill] sm:$0xff] %v7731_v42  ;;  %5311 = vtanh.f32 %v7731_v42  ;;  %v2481_v59 = vmax.f32 %v5065_v63, 0.0  ;;  %v2361_v14 = vpop.f32.mrb[11].mxu0  ;;  %v2849_v30 = vrot.slane %v7743_v56, 1  ;;  %v2848_v60 = vrot.slane %v7737_v41, 1 }
 0x316   : > { %10616 = vst [vmem:[#allocation99_spill] sm:$0xff] %v7740_v11  ;;  %5313 = vtanh.f32 %v7740_v11  ;;  %v2480_v6 = vmax.f32 %v2361_v14, 0.0 }
 0x317   : > { %v2519_v27 = vmul.f32 %v7629_v61, %v2481_v59  ;;  %v7752_v33 = vsel %vm961_vm1, %v2849_v30, %v2851_v1  ;;  %v7755_v25 = vsel %vm961_vm1, %v2848_v60, %v2849_v30 }
 0x318   : > { %v5308_v43 = vpop.eup %5307  ;;  %v2518_v46 = vmul.f32 %v7629_v61, %v2480_v6  ;;  %2923 = vrot.lane.b32.xlu0 %v7752_v33, %s5422_s16  ;;  %2921 = vrot.lane.b32.xlu1 %v7755_v25, %s5422_s16 }
 0x319   : > { %v5310_v17 = vpop.eup %5309  ;;  %v2557_v29 = vadd.f32 %v7632_v57, %v2519_v27  ;;  %v2691_v55 = vrot.slane %v5308_v43, 7  ;;  %v10623_v27 = vld [vmem:[#allocation20_spill] sm:$0xff] }
 0x31a   : > { %v2690_v54 = vrot.slane %v5310_v17, 7  ;;  %v2556_v34 = vadd.f32 %v7632_v57, %v2518_v46 }
 0x31b   : > { %v7765_v47 = vadd.f32 %v2557_v29, %v10617_v50  ;;  %v7768_v15 = vsel %vm802_vm0, %v2691_v55, 0.0  ;;  %v10626_v29 = vld [vmem:[#allocation19_spill] sm:$0xff] }
 0x31c   : > { %v7771_v44 = vsel %vm802_vm0, 0.0, %v2690_v54  ;;  %v7774_v37 = vadd.f32 %v2556_v34, %v10619_v9  ;;  %v5068_v5 = vpop.f32.mrb[12].mxu0  ;;  %v7777_v51 = vsel %vm802_vm0, %v2690_v54, %v2691_v55  ;;  %v2856_v24 = vrot.slane %v7768_v15, 1 }
 0x31d   : > { %10618 = vst [vmem:[#allocation100_spill] sm:$0xff] %v7765_v47  ;;  %5315 = vtanh.f32 %v7765_v47  ;;  %v2483_v10 = vmax.f32 %v5068_v5, 0.0  ;;  %v2371_v12 = vpop.f32.mrb[13].mxu0  ;;  %v2854_v0 = vrot.slane %v7777_v51, 1  ;;  %v2853_v40 = vrot.slane %v7771_v44, 1 }
 0x31e   : > { %10620 = vst [vmem:[#allocation26_spill] sm:$0xff] %v7774_v37  ;;  %5317 = vtanh.f32 %v7774_v37  ;;  %v2482_v26 = vmax.f32 %v2371_v12, 0.0 }
 0x31f   : > { %v5312_v20 = vpop.eup %5311  ;;  %v2521_v23 = vmul.f32 %v7629_v61, %v2483_v10  ;;  %v7786_v52 = vsel %vm961_vm1, %v2854_v0, %v2856_v24  ;;  %v7789_v48 = vsel %vm961_vm1, %v2853_v40, %v2854_v0 }
 0x320   : > { %10621 = vst [vmem:[#allocation101_spill] sm:$0xff] %v7786_v52  ;;  %v5314_v3 = vpop.eup %5313  ;;  %v2520_v63 = vmul.f32 %v7629_v61, %v2482_v26  ;;  %2927 = vrot.lane.b32.xlu0 %v7786_v52, %s5422_s16  ;;  %2925 = vrot.lane.b32.xlu1 %v7789_v48, %s5422_s16  ;;  %v2694_v1 = vrot.slane %v5312_v20, 7 }
 0x321   : > { %v2693_v59 = vrot.slane %v5314_v3, 7  ;;  %v2559_v14 = vadd.f32 %v7632_v57, %v2521_v23 }
 0x322   : > { %v2558_v30 = vadd.f32 %v7632_v57, %v2520_v63  ;;  %v7799_v60 = vsel %vm802_vm0, %v2694_v1, 0.0 }
 0x323   : > { %v7802_v6 = vsel %vm802_vm0, 0.0, %v2693_v59  ;;  %v7805_v43 = vadd.f32 %v2559_v14, %v10623_v27  ;;  %v7808_v46 = vsel %vm802_vm0, %v2693_v59, %v2694_v1  ;;  %v2861_v17 = vrot.slane %v7799_v60, 1 }
 0x324   : > { %10622 = vst [vmem:[#allocation24_spill] sm:$0xff] %v7802_v6  ;;  %10625 = vst [vmem:[#allocation132_spill] sm:$0xff] %v7808_v46  ;;  %v7812_v55 = vadd.f32 %v2558_v30, %v10626_v29  ;;  %v5071_v54 = vpop.f32.mrb[14].mxu0  ;;  %v2859_v34 = vrot.slane %v7808_v46, 1  ;;  %v2858_v50 = vrot.slane %v7802_v6, 1  ;;  %v10631_v30 = vld [vmem:[#allocation22_spill] sm:$0xff] }
 0x325   : > { %10624 = vst [vmem:[#allocation82_spill] sm:$0xff] %v7805_v43  ;;  %5319 = vtanh.f32 %v7805_v43  ;;  %v2485_v9 = vmax.f32 %v5071_v54, 0.0  ;;  %v2381_v5 = vpop.f32.mrb[15].mxu0  ;;  %v10634_v54 = vld [vmem:[#allocation21_spill] sm:$0xff] }
 0x326   : > { %10627 = vst [vmem:[#allocation134_spill] sm:$0xff] %v7812_v55  ;;  %5321 = vtanh.f32 %v7812_v55  ;;  %v2484_v24 = vmax.f32 %v2381_v5, 0.0  ;;  %v7819_v10 = vsel %vm961_vm1, %v2859_v34, %v2861_v17  ;;  %v7822_v12 = vsel %vm961_vm1, %v2858_v50, %v2859_v34 }
 0x327   : > { %10628 = vst [vmem:[#allocation154_spill] sm:$0xff] %v7819_v10  ;;  %10629 = vst [vmem:[#allocation156_spill] sm:$0xff] %v7822_v12  ;;  %v5316_v0 = vpop.eup %5315  ;;  %v2523_v40 = vmul.f32 %v7629_v61, %v2485_v9  ;;  %2931 = vrot.lane.b32.xlu0 %v7819_v10, %s5422_s16  ;;  %2929 = vrot.lane.b32.xlu1 %v7822_v12, %s5422_s16  ;;  %v10690_v10 = vld [vmem:[#allocation68_spill] sm:$0xff] }
 0x328   : > { %v5318_v26 = vpop.eup %5317  ;;  %v2522_v20 = vmul.f32 %v7629_v61, %v2484_v24  ;;  %v2697_v23 = vrot.slane %v5316_v0, 7 }
 0x329   : > { %v2696_v3 = vrot.slane %v5318_v26, 7  ;;  %v2561_v63 = vadd.f32 %v7632_v57, %v2523_v40 }
 0x32a   : > { %v2560_v1 = vadd.f32 %v7632_v57, %v2522_v20  ;;  %v7833_v59 = vsel %vm802_vm0, %v2697_v23, 0.0 }
 0x32b   : > { %v7836_v14 = vsel %vm802_vm0, 0.0, %v2696_v3  ;;  %v7839_v27 = vadd.f32 %v2561_v63, %v10631_v30  ;;  %v7842_v17 = vsel %vm802_vm0, %v2696_v3, %v2697_v23  ;;  %v2866_v29 = vrot.slane %v7833_v59, 1 }
 0x32c   : > { %10630 = vst [vmem:[#allocation180_spill] sm:$0xff] %v7836_v14  ;;  %10633 = vst [vmem:[#allocation84_spill] sm:$0xff] %v7842_v17  ;;  %v7846_v34 = vadd.f32 %v2560_v1, %v10634_v54  ;;  %v2864_v50 = vrot.slane %v7842_v17, 1  ;;  %v2863_v9 = vrot.slane %v7836_v14, 1 }
 0x32d   : > { %10632 = vst [vmem:[#allocation83_spill] sm:$0xff] %v7839_v27  ;;  %5323 = vtanh.f32 %v7839_v27 }
 0x32e   : > { %10635 = vst [vmem:[#allocation103_spill] sm:$0xff] %v7846_v34  ;;  %5325 = vtanh.f32 %v7846_v34  ;;  %v7853_v5 = vsel %vm961_vm1, %v2864_v50, %v2866_v29  ;;  %v7856_v24 = vsel %vm961_vm1, %v2863_v9, %v2864_v50 }
 0x32f   : > { %10636 = vst [vmem:[#allocation104_spill] sm:$0xff] %v7853_v5  ;;  %10637 = vst [vmem:[#allocation85_spill] sm:$0xff] %v7856_v24  ;;  %v5320_v0 = vpop.eup %5319  ;;  %2935 = vrot.lane.b32.xlu0 %v7853_v5, %s5422_s16  ;;  %2933 = vrot.lane.b32.xlu1 %v7856_v24, %s5422_s16  ;;  %v5074_v40 = vpop.f32.mrb[16].mxu0  ;;  %v10687_v24 = vld [vmem:[#allocation69_spill] sm:$0xff] }
 0x330   : > { %v5322_v26 = vpop.eup %5321  ;;  %v2487_v20 = vmax.f32 %v5074_v40, 0.0  ;;  %v2391_v23 = vpop.f32.mrb[17].mxu0  ;;  %v2700_v3 = vrot.slane %v5320_v0, 7 }
 0x331   : > { %v2699_v63 = vrot.slane %v5322_v26, 7  ;;  %v2486_v1 = vmax.f32 %v2391_v23, 0.0  ;;  %v10640_v23 = vld [vmem:[#allocation25_spill] sm:$0xff] }
 0x332   : > { %v2525_v30 = vmul.f32 %v7629_v61, %v2487_v20  ;;  %v7864_v29 = vsel %vm802_vm0, %v2700_v3, 0.0 }
 0x333   : > { %v7867_v54 = vsel %vm802_vm0, 0.0, %v2699_v63  ;;  %v2524_v50 = vmul.f32 %v7629_v61, %v2486_v1  ;;  %v7871_v9 = vsel %vm802_vm0, %v2699_v63, %v2700_v3  ;;  %v2871_v34 = vrot.slane %v7864_v29, 1  ;;  %v10644_v63 = vld [vmem:[#allocation23_spill] sm:$0xff] }
 0x334   : > { %10638 = vst [vmem:[#allocation102_spill] sm:$0xff] %v7867_v54  ;;  %10639 = vst [vmem:[#allocation135_spill] sm:$0xff] %v7871_v9  ;;  %v2563_v40 = vadd.f32 %v7632_v57, %v2525_v30  ;;  %v2869_v0 = vrot.slane %v7871_v9, 1  ;;  %v2868_v26 = vrot.slane %v7867_v54, 1 }
 0x335   : > { %v2562_v20 = vadd.f32 %v7632_v57, %v2524_v50 }
 0x336   : > { %v7879_v27 = vadd.f32 %v2563_v40, %v10640_v23  ;;  %v7882_v55 = vsel %vm961_vm1, %v2869_v0, %v2871_v34  ;;  %v7885_v1 = vsel %vm961_vm1, %v2868_v26, %v2869_v0 }
 0x337   : > { %10642 = vst [vmem:[#allocation157_spill] sm:$0xff] %v7882_v55  ;;  %10643 = vst [vmem:[#allocation159_spill] sm:$0xff] %v7885_v1  ;;  %v5324_v3 = vpop.eup %5323  ;;  %v7888_v43 = vadd.f32 %v2562_v20, %v10644_v63  ;;  %2939 = vrot.lane.b32.xlu0 %v7882_v55, %s5422_s16  ;;  %2937 = vrot.lane.b32.xlu1 %v7885_v1, %s5422_s16 }
 0x338   : > { %10641 = vst [vmem:[#allocation137_spill] sm:$0xff] %v7879_v27  ;;  %v5326_v30 = vpop.eup %5325  ;;  %5327 = vtanh.f32 %v7879_v27  ;;  %v2703_v50 = vrot.slane %v5324_v3, 7 }
 0x339   : > { %10645 = vst [vmem:[#allocation133_spill] sm:$0xff] %v7888_v43  ;;  %v2702_v40 = vrot.slane %v5326_v30, 7  ;;  %5329 = vtanh.f32 %v7888_v43 }
 0x33a   : > { %v7897_v34 = vsel %vm802_vm0, %v2703_v50, 0.0 }
 0x33b   : > { %v7900_v0 = vsel %vm802_vm0, 0.0, %v2702_v40  ;;  %v5077_v26 = vpop.f32.mrb[18].mxu0  ;;  %v7903_v20 = vsel %vm802_vm0, %v2702_v40, %v2703_v50  ;;  %v2876_v23 = vrot.slane %v7897_v34, 1 }
 0x33c   : > { %10646 = vst [vmem:[#allocation105_spill] sm:$0xff] %v7900_v0  ;;  %10647 = vst [vmem:[#allocation106_spill] sm:$0xff] %v7903_v20  ;;  %v2489_v63 = vmax.f32 %v5077_v26, 0.0  ;;  %v2401_v37 = vpop.f32.mrb[19].mxu0  ;;  %v2874_v27 = vrot.slane %v7903_v20, 1  ;;  %v2873_v3 = vrot.slane %v7900_v0, 1 }
 0x33d   : > { %v2488_v30 = vmax.f32 %v2401_v37, 0.0 }
 0x33e   : > { %v2527_v43 = vmul.f32 %v7629_v61, %v2489_v63  ;;  %v7910_v47 = vsel %vm961_vm1, %v2874_v27, %v2876_v23  ;;  %v7913_v53 = vsel %vm961_vm1, %v2873_v3, %v2874_v27  ;;  %v10650_v63 = vld [vmem:[#allocation43_spill] sm:$0xff] }
 0x33f   : > { %10648 = vst [vmem:[#allocation136_spill] sm:$0xff] %v7910_v47  ;;  %10649 = vst [vmem:[#allocation155_spill] sm:$0xff] %v7913_v53  ;;  %v2526_v50 = vmul.f32 %v7629_v61, %v2488_v30  ;;  %2943 = vrot.lane.b32.xlu0 %v7910_v47, %s5422_s16  ;;  %2941 = vrot.lane.b32.xlu1 %v7913_v53, %s5422_s16 }
 0x340   : > { %v2565_v40 = vadd.f32 %v7632_v57, %v2527_v43 }
 0x341   : > { %v2564_v37 = vadd.f32 %v7632_v57, %v2526_v50 }
 0x342   : > { %v5328_v26 = vpop.eup %5327  ;;  %v7923_v18 = vadd.f32 %v2565_v40, %v10650_v63 }
 0x343   : > { %v5330_v23 = vpop.eup %5329  ;;  %v7926_v27 = vadd.f32 %v2564_v37, %v10652_v7  ;;  %v2706_v3 = vrot.slane %v5328_v26, 7 }
 0x344   : > { %10651 = vst [vmem:[#allocation138_spill] sm:$0xff] %v7923_v18  ;;  %v2705_v30 = vrot.slane %v5330_v23, 7  ;;  %5331 = vtanh.f32 %v7923_v18 }
 0x345   : > { %10653 = vst [vmem:[#allocation139_spill] sm:$0xff] %v7926_v27  ;;  %5333 = vtanh.f32 %v7926_v27  ;;  %v7931_v11 = vsel %vm802_vm0, %v2706_v3, 0.0 }
 0x346   : > { %v7934_v43 = vsel %vm802_vm0, 0.0, %v2705_v30  ;;  %v7937_v50 = vsel %vm802_vm0, %v2705_v30, %v2706_v3  ;;  %v2881_v40 = vrot.slane %v7931_v11, 1 }
 0x347   : > { %v5080_v63 = vpop.f32.mrb[20].mxu0  ;;  %v2879_v7 = vrot.slane %v7937_v50, 1  ;;  %v2878_v37 = vrot.slane %v7934_v43, 1 }
 0x348   : > { %v2491_v26 = vmax.f32 %v5080_v63, 0.0  ;;  %v2411_v23 = vpop.f32.mrb[21].mxu0 }
 0x349   : > { %v2490_v18 = vmax.f32 %v2411_v23, 0.0  ;;  %v7943_v27 = vsel %vm961_vm1, %v2879_v7, %v2881_v40  ;;  %v7946_v42 = vsel %vm961_vm1, %v2878_v37, %v2879_v7  ;;  %v10656_v40 = vld [vmem:[#allocation45_spill] sm:$0xff]  ;;  %v10658_v37 = vld [vmem:[#allocation44_spill] sm:$0xff] }
 0x34a   : > { %10654 = vst [vmem:[#allocation160_spill] sm:$0xff] %v7943_v27  ;;  %10655 = vst [vmem:[#allocation87_spill] sm:$0xff] %v7946_v42  ;;  %v2529_v39 = vmul.f32 %v7629_v61, %v2491_v26  ;;  %2947 = vrot.lane.b32.xlu0 %v7943_v27, %s5422_s16  ;;  %2945 = vrot.lane.b32.xlu1 %v7946_v42, %s5422_s16 }
 0x34b   : > { %v2528_v3 = vmul.f32 %v7629_v61, %v2490_v18 }
 0x34c   : > { %v2567_v30 = vadd.f32 %v7632_v57, %v2529_v39 }
 0x34d   : > { %v2566_v63 = vadd.f32 %v7632_v57, %v2528_v3 }
 0x34e   : > { %v5332_v23 = vpop.eup %5331  ;;  %v7957_v36 = vadd.f32 %v2567_v30, %v10656_v40 }
 0x34f   : > { %v5334_v7 = vpop.eup %5333  ;;  %v7960_v58 = vadd.f32 %v2566_v63, %v10658_v37  ;;  %v2709_v26 = vrot.slane %v5332_v23, 7 }
 0x350   : > { %10657 = vst [vmem:[#allocation158_spill] sm:$0xff] %v7957_v36  ;;  %v2708_v28 = vrot.slane %v5334_v7, 7  ;;  %5335 = vtanh.f32 %v7957_v36 }
 0x351   : > { %10659 = vst [vmem:[#allocation181_spill] sm:$0xff] %v7960_v58  ;;  %5337 = vtanh.f32 %v7960_v58  ;;  %v7965_v18 = vsel %vm802_vm0, %v2709_v26, 0.0 }
 0x352   : > { %v7968_v39 = vsel %vm802_vm0, 0.0, %v2708_v28  ;;  %v7971_v3 = vsel %vm802_vm0, %v2708_v28, %v2709_v26  ;;  %v2886_v30 = vrot.slane %v7965_v18, 1 }
 0x353   : > { %10660 = vst [vmem:[#allocation107_spill] sm:$0xff] %v7968_v39  ;;  %10661 = vst [vmem:[#allocation29_spill] sm:$0xff] %v7971_v3  ;;  %v5083_v40 = vpop.f32.mrb[22].mxu0  ;;  %v2884_v63 = vrot.slane %v7971_v3, 1  ;;  %v2883_v23 = vrot.slane %v7968_v39, 1 }
 0x354   : > { %v2493_v7 = vmax.f32 %v5083_v40, 0.0  ;;  %v2421_v37 = vpop.f32.mrb[23].mxu0 }
 0x355   : > { %v2492_v36 = vmax.f32 %v2421_v37, 0.0  ;;  %v7977_v58 = vsel %vm961_vm1, %v2884_v63, %v2886_v30  ;;  %v7980_v2 = vsel %vm961_vm1, %v2883_v23, %v2884_v63  ;;  %v10664_v30 = vld [vmem:[#allocation47_spill] sm:$0xff]  ;;  %v10666_v23 = vld [vmem:[#allocation46_spill] sm:$0xff] }
 0x356   : > { %10662 = vst [vmem:[#allocation108_spill] sm:$0xff] %v7977_v58  ;;  %10663 = vst [vmem:[#allocation32_spill] sm:$0xff] %v7980_v2  ;;  %v2531_v8 = vmul.f32 %v7629_v61, %v2493_v7  ;;  %2951 = vrot.lane.b32.xlu0 %v7977_v58, %s5422_s16  ;;  %2949 = vrot.lane.b32.xlu1 %v7980_v2, %s5422_s16 }
 0x357   : > { %v2530_v28 = vmul.f32 %v7629_v61, %v2492_v36 }
 0x358   : > { %v2569_v26 = vadd.f32 %v7632_v57, %v2531_v8 }
 0x359   : > { %v2568_v40 = vadd.f32 %v7632_v57, %v2530_v28 }
 0x35a   : > { %v5336_v37 = vpop.eup %5335  ;;  %v7991_v35 = vadd.f32 %v2569_v26, %v10664_v30 }
 0x35b   : > { %v5338_v63 = vpop.eup %5337  ;;  %v7994_v31 = vadd.f32 %v2568_v40, %v10666_v23  ;;  %v2712_v7 = vrot.slane %v5336_v37, 7 }
 0x35c   : > { %10665 = vst [vmem:[#allocation182_spill] sm:$0xff] %v7991_v35  ;;  %v2711_v27 = vrot.slane %v5338_v63, 7  ;;  %5339 = vtanh.f32 %v7991_v35 }
 0x35d   : > { %10667 = vst [vmem:[#allocation140_spill] sm:$0xff] %v7994_v31  ;;  %5341 = vtanh.f32 %v7994_v31  ;;  %v7999_v36 = vsel %vm802_vm0, %v2712_v7, 0.0 }
 0x35e   : > { %v8002_v8 = vsel %vm802_vm0, 0.0, %v2711_v27  ;;  %v8005_v28 = vsel %vm802_vm0, %v2711_v27, %v2712_v7  ;;  %v2891_v26 = vrot.slane %v7999_v36, 1 }
 0x35f   : > { %v5086_v30 = vpop.f32.mrb[24].mxu0  ;;  %v2889_v40 = vrot.slane %v8005_v28, 1  ;;  %v2888_v37 = vrot.slane %v8002_v8, 1 }
 0x360   : > { %v2495_v63 = vmax.f32 %v5086_v30, 0.0  ;;  %v2431_v23 = vpop.f32.mrb[25].mxu0 }
 0x361   : > { %v2494_v35 = vmax.f32 %v2431_v23, 0.0  ;;  %v8011_v31 = vsel %vm961_vm1, %v2889_v40, %v2891_v26  ;;  %v8014_v58 = vsel %vm961_vm1, %v2888_v37, %v2889_v40  ;;  %v10670_v26 = vld [vmem:[#allocation49_spill] sm:$0xff]  ;;  %v10672_v37 = vld [vmem:[#allocation48_spill] sm:$0xff] }
 0x362   : > { %10668 = vst [vmem:[#allocation27_spill] sm:$0xff] %v8011_v31  ;;  %10669 = vst [vmem:[#allocation161_spill] sm:$0xff] %v8014_v58  ;;  %v2533_v2 = vmul.f32 %v7629_v61, %v2495_v63  ;;  %2955 = vrot.lane.b32.xlu0 %v8011_v31, %s5422_s16  ;;  %2953 = vrot.lane.b32.xlu1 %v8014_v58, %s5422_s16 }
 0x363   : > { %v2532_v27 = vmul.f32 %v7629_v61, %v2494_v35 }
 0x364   : > { %v2571_v7 = vadd.f32 %v7632_v57, %v2533_v2 }
 0x365   : > { %v2570_v30 = vadd.f32 %v7632_v57, %v2532_v27 }
 0x366   : > { %v5340_v23 = vpop.eup %5339  ;;  %v8025_v42 = vadd.f32 %v2571_v7, %v10670_v26 }
 0x367   : > { %v5342_v40 = vpop.eup %5341  ;;  %v8028_v47 = vadd.f32 %v2570_v30, %v10672_v37  ;;  %v2715_v63 = vrot.slane %v5340_v23, 7 }
 0x368   : > { %10671 = vst [vmem:[#allocation162_spill] sm:$0xff] %v8025_v42  ;;  %v2714_v53 = vrot.slane %v5342_v40, 7  ;;  %5343 = vtanh.f32 %v8025_v42 }
 0x369   : > { %10673 = vst [vmem:[#allocation183_spill] sm:$0xff] %v8028_v47  ;;  %5345 = vtanh.f32 %v8028_v47  ;;  %v8033_v35 = vsel %vm802_vm0, %v2715_v63, 0.0 }
 0x36a   : > { %v8036_v2 = vsel %vm802_vm0, 0.0, %v2714_v53  ;;  %v8039_v27 = vsel %vm802_vm0, %v2714_v53, %v2715_v63  ;;  %v2896_v7 = vrot.slane %v8033_v35, 1 }
 0x36b   : > { %10674 = vst [vmem:[#allocation184_spill] sm:$0xff] %v8036_v2  ;;  %10675 = vst [vmem:[#allocation6_spill] sm:$0xff] %v8039_v27  ;;  %v5089_v26 = vpop.f32.mrb[26].mxu0  ;;  %v2894_v30 = vrot.slane %v8039_v27, 1  ;;  %v2893_v23 = vrot.slane %v8036_v2, 1 }
 0x36c   : > { %v2497_v40 = vmax.f32 %v5089_v26, 0.0  ;;  %v2441_v37 = vpop.f32.mrb[27].mxu0 }
 0x36d   : > { %v2496_v42 = vmax.f32 %v2441_v37, 0.0  ;;  %v8045_v47 = vsel %vm961_vm1, %v2894_v30, %v2896_v7  ;;  %v8048_v31 = vsel %vm961_vm1, %v2893_v23, %v2894_v30  ;;  %v10678_v7 = vld [vmem:[#allocation53_spill] sm:$0xff]  ;;  %v10680_v23 = vld [vmem:[#allocation52_spill] sm:$0xff] }
 0x36e   : > { %10676 = vst [vmem:[#allocation86_spill] sm:$0xff] %v8045_v47  ;;  %10677 = vst [vmem:[#allocation109_spill] sm:$0xff] %v8048_v31  ;;  %v2535_v58 = vmul.f32 %v7629_v61, %v2497_v40  ;;  %2959 = vrot.lane.b32.xlu0 %v8045_v47, %s5422_s16  ;;  %2957 = vrot.lane.b32.xlu1 %v8048_v31, %s5422_s16 }
 0x36f   : > { %v2534_v53 = vmul.f32 %v7629_v61, %v2496_v42 }
 0x370   : > { %v2573_v63 = vadd.f32 %v7632_v57, %v2535_v58 }
 0x371   : > { %v2572_v26 = vadd.f32 %v7632_v57, %v2534_v53 }
 0x372   : > { %v5344_v37 = vpop.eup %5343  ;;  %v8059_v55 = vadd.f32 %v2573_v63, %v10678_v7 }
 0x373   : > { %v5346_v30 = vpop.eup %5345  ;;  %v8062_v1 = vadd.f32 %v2572_v26, %v10680_v23  ;;  %v2718_v40 = vrot.slane %v5344_v37, 7 }
 0x374   : > { %10679 = vst [vmem:[#allocation33_spill] sm:$0xff] %v8059_v55  ;;  %v2717_v5 = vrot.slane %v5346_v30, 7  ;;  %5347 = vtanh.f32 %v8059_v55 }
 0x375   : > { %10681 = vst [vmem:[#allocation110_spill] sm:$0xff] %v8062_v1  ;;  %5349 = vtanh.f32 %v8062_v1  ;;  %v8067_v42 = vsel %vm802_vm0, %v2718_v40, 0.0 }
 0x376   : > { %v8070_v58 = vsel %vm802_vm0, 0.0, %v2717_v5  ;;  %v8073_v53 = vsel %vm802_vm0, %v2717_v5, %v2718_v40  ;;  %v2901_v63 = vrot.slane %v8067_v42, 1 }
 0x377   : > { %10682 = vst [vmem:[#allocation34_spill] sm:$0xff] %v8070_v58  ;;  %10683 = vst [vmem:[#allocation141_spill] sm:$0xff] %v8073_v53  ;;  %v5092_v7 = vpop.f32.mrb[28].mxu0  ;;  %v2899_v26 = vrot.slane %v8073_v53, 1  ;;  %v2898_v37 = vrot.slane %v8070_v58, 1 }
 0x378   : > { %v2499_v30 = vmax.f32 %v5092_v7, 0.0  ;;  %v2451_v23 = vpop.f32.mrb[29].mxu0 }
 0x379   : > { %v2498_v55 = vmax.f32 %v2451_v23, 0.0  ;;  %v8079_v1 = vsel %vm961_vm1, %v2899_v26, %v2901_v63  ;;  %v8082_v47 = vsel %vm961_vm1, %v2898_v37, %v2899_v26 }
 0x37a   : > { %10684 = vst [vmem:[#allocation28_spill] sm:$0xff] %v8079_v1  ;;  %10685 = vst [vmem:[#allocation163_spill] sm:$0xff] %v8082_v47  ;;  %v2537_v31 = vmul.f32 %v7629_v61, %v2499_v30  ;;  %2963 = vrot.lane.b32.xlu0 %v8079_v1, %s5422_s16  ;;  %2961 = vrot.lane.b32.xlu1 %v8082_v47, %s5422_s16 }
 0x37b   : > { %v2536_v5 = vmul.f32 %v7629_v61, %v2498_v55 }
 0x37c   : > { %v2575_v40 = vadd.f32 %v7632_v57, %v2537_v31 }
 0x37d   : > { %v2574_v7 = vadd.f32 %v7632_v57, %v2536_v5  ;;  %v8092_v23 = vpop.f32.mrb[30].mxu0 }
 0x37e   : > { %10686 = vst [vmem:[#allocation164_spill] sm:$0xff] %v8092_v23  ;;  %v5348_v63 = vpop.eup %5347  ;;  %v8095_v26 = vadd.f32 %v2575_v40, %v10687_v24  ;;  %v8097_v37 = vpop.f32.mrb[31].mxu0  ;;  %v3003_v23 = vrot.slane %v7673_v38, 2 }
 0x37f   : > { %10689 = vst [vmem:[#allocation186_spill] sm:$0xff] %v8097_v37  ;;  %v5350_v30 = vpop.eup %5349  ;;  %v8100_v1 = vadd.f32 %v2574_v7, %v10690_v10  ;;  %v2721_v12 = vrot.slane %v5348_v63, 7  ;;  %v3006_v37 = vrot.slane %v7663_v13, 2  ;;  %v3008_v13 = vrot.slane %v7700_v45, 2 }
 0x380   : > { %10688 = vst [vmem:[#allocation185_spill] sm:$0xff] %v8095_v26  ;;  %v2720_v47 = vrot.slane %v5350_v30, 7  ;;  %5351 = vtanh.f32 %v8095_v26 }
 0x381   : > { %10691 = vst [vmem:[#allocation111_spill] sm:$0xff] %v8100_v1  ;;  %5353 = vtanh.f32 %v8100_v1  ;;  %v8105_v61 = vsel %vm802_vm0, %v2721_v12, 0.0 }
 0x382   : > { %v8108_v57 = vsel %vm802_vm0, 0.0, %v2720_v47  ;;  %v8111_v31 = vsel %vm802_vm0, %v2720_v47, %v2721_v12  ;;  %v2906_v55 = vrot.slane %v8105_v61, 1 }
 0x383   : > { %10692 = vst [vmem:[#allocation35_spill] sm:$0xff] %v8108_v57  ;;  %10693 = vst [vmem:[#allocation112_spill] sm:$0xff] %v8111_v31  ;;  %v2904_v10 = vrot.slane %v8111_v31, 1  ;;  %v2903_v24 = vrot.slane %v8108_v57, 1 }
 0x385   : > { %v8117_v5 = vsel %vm961_vm1, %v2904_v10, %v2906_v55  ;;  %v8122_v40 = vsel %vm961_vm1, %v2903_v24, %v2904_v10 }
 0x386   : > { %10694 = vst [vmem:[#allocation30_spill] sm:$0xff] %v8117_v5  ;;  %2967 = vrot.lane.b32.xlu0 %v8117_v5, %s5422_s16  ;;  %10695 = vst [vmem:[#allocation31_spill] sm:$0xff] %v8122_v40  ;;  %2965 = vrot.lane.b32.xlu1 %v8122_v40, %s5422_s16  ;;  %v3004_v5 = vrot.slane %v7669_v21, 2 }
 0x38a   : > { %v5352_v47 = vpop.eup %5351 }
 0x38b   : > { %v5354_v12 = vpop.eup %5353  ;;  %v2724_v7 = vrot.slane %v5352_v47, 7 }
 0x38c   : > { %v2723_v63 = vrot.slane %v5354_v12, 7 }
 0x38d   : > { %v8127_v30 = vsel %vm802_vm0, %v2724_v7, 0.0 }
 0x38e   : > { %v8130_v1 = vsel %vm802_vm0, 0.0, %v2723_v63  ;;  %v8133_v55 = vsel %vm802_vm0, %v2723_v63, %v2724_v7  ;;  %v2911_v26 = vrot.slane %v8127_v30, 1  ;;  %v3009_v7 = vrot.slane %v7706_v22, 2 }
 0x38f   : > { %10696 = vst [vmem:[#allocation165_spill] sm:$0xff] %v8130_v1  ;;  %10697 = vst [vmem:[#allocation166_spill] sm:$0xff] %v8133_v55  ;;  %v2909_v10 = vrot.slane %v8133_v55, 1  ;;  %v2908_v24 = vrot.slane %v8130_v1, 1  ;;  %v3011_v63 = vrot.slane %v7697_v4, 2  ;;  %v3014_v4 = vrot.slane %v7743_v56, 2 }
 0x391   : > { %v8140_v47 = vsel %vm961_vm1, %v2909_v10, %v2911_v26  ;;  %v8143_v12 = vsel %vm961_vm1, %v2908_v24, %v2909_v10  ;;  %v8154_v26 = vsel %vm1132_vm2, %v3004_v5, %v3006_v37  ;;  %v8157_v10 = vsel %vm1132_vm2, %v3003_v23, %v3004_v5 }
 0x392   : > { %10698 = vst [vmem:[#allocation187_spill] sm:$0xff] %v8140_v47  ;;  %10699 = vst [vmem:[#allocation188_spill] sm:$0xff] %v8143_v12  ;;  %2971 = vrot.lane.b32.xlu0 %v8140_v47, %s5422_s16  ;;  %2969 = vrot.lane.b32.xlu1 %v8143_v12, %s5422_s16  ;;  %v8165_v24 = vsel %vm1132_vm2, %v3009_v7, %v3011_v63  ;;  %v8168_v47 = vsel %vm1132_vm2, %v3008_v13, %v3009_v7  ;;  %v3016_v37 = vrot.slane %v7734_v19, 2 }
 0x393   : > { %v3013_v23 = vrot.slane %v7737_v41, 2  ;;  %v3019_v5 = vrot.slane %v7777_v51, 2  ;;  %v3021_v63 = vrot.slane %v7768_v15, 2  ;;  %v3018_v19 = vrot.slane %v7771_v44, 2 }
 0x394   : > { %v8180_v12 = vsel %vm1132_vm2, %v3014_v4, %v3016_v37  ;;  %v3024_v15 = vrot.slane %v7808_v46, 2  ;;  %v3026_v37 = vrot.slane %v7799_v60, 2  ;;  %v3028_v60 = vrot.slane %v7836_v14, 2 }
 0x395   : > { %v8183_v7 = vsel %vm1132_vm2, %v3013_v23, %v3014_v4  ;;  %v8191_v13 = vsel %vm1132_vm2, %v3019_v5, %v3021_v63  ;;  %v8194_v40 = vsel %vm1132_vm2, %v3018_v19, %v3019_v5  ;;  %v3023_v4 = vrot.slane %v7802_v6, 2 }
 0x396   : > { %3080 = vrot.lane.b32.xlu0 %v8154_v26, %s5423_s14  ;;  %3078 = vrot.lane.b32.xlu1 %v8157_v10, %s5423_s14  ;;  %10700 = vst [vmem:[#allocation113_spill] sm:$0xff] %v8191_v13  ;;  %v3029_v23 = vrot.slane %v7842_v17, 2  ;;  %v3031_v63 = vrot.slane %v7833_v59, 2  ;;  %v8206_v52 = vsel %vm1132_vm2, %v3024_v15, %v3026_v37  ;;  %v3034_v59 = vrot.slane %v7871_v9, 2 }
 0x397   : > { %10701 = vst [vmem:[#allocation114_spill] sm:$0xff] %v8206_v52  ;;  %v8209_v5 = vsel %vm1132_vm2, %v3023_v4, %v3024_v15  ;;  %v3036_v37 = vrot.slane %v7864_v29, 2  ;;  %v3033_v15 = vrot.slane %v7867_v54, 2  ;;  %v3039_v4 = vrot.slane %v7903_v20, 2 }
 0x398   : > { %v8217_v19 = vsel %vm1132_vm2, %v3029_v23, %v3031_v63  ;;  %v3041_v63 = vrot.slane %v7897_v34, 2  ;;  %v3038_v29 = vrot.slane %v7900_v0, 2  ;;  %v3044_v34 = vrot.slane %v7937_v50, 2 }
 0x39a   : > { %3084 = vrot.lane.b32.xlu0 %v8165_v24, %s5423_s14  ;;  %3082 = vrot.lane.b32.xlu1 %v8168_v47, %s5423_s14  ;;  %v8246_v20 = vsel %vm1132_vm2, %v3038_v29, %v3039_v4 }
 0x39e   : > { %3088 = vrot.lane.b32.xlu0 %v8180_v12, %s5423_s14  ;;  %3086 = vrot.lane.b32.xlu1 %v8183_v7, %s5423_s14 }
 0x3a2   : > { %3092 = vrot.lane.b32.xlu0 %v8191_v13, %s5423_s14  ;;  %3090 = vrot.lane.b32.xlu1 %v8194_v40, %s5423_s14  ;;  %v8220_v13 = vsel %vm1132_vm2, %v3028_v60, %v3029_v23  ;;  %v8235_v23 = vsel %vm1132_vm2, %v3033_v15, %v3034_v59  ;;  %v8243_v60 = vsel %vm1132_vm2, %v3039_v4, %v3041_v63  ;;  %v3049_v15 = vrot.slane %v7971_v3, 2 }
 0x3a3   : > { %v3051_v63 = vrot.slane %v7965_v18, 2  ;;  %v3054_v18 = vrot.slane %v8005_v28, 2 }
 0x3a5   : > { %v8269_v29 = vsel %vm1132_vm2, %v3049_v15, %v3051_v63  ;;  %v3061_v63 = vrot.slane %v8033_v35, 2  ;;  %v3064_v35 = vrot.slane %v8073_v53, 2 }
 0x3a6   : > { %3096 = vrot.lane.b32.xlu0 %v8206_v52, %s5423_s14  ;;  %3094 = vrot.lane.b32.xlu1 %v8209_v5, %s5423_s14  ;;  %v8232_v52 = vsel %vm1132_vm2, %v3034_v59, %v3036_v37  ;;  %v3046_v37 = vrot.slane %v7931_v11, 2  ;;  %v3043_v59 = vrot.slane %v7934_v43, 2  ;;  %v3048_v11 = vrot.slane %v7968_v39, 2 }
 0x3a8   : > { %v8258_v0 = vsel %vm1132_vm2, %v3044_v34, %v3046_v37  ;;  %v8261_v4 = vsel %vm1132_vm2, %v3043_v59, %v3044_v34  ;;  %v8272_v3 = vsel %vm1132_vm2, %v3048_v11, %v3049_v15  ;;  %v3056_v37 = vrot.slane %v7999_v36, 2 }
 0x3a9   : > { %v3053_v34 = vrot.slane %v8002_v8, 2  ;;  %v3059_v59 = vrot.slane %v8039_v27, 2  ;;  %v3058_v36 = vrot.slane %v8036_v2, 2 }
 0x3aa   : > { %3100 = vrot.lane.b32.xlu0 %v8217_v19, %s5423_s14  ;;  %3098 = vrot.lane.b32.xlu1 %v8220_v13, %s5423_s14  ;;  %v8284_v39 = vsel %vm1132_vm2, %v3054_v18, %v3056_v37  ;;  %v3066_v37 = vrot.slane %v8067_v42, 2  ;;  %v3068_v42 = vrot.slane %v8108_v57, 2  ;;  %v8335_v57 = vpop.permute.xlu0 %2915 }
 0x3ab   : > { %v8287_v15 = vsel %vm1132_vm2, %v3053_v34, %v3054_v18  ;;  %v8295_v11 = vsel %vm1132_vm2, %v3059_v59, %v3061_v63  ;;  %v8298_v27 = vsel %vm1132_vm2, %v3058_v36, %v3059_v59  ;;  %v3063_v18 = vrot.slane %v8070_v58, 2 }
 0x3ac   : > { %10702 = vst [vmem:[#allocation36_spill] sm:$0xff] %v8295_v11  ;;  %10703 = vst [vmem:[#allocation37_spill] sm:$0xff] %v8298_v27  ;;  %v3069_v34 = vrot.slane %v8111_v31, 2  ;;  %v3071_v63 = vrot.slane %v8105_v61, 2  ;;  %v8310_v2 = vsel %vm1132_vm2, %v3064_v35, %v3066_v37  ;;  %v3074_v61 = vrot.slane %v8133_v55, 2 }
 0x3ad   : > { %10704 = vst [vmem:[#allocation167_spill] sm:$0xff] %v8310_v2  ;;  %v8313_v59 = vsel %vm1132_vm2, %v3063_v18, %v3064_v35  ;;  %v3076_v37 = vrot.slane %v8127_v30, 2  ;;  %v3073_v35 = vrot.slane %v8130_v1, 2  ;;  %v8333_v18 = vpop.permute.xlu1 %2913 }
 0x3ae   : > { %3104 = vrot.lane.b32.xlu0 %v8232_v52, %s5423_s14  ;;  %3102 = vrot.lane.b32.xlu1 %v8235_v23, %s5423_s14  ;;  %10705 = vst [vmem:[#allocation168_spill] sm:$0xff] %v8313_v59  ;;  %v8321_v36 = vsel %vm1132_vm2, %v3069_v34, %v3071_v63  ;;  %v8324_v31 = vsel %vm1132_vm2, %v3068_v42, %v3069_v34  ;;  %v8349_v42 = vpop.permute.xlu0 %2919 }
 0x3af   : > { %10706 = vst [vmem:[#allocation189_spill] sm:$0xff] %v8321_v36  ;;  %10707 = vst [vmem:[#allocation115_spill] sm:$0xff] %v8324_v31  ;;  %v8338_v63 = vsel %vm1132_vm2, %v3074_v61, %v3076_v37  ;;  %v8341_v34 = vsel %vm1132_vm2, %v3073_v35, %v3074_v61 }
 0x3b0   : > { %10708 = vst [vmem:[#allocation38_spill] sm:$0xff] %v8338_v63  ;;  %10709 = vst [vmem:[#allocation169_spill] sm:$0xff] %v8341_v34 }
 0x3b1   : > { %v8347_v30 = vpop.permute.xlu1 %2917 }
 0x3b2   : > { %3108 = vrot.lane.b32.xlu0 %v8243_v60, %s5423_s14  ;;  %3106 = vrot.lane.b32.xlu1 %v8246_v20, %s5423_s14  ;;  %v8357_v61 = vpop.permute.xlu0 %2923 }
 0x3b5   : > { %v8355_v37 = vpop.permute.xlu1 %2921 }
 0x3b6   : > { %3112 = vrot.lane.b32.xlu0 %v8258_v0, %s5423_s14  ;;  %3110 = vrot.lane.b32.xlu1 %v8261_v4, %s5423_s14 }
 0x3b9   : > { %v8363_v35 = vpop.permute.xlu1 %2925 }
 0x3ba   : > { %3116 = vrot.lane.b32.xlu0 %v8269_v29, %s5423_s14  ;;  %3114 = vrot.lane.b32.xlu1 %v8272_v3, %s5423_s14 }
 0x3be   : > { %3120 = vrot.lane.b32.xlu0 %v8284_v39, %s5423_s14  ;;  %3118 = vrot.lane.b32.xlu1 %v8287_v15, %s5423_s14 }
 0x3c2   : > { %3124 = vrot.lane.b32.xlu0 %v8295_v11, %s5423_s14  ;;  %3122 = vrot.lane.b32.xlu1 %v8298_v27, %s5423_s14  ;;  %v10770_v27 = vld [vmem:[#allocation157_spill] sm:$0xff] }
 0x3c6   : > { %3128 = vrot.lane.b32.xlu0 %v8310_v2, %s5423_s14  ;;  %3126 = vrot.lane.b32.xlu1 %v8313_v59, %s5423_s14 }
 0x3ca   : > { %3132 = vrot.lane.b32.xlu0 %v8321_v36, %s5423_s14  ;;  %3130 = vrot.lane.b32.xlu1 %v8324_v31, %s5423_s14 }
 0x3ce   : > { %3136 = vrot.lane.b32.xlu0 %v8338_v63, %s5423_s14  ;;  %3134 = vrot.lane.b32.xlu1 %v8341_v34, %s5423_s14  ;;  %v8365_v63 = vpop.permute.xlu0 %2927  ;;  %v8371_v34 = vpop.permute.xlu1 %2929  ;;  %s540_s14 = scalar_lea.vmem %s9821_s5, %s5170_s17  ;;  %s10725_s17 = smov 24  }
 0x3cf   : > { %10710 = vst [vmem:[#allocation190_spill] sm:$0xff] %v8371_v34  ;;  %v10773_v34 = vld [vmem:[#allocation106_spill] sm:$0xff] }
 0x3d2   : > { %3171 = vrot.lane.b32.xlu0 %v7669_v21, %s5424_s0  ;;  %3169 = vrot.lane.b32.xlu1 %v7673_v38, %s5424_s0  ;;  %v8373_v55 = vpop.permute.xlu0 %2931  ;;  %v8379_v1 = vpop.permute.xlu1 %2933 }
 0x3d3   : > { %10711 = vst [vmem:[#allocation116_spill] sm:$0xff] %v8373_v55  ;;  %10712 = vst [vmem:[#allocation206_spill] sm:$0xff] %v8379_v1 }
 0x3d6   : > { %3175 = vrot.lane.b32.xlu0 %v7706_v22, %s5424_s0  ;;  %3173 = vrot.lane.b32.xlu1 %v7700_v45, %s5424_s0  ;;  %v8381_v36 = vpop.permute.xlu0 %2935  ;;  %v8387_v31 = vpop.permute.xlu1 %2937 }
 0x3d7   : > { %10713 = vst [vmem:[#allocation39_spill] sm:$0xff] %v8381_v36  ;;  %10714 = vst [vmem:[#allocation71_spill] sm:$0xff] %v8387_v31 }
 0x3da   : > { %3179 = vrot.lane.b32.xlu0 %v7743_v56, %s5424_s0  ;;  %3177 = vrot.lane.b32.xlu1 %v7737_v41, %s5424_s0  ;;  %v8389_v2 = vpop.permute.xlu0 %2939  ;;  %v8395_v59 = vpop.permute.xlu1 %2941 }
 0x3db   : > { %10715 = vst [vmem:[#allocation170_spill] sm:$0xff] %v8389_v2  ;;  %10716 = vst [vmem:[#allocation191_spill] sm:$0xff] %v8395_v59  ;;  %v2643_v59 = vld [vmem:[%s540_s14 + $0x8] sm:$0xff] }
 0x3de   : > { %3183 = vrot.lane.b32.xlu0 %v7777_v51, %s5424_s0  ;;  %3181 = vrot.lane.b32.xlu1 %v7771_v44, %s5424_s0  ;;  %v8397_v53 = vpop.permute.xlu0 %2943  ;;  %v8403_v36 = vpop.permute.xlu1 %2945 }
 0x3df   : > { %10717 = vst [vmem:[#allocation56_spill] sm:$0xff] %v8397_v53  ;;  %10718 = vst [vmem:[#allocation117_spill] sm:$0xff] %v8403_v36  ;;  %v2642_v53 = vld [vmem:[%s540_s14] sm:$0xff] }
 0x3e0   : > { %v5162_v36 = vpack.c.bf16 %v2643_v59, %v2642_v53  ;;  %v2646_v53 = vld [vmem:[%s540_s14 + $0x20] sm:$0xf] }
 0x3e2   : > { %3187 = vrot.lane.b32.xlu0 %v7808_v46, %s5424_s0  ;;  %3185 = vrot.lane.b32.xlu1 %v7802_v6, %s5424_s0  ;;  %v8405_v31 = vpop.permute.xlu0 %2947  ;;  %v8416_v2 = vpop.permute.xlu1 %2949 }
 0x3e3   : > { %10719 = vst [vmem:[#allocation54_spill] sm:$0xff] %v8405_v31  ;;  %10720 = vst [vmem:[#allocation40_spill] sm:$0xff] %v8416_v2  ;;  %5163 = vmatprep.subr.bf16.mxu1 %v5162_v36 }
 0x3e4   : > { %5165 = vmatpush3.bf16.msra.mxu1 %v5162_v36 }
 0x3e6   : > { %3191 = vrot.lane.b32.xlu0 %v7842_v17, %s5424_s0  ;;  %3189 = vrot.lane.b32.xlu1 %v7836_v14, %s5424_s0  ;;  %v8418_v58 = vpop.permute.xlu0 %2951  ;;  %v8424_v31 = vpop.permute.xlu1 %2953 }
 0x3e7   : > { %10721 = vst [vmem:[#allocation171_spill] sm:$0xff] %v8418_v58  ;;  %10723 = vst [vmem:[#allocation192_spill] sm:$0xff] %v8424_v31 }
 0x3ea   : > { %3195 = vrot.lane.b32.xlu0 %v7871_v9, %s5424_s0  ;;  %3193 = vrot.lane.b32.xlu1 %v7867_v54, %s5424_s0  ;;  %v8426_v1 = vpop.permute.xlu0 %2955 }
 0x3eb   : > { %10724 = vst [vmem:[#allocation118_spill] sm:$0xff] %v8426_v1  ;;  %v10744_v1 = vld [vmem:[#allocation101_spill] sm:$0xff] }
 0x3ee   : > { %3273 = vrot.lane.b32.xlu0 %v7683_v32, %s5425_s29  ;;  %3271 = vrot.lane.b32.xlu1 %v7686_v62, %s5425_s29  ;;  %v2644_v32 = vld [vmem:[%s540_s14 + $0x10] sm:$0xff]  ;;  %v2645_v62 = vld [vmem:[%s540_s14 + $0x18] sm:$0xff]  ;;  %s552_s14 = scalar_lea.vmem %s9825_s9, %s5555_s15 }
 0x3ef   : > { %v5166_v11 = vpack.c.bf16 %v2645_v62, %v2644_v32 }
 0x3f1   : > { %5167 = vmatprep.subr.bf16.mxu1 %v5166_v11 }
 0x3f2   : > { %3374 = vrot.lane.b32.xlu0 %v8154_v26, %s10722_s13  ;;  %3372 = vrot.lane.b32.xlu1 %v8157_v10, %s10722_s13  ;;  %v8432_v26 = vpop.permute.xlu1 %2957  ;;  %v8434_v10 = vpop.permute.xlu0 %2959 }
 0x3f3   : > { %10726 = vst [vmem:[#allocation55_spill] sm:$0xff] %v8432_v26  ;;  %10727 = vst [vmem:[#allocation57_spill] sm:$0xff] %v8434_v10  ;;  %5169 = vmatpush3.bf16.msra.mxu1 %v5166_v11 }
 0x3f4   : > { %5104 = vmatprep.subr.msk.mxu1 %vm2241_vm3, %v2646_v53 }
 0x3f6   : > { %3470 = vrot.lane.b32.xlu0 %v7706_v22, %s10725_s17  ;;  %3468 = vrot.lane.b32.xlu1 %v7700_v45, %s10725_s17  ;;  %v8441_v59 = vpop.permute.xlu1 %2961  ;;  %v8443_v36 = vpop.permute.xlu0 %2963 }
 0x3f7   : > { %10729 = vst [vmem:[#allocation42_spill] sm:$0xff] %v8441_v59  ;;  %10730 = vst [vmem:[#allocation172_spill] sm:$0xff] %v8443_v36  ;;  %5105 = vmatpush3.msk.msra.mxu1 %vm2241_vm3, %v2646_v53 }
 0x3fa   : > { %3275 = vrot.lane.b32.xlu0 %v7721_v49, %s5425_s29  ;;  %3558 = vrot.lane.b32.xlu1 %v7721_v49, %s10728_s18  ;;  %v8450_v11 = vpop.permute.xlu1 %2965  ;;  %v8452_v32 = vpop.permute.xlu0 %2967 }
 0x3fb   : > { %10732 = vst [vmem:[#allocation193_spill] sm:$0xff] %v8450_v11  ;;  %10733 = vst [vmem:[#allocation207_spill] sm:$0xff] %v8452_v32 }
 0x3fe   : > { %3648 = vrot.lane.b32.xlu0 %v8168_v47, %s10731_s28  ;;  %3560 = vrot.lane.b32.xlu1 %v7718_v16, %s10728_s18 }
 0x402   : > { %3376 = vrot.lane.b32.xlu0 %v8168_v47, %s10722_s13  ;;  %3277 = vrot.lane.b32.xlu1 %v7718_v16, %s5425_s29 }
 0x404   : > { %v8458_v49 = vpop.permute.xlu1 %2969  ;;  %v8460_v62 = vpop.permute.xlu0 %2971 }
 0x405   : > { %10734 = vst [vmem:[#allocation119_spill] sm:$0xff] %v8458_v49  ;;  %10735 = vst [vmem:[#allocation59_spill] sm:$0xff] %v8460_v62 }
 0x406   : > { %3378 = vrot.lane.b32.xlu0 %v8165_v24, %s10722_s13  ;;  %3650 = vrot.lane.b32.xlu1 %v8165_v24, %s10731_s28 }
 0x408   : > { %v8466_v53 = vpop.permute.xlu1 %3078  ;;  %v8468_v11 = vpop.permute.xlu0 %3080 }
 0x40a   : > { %3474 = vrot.lane.b32.xlu0 %v7743_v56, %s10725_s17  ;;  %3472 = vrot.lane.b32.xlu1 %v7737_v41, %s10725_s17 }
 0x40c   : > { %v8474_v16 = vpop.permute.xlu1 %3082  ;;  %v8476_v47 = vpop.permute.xlu0 %3084 }
 0x40e   : > { %3279 = vrot.lane.b32.xlu0 %v7755_v25, %s5425_s29  ;;  %3562 = vrot.lane.b32.xlu1 %v7755_v25, %s10728_s18 }
 0x410   : > { %v8482_v24 = vpop.permute.xlu1 %3086  ;;  %v8484_v62 = vpop.permute.xlu0 %3088 }
 0x412   : > { %3652 = vrot.lane.b32.xlu0 %v8183_v7, %s10731_s28  ;;  %3564 = vrot.lane.b32.xlu1 %v7752_v33, %s10728_s18 }
 0x414   : > { %v8490_v32 = vpop.permute.xlu1 %3090  ;;  %v8492_v49 = vpop.permute.xlu0 %3092 }
 0x416   : > { %3281 = vrot.lane.b32.xlu1 %v7752_v33, %s5425_s29  ;;  %3380 = vrot.lane.b32.xlu0 %v8183_v7, %s10722_s13 }
 0x418   : > { %v8498_v25 = vpop.permute.xlu1 %3094  ;;  %v8500_v36 = vpop.permute.xlu0 %3096 }
 0x419   : > { %10736 = vst [vmem:[#allocation50_spill] sm:$0xff] %v8498_v25  ;;  %10737 = vst [vmem:[#allocation173_spill] sm:$0xff] %v8500_v36 }
 0x41a   : > { %3654 = vrot.lane.b32.xlu1 %v8180_v12, %s10731_s28  ;;  %3382 = vrot.lane.b32.xlu0 %v8180_v12, %s10722_s13 }
 0x41c   : > { %v8506_v59 = vpop.permute.xlu1 %3098  ;;  %v8508_v10 = vpop.permute.xlu0 %3100 }
 0x41d   : > { %10738 = vst [vmem:[#allocation194_spill] sm:$0xff] %v8506_v59  ;;  %10739 = vst [vmem:[#allocation120_spill] sm:$0xff] %v8508_v10  ;;  %v10769_v59 = vld [vmem:[#allocation159_spill] sm:$0xff] }
 0x41e   : > { %3476 = vrot.lane.b32.xlu1 %v7771_v44, %s10725_s17  ;;  %3478 = vrot.lane.b32.xlu0 %v7777_v51, %s10725_s17 }
 0x420   : > { %v8514_v33 = vpop.permute.xlu1 %3102  ;;  %v8516_v7 = vpop.permute.xlu0 %3104 }
 0x421   : > { %10740 = vst [vmem:[#allocation58_spill] sm:$0xff] %v8514_v33  ;;  %10741 = vst [vmem:[#allocation208_spill] sm:$0xff] %v8516_v7 }
 0x422   : > { %3566 = vrot.lane.b32.xlu1 %v7789_v48, %s10728_s18  ;;  %3283 = vrot.lane.b32.xlu0 %v7789_v48, %s5425_s29 }
 0x424   : > { %v8522_v12 = vpop.permute.xlu1 %3106  ;;  %v8524_v26 = vpop.permute.xlu0 %3108 }
 0x425   : > { %10742 = vst [vmem:[#allocation51_spill] sm:$0xff] %v8522_v12  ;;  %10743 = vst [vmem:[#allocation90_spill] sm:$0xff] %v8524_v26  ;;  %v10749_v26 = vld [vmem:[#allocation113_spill] sm:$0xff] }
 0x426   : > { %3568 = vrot.lane.b32.xlu1 %v10744_v1, %s10728_s18  ;;  %3656 = vrot.lane.b32.xlu0 %v8194_v40, %s10731_s28 }
 0x428   : > { %v8530_v31 = vpop.permute.xlu1 %3110  ;;  %v8532_v58 = vpop.permute.xlu0 %3112 }
 0x429   : > { %10745 = vst [vmem:[#allocation195_spill] sm:$0xff] %v8530_v31  ;;  %10746 = vst [vmem:[#allocation60_spill] sm:$0xff] %v8532_v58 }
 0x42a   : > { %3285 = vrot.lane.b32.xlu1 %v10744_v1, %s5425_s29  ;;  %3384 = vrot.lane.b32.xlu0 %v8194_v40, %s10722_s13 }
 0x42c   : > { %v8538_v48 = vpop.permute.xlu1 %3114  ;;  %v8540_v2 = vpop.permute.xlu0 %3116 }
 0x42d   : > { %10747 = vst [vmem:[#allocation121_spill] sm:$0xff] %v8538_v48  ;;  %10748 = vst [vmem:[#allocation62_spill] sm:$0xff] %v8540_v2  ;;  %v10754_v2 = vld [vmem:[#allocation156_spill] sm:$0xff] }
 0x42e   : > { %3658 = vrot.lane.b32.xlu1 %v10749_v26, %s10731_s28  ;;  %3386 = vrot.lane.b32.xlu0 %v10749_v26, %s10722_s13 }
 0x430   : > { %v8546_v12 = vpop.permute.xlu1 %3118  ;;  %v8548_v31 = vpop.permute.xlu0 %3120 }
 0x431   : > { %10750 = vst [vmem:[#allocation142_spill] sm:$0xff] %v8546_v12  ;;  %10751 = vst [vmem:[#allocation174_spill] sm:$0xff] %v8548_v31  ;;  %v10757_v31 = vld [vmem:[#allocation154_spill] sm:$0xff] }
 0x432   : > { %3480 = vrot.lane.b32.xlu1 %v7802_v6, %s10725_s17  ;;  %3482 = vrot.lane.b32.xlu0 %v7808_v46, %s10725_s17 }
 0x434   : > { %v8554_v1 = vpop.permute.xlu1 %3122  ;;  %v8556_v40 = vpop.permute.xlu0 %3124 }
 0x435   : > { %10752 = vst [vmem:[#allocation196_spill] sm:$0xff] %v8554_v1  ;;  %10753 = vst [vmem:[#allocation122_spill] sm:$0xff] %v8556_v40 }
 0x436   : > { %3570 = vrot.lane.b32.xlu1 %v10754_v2, %s10728_s18  ;;  %3287 = vrot.lane.b32.xlu0 %v10754_v2, %s5425_s29 }
 0x438   : > { %v8562_v26 = vpop.permute.xlu1 %3126  ;;  %v8564_v12 = vpop.permute.xlu0 %3128 }
 0x439   : > { %10755 = vst [vmem:[#allocation65_spill] sm:$0xff] %v8562_v26  ;;  %10756 = vst [vmem:[#allocation61_spill] sm:$0xff] %v8564_v12  ;;  %v10762_v12 = vld [vmem:[#allocation114_spill] sm:$0xff] }
 0x43a   : > { %3572 = vrot.lane.b32.xlu1 %v10757_v31, %s10728_s18  ;;  %3660 = vrot.lane.b32.xlu0 %v8209_v5, %s10731_s28 }
 0x43c   : > { %v8570_v48 = vpop.permute.xlu1 %3130  ;;  %v8572_v1 = vpop.permute.xlu0 %3132 }
 0x43d   : > { %10758 = vst [vmem:[#allocation143_spill] sm:$0xff] %v8570_v48  ;;  %10759 = vst [vmem:[#allocation91_spill] sm:$0xff] %v8572_v1 }
 0x43e   : > { %3289 = vrot.lane.b32.xlu1 %v10757_v31, %s5425_s29  ;;  %3388 = vrot.lane.b32.xlu0 %v8209_v5, %s10722_s13 }
 0x440   : > { %v8578_v2 = vpop.permute.xlu1 %3134  ;;  %v8580_v26 = vpop.permute.xlu0 %3136 }
 0x441   : > { %10760 = vst [vmem:[#allocation197_spill] sm:$0xff] %v8578_v2  ;;  %10761 = vst [vmem:[#allocation209_spill] sm:$0xff] %v8580_v26  ;;  %v10763_v26 = vld [vmem:[#allocation85_spill] sm:$0xff]  ;;  %v10764_v2 = vld [vmem:[#allocation104_spill] sm:$0xff] }
 0x442   : > { %3662 = vrot.lane.b32.xlu1 %v10762_v12, %s10731_s28  ;;  %3390 = vrot.lane.b32.xlu0 %v10762_v12, %s10722_s13 }
 0x444   : > { %v3170_v40 = vpop.permute.xlu1 %3169  ;;  %v3172_v48 = vpop.permute.xlu0 %3171 }
 0x446   : > { %3484 = vrot.lane.b32.xlu1 %v7836_v14, %s10725_s17  ;;  %3486 = vrot.lane.b32.xlu0 %v7842_v17, %s10725_s17 }
 0x448   : > { %v8590_v31 = vpop.permute.xlu1 %3173  ;;  %v8592_v5 = vpop.permute.xlu0 %3175 }
 0x44a   : > { %3574 = vrot.lane.b32.xlu1 %v10763_v26, %s10728_s18  ;;  %3291 = vrot.lane.b32.xlu0 %v10763_v26, %s5425_s29 }
 0x44c   : > { %v8598_v1 = vpop.permute.xlu1 %3177  ;;  %v8600_v12 = vpop.permute.xlu0 %3179 }
 0x44e   : > { %3576 = vrot.lane.b32.xlu1 %v10764_v2, %s10728_s18  ;;  %3664 = vrot.lane.b32.xlu0 %v8220_v13, %s10731_s28 }
 0x450   : > { %v8606_v58 = vpop.permute.xlu1 %3181  ;;  %v8608_v7 = vpop.permute.xlu0 %3183 }
 0x452   : > { %3293 = vrot.lane.b32.xlu1 %v10764_v2, %s5425_s29  ;;  %3392 = vrot.lane.b32.xlu0 %v8220_v13, %s10722_s13 }
 0x454   : > { %v8614_v26 = vpop.permute.xlu1 %3185  ;;  %v8616_v33 = vpop.permute.xlu0 %3187 }
 0x456   : > { %3666 = vrot.lane.b32.xlu1 %v8217_v19, %s10731_s28  ;;  %3394 = vrot.lane.b32.xlu0 %v8217_v19, %s10722_s13 }
 0x458   : > { %v8622_v10 = vpop.permute.xlu1 %3189  ;;  %v8624_v17 = vpop.permute.xlu0 %3191 }
 0x459   : > { %10765 = vst [vmem:[#allocation123_spill] sm:$0xff] %v8622_v10  ;;  %10766 = vst [vmem:[#allocation67_spill] sm:$0xff] %v8624_v17  ;;  %v10772_v10 = vld [vmem:[#allocation105_spill] sm:$0xff] }
 0x45a   : > { %3488 = vrot.lane.b32.xlu1 %v7867_v54, %s10725_s17  ;;  %3490 = vrot.lane.b32.xlu0 %v7871_v9, %s10725_s17 }
 0x45c   : > { %v8630_v13 = vpop.permute.xlu1 %3193  ;;  %v8632_v2 = vpop.permute.xlu0 %3195 }
 0x45d   : > { %10767 = vst [vmem:[#allocation144_spill] sm:$0xff] %v8630_v13  ;;  %10768 = vst [vmem:[#allocation175_spill] sm:$0xff] %v8632_v2 }
 0x45e   : > { %3578 = vrot.lane.b32.xlu1 %v10769_v59, %s10728_s18  ;;  %3295 = vrot.lane.b32.xlu0 %v10769_v59, %s5425_s29  ;;  %v10771_v59 = vld [vmem:[#allocation74_spill] sm:$0xff] }
 0x45f   : > { %v3798_v17 = vsel %vm1946_vm6, %v10771_v59, %v3170_v40 }
 0x460   : > { %v3272_v19 = vpop.permute.xlu1 %3271  ;;  %v3274_v14 = vpop.permute.xlu0 %3273 }
 0x461   : > { %v3830_v55 = vsel %vm1979_vm7, %v3798_v17, %v3272_v19  ;;  %v10774_v17 = vld [vmem:[#allocation155_spill] sm:$0xff] }
 0x462   : > { %3580 = vrot.lane.b32.xlu1 %v10770_v27, %s10728_s18  ;;  %3668 = vrot.lane.b32.xlu0 %v8235_v23, %s10731_s28 }
 0x464   : > { %v3373_v54 = vpop.permute.xlu1 %3372  ;;  %v3375_v9 = vpop.permute.xlu0 %3374 }
 0x466   : > { %3297 = vrot.lane.b32.xlu1 %v10770_v27, %s5425_s29  ;;  %3396 = vrot.lane.b32.xlu0 %v8235_v23, %s10722_s13  ;;  %v3862_v27 = vsel %vm2012_vm8, %v3830_v55, %v3373_v54  ;;  %v3799_v54 = vsel %vm1946_vm6, %v10771_v59, %v3172_v48  ;;  %v10775_v59 = vld [vmem:[#allocation136_spill] sm:$0xff] }
 0x468   : > { %v3469_v2 = vpop.permute.xlu1 %3468  ;;  %v3471_v13 = vpop.permute.xlu0 %3470 }
 0x469   : > { %v3894_v23 = vsel %vm2045_vm9, %v3862_v27, %v3469_v2  ;;  %v3831_v2 = vsel %vm1979_vm7, %v3799_v54, %v3274_v14 }
 0x46a   : > { %3670 = vrot.lane.b32.xlu1 %v8232_v52, %s10731_s28  ;;  %3398 = vrot.lane.b32.xlu0 %v8232_v52, %s10722_s13 }
 0x46c   : > { %v3559_v36 = vpop.permute.xlu1 %3558  ;;  %v3276_v46 = vpop.permute.xlu0 %3275 }
 0x46d   : > { %v3926_v25 = vsel %vm2078_vm10, %v3894_v23, %v3559_v36  ;;  %v3863_v36 = vsel %vm2012_vm8, %v3831_v2, %v3375_v9 }
 0x46e   : > { %3492 = vrot.lane.b32.xlu1 %v10772_v10, %s10725_s17  ;;  %3197 = vrot.lane.b32.xlu0 %v10772_v10, %s5424_s0 }
 0x470   : > { %v3561_v52 = vpop.permute.xlu1 %3560  ;;  %v3649_v6 = vpop.permute.xlu0 %3648 }
 0x471   : > { %v3958_v40 = vsel %vm2111_vm11, %v3926_v25, %v3649_v6  ;;  %v3895_v6 = vsel %vm2045_vm9, %v3863_v36, %v3471_v13  ;;  %v3738_v13 = vsel %vm1882_vm4, %v7673_v38, %v8333_v18 }
 0x472   : > { %3494 = vrot.lane.b32.xlu1 %v10773_v34, %s10725_s17  ;;  %3582 = vrot.lane.b32.xlu0 %v10774_v17, %s10728_s18  ;;  %v3927_v25 = vsel %vm2078_vm10, %v3895_v6, %v3561_v52  ;;  %v3768_v52 = vsel %vm1914_vm5, %v3738_v13, %v8466_v53  ;;  %v10777_v13 = vld [vmem:[#allocation160_spill] sm:$0xff] }
 0x473   : > { %5106 = vmatprep.mubr.msk.f32.mxu1 %vm2144_vm12, %v3958_v40  ;;  %v3800_v40 = vsel %vm1946_vm6, %v3768_v52, %v8590_v31 }
 0x474   : > { %v3278_v55 = vpop.permute.xlu1 %3277  ;;  %v3377_v19 = vpop.permute.xlu0 %3376  ;;  %v3832_v2 = vsel %vm1979_vm7, %v3800_v40, %v3276_v46  ;;  %v3739_v46 = vsel %vm1882_vm4, %v7669_v21, %v8335_v57  ;;  %v10776_v57 = vld [vmem:[#allocation87_spill] sm:$0xff] }
 0x475   : > { %v3864_v36 = vsel %vm2012_vm8, %v3832_v2, %v3377_v19 }
 0x476   : > { %3199 = vrot.lane.b32.xlu1 %v10773_v34, %s5424_s0  ;;  %3299 = vrot.lane.b32.xlu0 %v10774_v17, %s5425_s29 }
 0x478   : > { %v3651_v27 = vpop.permute.xlu1 %3650  ;;  %v3379_v23 = vpop.permute.xlu0 %3378 }
 0x479   : > { %v3959_v48 = vsel %vm2111_vm11, %v3927_v25, %v3651_v27 }
 0x47a   : > { %3584 = vrot.lane.b32.xlu1 %v10775_v59, %s10728_s18  ;;  %3672 = vrot.lane.b32.xlu0 %v8246_v20, %s10731_s28 }
 0x47b   : > { %5107 = vmatmul.mubr.msk.f32.vlgmr.msra.gmra.mrb[0].mxu1 %vm2144_vm12, %v3959_v48 }
 0x47c   : > { %v3473_v14 = vpop.permute.xlu1 %3472  ;;  %v3475_v9 = vpop.permute.xlu0 %3474 }
 0x47d   : > { %v3896_v38 = vsel %vm2045_vm9, %v3864_v36, %v3473_v14 }
 0x47e   : > { %3301 = vrot.lane.b32.xlu1 %v10775_v59, %s5425_s29  ;;  %3400 = vrot.lane.b32.xlu0 %v8246_v20, %s10722_s13 }
 0x480   : > { %v3563_v17 = vpop.permute.xlu1 %3562  ;;  %v3280_v54 = vpop.permute.xlu0 %3279 }
 0x481   : > { %v3928_v20 = vsel %vm2078_vm10, %v3896_v38, %v3563_v17 }
 0x482   : > { %3674 = vrot.lane.b32.xlu1 %v8243_v60, %s10731_s28  ;;  %3402 = vrot.lane.b32.xlu0 %v8243_v60, %s10722_s13  ;;  %v3769_v60 = vsel %vm1914_vm5, %v3739_v46, %v8468_v11 }
 0x483   : > { %v3801_v19 = vsel %vm1946_vm6, %v3769_v60, %v8592_v5 }
 0x484   : > { %v3565_v18 = vpop.permute.xlu1 %3564  ;;  %v3653_v53 = vpop.permute.xlu0 %3652  ;;  %v3833_v27 = vsel %vm1979_vm7, %v3801_v19, %v3278_v55 }
 0x485   : > { %v3960_v31 = vsel %vm2111_vm11, %v3928_v20, %v3653_v53  ;;  %v3865_v21 = vsel %vm2012_vm8, %v3833_v27, %v3379_v23 }
 0x486   : > { %3496 = vrot.lane.b32.xlu1 %v7934_v43, %s10725_s17  ;;  %3201 = vrot.lane.b32.xlu0 %v7934_v43, %s5424_s0  ;;  %v3897_v48 = vsel %vm2045_vm9, %v3865_v21, %v3475_v9  ;;  %v3740_v9 = vsel %vm1882_vm4, %v7700_v45, %v8347_v30 }
 0x487   : > { %5109 = vmatprep.mubr.msk.f32.mxu1 %vm2144_vm12, %v3960_v31  ;;  %v3929_v11 = vsel %vm2078_vm10, %v3897_v48, %v3565_v18  ;;  %v3770_v52 = vsel %vm1914_vm5, %v3740_v9, %v8474_v16 }
 0x488   : > { %v3282_v6 = vpop.permute.xlu1 %3281  ;;  %v3381_v25 = vpop.permute.xlu0 %3380  ;;  %v3802_v40 = vsel %vm1946_vm6, %v3770_v52, %v8598_v1 }
 0x489   : > { %v3834_v36 = vsel %vm1979_vm7, %v3802_v40, %v3280_v54  ;;  %v3741_v54 = vsel %vm1882_vm4, %v7706_v22, %v8349_v42  ;;  %v10778_v42 = vld [vmem:[#allocation107_spill] sm:$0xff] }
 0x48a   : > { %3498 = vrot.lane.b32.xlu1 %v7937_v50, %s10725_s17  ;;  %3586 = vrot.lane.b32.xlu0 %v10776_v57, %s10728_s18  ;;  %v3866_v38 = vsel %vm2012_vm8, %v3834_v36, %v3381_v25  ;;  %v10779_v25 = vld [vmem:[#allocation29_spill] sm:$0xff] }
 0x48c   : > { %v3655_v59 = vpop.permute.xlu1 %3654  ;;  %v3383_v14 = vpop.permute.xlu0 %3382 }
 0x48d   : > { %v3961_v5 = vsel %vm2111_vm11, %v3929_v11, %v3655_v59 }
 0x48e   : > { %3203 = vrot.lane.b32.xlu1 %v7937_v50, %s5424_s0  ;;  %3303 = vrot.lane.b32.xlu0 %v10776_v57, %s5425_s29  ;;  %v3742_v57 = vsel %vm1882_vm4, %v7737_v41, %v8355_v37  ;;  %v10781_v41 = vld [vmem:[#allocation108_spill] sm:$0xff] }
 0x48f   : > { %5110 = vmatmul.mubr.msk.f32.gmra.mrb[2].mxu1 %vm2144_vm12, %v3961_v5  ;;  %v3772_v48 = vsel %vm1914_vm5, %v3742_v57, %v8482_v24 }
 0x490   : > { %v3477_v55 = vpop.permute.xlu1 %3476  ;;  %v3479_v23 = vpop.permute.xlu0 %3478  ;;  %v3804_v11 = vsel %vm1946_vm6, %v3772_v48, %v8606_v58  ;;  %v10784_v48 = vld [vmem:[#allocation190_spill] sm:$0xff] }
 0x491   : > { %v3898_v45 = vsel %vm2045_vm9, %v3866_v38, %v3477_v55 }
 0x492   : > { %3588 = vrot.lane.b32.xlu1 %v10777_v13, %s10728_s18  ;;  %3676 = vrot.lane.b32.xlu0 %v8261_v4, %s10731_s28 }
 0x494   : > { %v3567_v17 = vpop.permute.xlu1 %3566  ;;  %v3284_v2 = vpop.permute.xlu0 %3283 }
 0x495   : > { %v3930_v30 = vsel %vm2078_vm10, %v3898_v45, %v3567_v17  ;;  %v3836_v5 = vsel %vm1979_vm7, %v3804_v11, %v3284_v2 }
 0x496   : > { %3305 = vrot.lane.b32.xlu1 %v10777_v13, %s5425_s29  ;;  %3404 = vrot.lane.b32.xlu0 %v8261_v4, %s10722_s13  ;;  %v3771_v4 = vsel %vm1914_vm5, %v3741_v54, %v8476_v47  ;;  %v3743_v13 = vsel %vm1882_vm4, %v7743_v56, %v8357_v61 }
 0x497   : > { %v3803_v18 = vsel %vm1946_vm6, %v3771_v4, %v8600_v12  ;;  %v3773_v52 = vsel %vm1914_vm5, %v3743_v13, %v8484_v62 }
 0x498   : > { %v3569_v16 = vpop.permute.xlu1 %3568  ;;  %v3657_v20 = vpop.permute.xlu0 %3656  ;;  %v3835_v46 = vsel %vm1979_vm7, %v3803_v18, %v3282_v6  ;;  %v10780_v6 = vld [vmem:[#allocation32_spill] sm:$0xff]  ;;  %v3805_v40 = vsel %vm1946_vm6, %v3773_v52, %v8608_v7 }
 0x499   : > { %v3962_v1 = vsel %vm2111_vm11, %v3930_v30, %v3657_v20  ;;  %v3867_v22 = vsel %vm2012_vm8, %v3835_v46, %v3383_v14  ;;  %v3745_v46 = vsel %vm1882_vm4, %v7777_v51, %v8365_v63 }
 0x49a   : > { %3678 = vrot.lane.b32.xlu1 %v8258_v0, %s10731_s28  ;;  %3406 = vrot.lane.b32.xlu0 %v8258_v0, %s10722_s13  ;;  %v3899_v0 = vsel %vm2045_vm9, %v3867_v22, %v3479_v23  ;;  %v10783_v22 = vld [vmem:[#allocation27_spill] sm:$0xff] }
 0x49b   : > { %5112 = vmatprep.mubr.msk.f32.mxu1 %vm2144_vm12, %v3962_v1  ;;  %v3931_v47 = vsel %vm2078_vm10, %v3899_v0, %v3569_v16  ;;  %v10782_v16 = vld [vmem:[#allocation161_spill] sm:$0xff]  ;;  %v3775_v0 = vsel %vm1914_vm5, %v3745_v46, %v8492_v49 }
 0x49c   : > { %v3286_v53 = vpop.permute.xlu1 %3285  ;;  %v3385_v31 = vpop.permute.xlu0 %3384 }
 0x49d   : > { %v3868_v55 = vsel %vm2012_vm8, %v3836_v5, %v3385_v31  ;;  %v3837_v36 = vsel %vm1979_vm7, %v3805_v40, %v3286_v53 }
 0x49e   : > { %3500 = vrot.lane.b32.xlu1 %v10778_v42, %s10725_s17  ;;  %3205 = vrot.lane.b32.xlu0 %v10778_v42, %s5424_s0 }
 0x4a0   : > { %v3659_v60 = vpop.permute.xlu1 %3658  ;;  %v3387_v19 = vpop.permute.xlu0 %3386 }
 0x4a1   : > { %v3963_v12 = vsel %vm2111_vm11, %v3931_v47, %v3659_v60  ;;  %v3869_v56 = vsel %vm2012_vm8, %v3837_v36, %v3387_v19  ;;  %v3807_v47 = vsel %vm1946_vm6, %v3775_v0, %v8616_v33  ;;  %v10791_v36 = vld [vmem:[#allocation116_spill] sm:$0xff] }
 0x4a2   : > { %3502 = vrot.lane.b32.xlu1 %v10779_v25, %s10725_s17  ;;  %3590 = vrot.lane.b32.xlu0 %v10780_v6, %s10728_s18  ;;  %v10799_v0 = vld [vmem:[#allocation180_spill] sm:$0xff] }
 0x4a3   : > { %5113 = vmatmul.mubr.msk.f32.gmra.mrb[4].mxu1 %vm2144_vm12, %v3963_v12 }
 0x4a4   : > { %v3481_v27 = vpop.permute.xlu1 %3480  ;;  %v3483_v21 = vpop.permute.xlu0 %3482 }
 0x4a5   : > { %v3900_v37 = vsel %vm2045_vm9, %v3868_v55, %v3481_v27  ;;  %v10788_v55 = vld [vmem:[#allocation123_spill] sm:$0xff] }
 0x4a6   : > { %3207 = vrot.lane.b32.xlu1 %v10779_v25, %s5424_s0  ;;  %3307 = vrot.lane.b32.xlu0 %v10780_v6, %s5425_s29 }
 0x4a8   : > { %v3571_v59 = vpop.permute.xlu1 %3570  ;;  %v3288_v14 = vpop.permute.xlu0 %3287 }
 0x4a9   : > { %v3932_v23 = vsel %vm2078_vm10, %v3900_v37, %v3571_v59  ;;  %v10786_v59 = vld [vmem:[#allocation184_spill] sm:$0xff] }
 0x4aa   : > { %3592 = vrot.lane.b32.xlu1 %v10781_v41, %s10728_s18  ;;  %3680 = vrot.lane.b32.xlu0 %v8272_v3, %s10731_s28 }
 0x4ac   : > { %v3573_v24 = vpop.permute.xlu1 %3572  ;;  %v3661_v9 = vpop.permute.xlu0 %3660 }
 0x4ad   : > { %v3964_v58 = vsel %vm2111_vm11, %v3932_v23, %v3661_v9  ;;  %v10789_v9 = vld [vmem:[#allocation6_spill] sm:$0xff] }
 0x4ae   : > { %3309 = vrot.lane.b32.xlu1 %v10781_v41, %s5425_s29  ;;  %3408 = vrot.lane.b32.xlu0 %v8272_v3, %s10722_s13  ;;  %v3901_v3 = vsel %vm2045_vm9, %v3869_v56, %v3483_v21  ;;  %v10792_v56 = vld [vmem:[#allocation132_spill] sm:$0xff] }
 0x4af   : > { %5115 = vmatprep.mubr.msk.f32.mxu1 %vm2144_vm12, %v3964_v58  ;;  %v3933_v61 = vsel %vm2078_vm10, %v3901_v3, %v3573_v24  ;;  %v10790_v58 = vld [vmem:[#allocation109_spill] sm:$0xff]  ;;  %v3747_v3 = vsel %vm1882_vm4, %v10792_v56, %v10791_v36  ;;  %v10810_v36 = vld [vmem:[#allocation168_spill] sm:$0xff] }
 0x4b0   : > { %v3290_v17 = vpop.permute.xlu1 %3289  ;;  %v3389_v2 = vpop.permute.xlu0 %3388 }
 0x4b1   : > { %v3839_v12 = vsel %vm1979_vm7, %v3807_v47, %v3290_v17 }
 0x4b2   : > { %3682 = vrot.lane.b32.xlu1 %v8269_v29, %s10731_s28  ;;  %3410 = vrot.lane.b32.xlu0 %v8269_v29, %s10722_s13  ;;  %v3744_v29 = vsel %vm1882_vm4, %v7771_v44, %v8363_v35 }
 0x4b3   : > { %v3774_v20 = vsel %vm1914_vm5, %v3744_v29, %v8490_v32 }
 0x4b4   : > { %v3663_v62 = vpop.permute.xlu1 %3662  ;;  %v3391_v38 = vpop.permute.xlu0 %3390  ;;  %v3806_v1 = vsel %vm1946_vm6, %v3774_v20, %v8614_v26  ;;  %v10795_v20 = vld [vmem:[#allocation86_spill] sm:$0xff] }
 0x4b5   : > { %v3965_v7 = vsel %vm2111_vm11, %v3933_v61, %v3663_v62  ;;  %v3838_v18 = vsel %vm1979_vm7, %v3806_v1, %v3288_v14  ;;  %v3871_v51 = vsel %vm2012_vm8, %v3839_v12, %v3391_v38  ;;  %v10787_v14 = vld [vmem:[#allocation50_spill] sm:$0xff]  ;;  %v10793_v61 = vld [vmem:[#allocation173_spill] sm:$0xff]  ;;  %v10794_v38 = vld [vmem:[#allocation67_spill] sm:$0xff] }
 0x4b6   : > { %3504 = vrot.lane.b32.xlu1 %v8002_v8, %s10725_s17  ;;  %3209 = vrot.lane.b32.xlu0 %v8002_v8, %s5424_s0  ;;  %v3870_v53 = vsel %vm2012_vm8, %v3838_v18, %v3389_v2  ;;  %v3777_v62 = vsel %vm1914_vm5, %v3747_v3, %v10793_v61  ;;  %v10796_v1 = vld [vmem:[#allocation37_spill] sm:$0xff] }
 0x4b7   : > { %5116 = vmatmul.mubr.msk.f32.gmra.mrb[6].mxu1 %vm2144_vm12, %v3965_v7  ;;  %v3809_v7 = vsel %vm1946_vm6, %v3777_v62, %v10794_v38 }
 0x4b8   : > { %v3485_v45 = vpop.permute.xlu1 %3484  ;;  %v3487_v30 = vpop.permute.xlu0 %3486 }
 0x4b9   : > { %v3902_v44 = vsel %vm2045_vm9, %v3870_v53, %v3485_v45  ;;  %v3903_v63 = vsel %vm2045_vm9, %v3871_v51, %v3487_v30  ;;  %v10802_v51 = vld [vmem:[#allocation144_spill] sm:$0xff] }
 0x4ba   : > { %3506 = vrot.lane.b32.xlu1 %v8005_v28, %s10725_s17  ;;  %3594 = vrot.lane.b32.xlu0 %v10782_v16, %s10728_s18 }
 0x4bc   : > { %v3575_v54 = vpop.permute.xlu1 %3574  ;;  %v3292_v4 = vpop.permute.xlu0 %3291 }
 0x4bd   : > { %v3934_v35 = vsel %vm2078_vm10, %v3902_v44, %v3575_v54 }
 0x4be   : > { %3211 = vrot.lane.b32.xlu1 %v8005_v28, %s5424_s0  ;;  %3311 = vrot.lane.b32.xlu0 %v10782_v16, %s5425_s29 }
 0x4c0   : > { %v3577_v32 = vpop.permute.xlu1 %3576  ;;  %v3665_v31 = vpop.permute.xlu0 %3664 }
 0x4c1   : > { %v3966_v26 = vsel %vm2111_vm11, %v3934_v35, %v3665_v31  ;;  %v3935_v49 = vsel %vm2078_vm10, %v3903_v63, %v3577_v32  ;;  %v10797_v31 = vld [vmem:[#allocation36_spill] sm:$0xff] }
 0x4c2   : > { %3596 = vrot.lane.b32.xlu1 %v10783_v22, %s10728_s18  ;;  %3684 = vrot.lane.b32.xlu0 %v8287_v15, %s10731_s28 }
 0x4c3   : > { %5118 = vmatprep.mubr.msk.f32.mxu1 %vm2144_vm12, %v3966_v26 }
 0x4c4   : > { %v3294_v60 = vpop.permute.xlu1 %3293  ;;  %v3393_v19 = vpop.permute.xlu0 %3392 }
 0x4c5   : > { %v3841_v29 = vsel %vm1979_vm7, %v3809_v7, %v3294_v60  ;;  %v10800_v60 = vld [vmem:[#allocation34_spill] sm:$0xff] }
 0x4c6   : > { %3313 = vrot.lane.b32.xlu1 %v10783_v22, %s5425_s29  ;;  %3412 = vrot.lane.b32.xlu0 %v8287_v15, %s10722_s13  ;;  %v10785_v15 = vld [vmem:[#allocation24_spill] sm:$0xff]  ;;  %v10798_v22 = vld [vmem:[#allocation206_spill] sm:$0xff] }
 0x4c7   : > { %v3746_v11 = vsel %vm1882_vm4, %v10785_v15, %v10784_v48  ;;  %v3748_v47 = vsel %vm1882_vm4, %v10799_v0, %v10798_v22  ;;  %v10816_v22 = vld [vmem:[#allocation112_spill] sm:$0xff]  ;;  %v10817_v0 = vld [vmem:[#allocation31_spill] sm:$0xff] }
 0x4c8   : > { %v3667_v6 = vpop.permute.xlu1 %3666  ;;  %v3395_v27 = vpop.permute.xlu0 %3394  ;;  %v3776_v5 = vsel %vm1914_vm5, %v3746_v11, %v10787_v14 }
 0x4c9   : > { %v3967_v33 = vsel %vm2111_vm11, %v3935_v49, %v3667_v6  ;;  %v3873_v16 = vsel %vm2012_vm8, %v3841_v29, %v3395_v27 }
 0x4ca   : > { %3686 = vrot.lane.b32.xlu1 %v8284_v39, %s10731_s28  ;;  %3414 = vrot.lane.b32.xlu0 %v8284_v39, %s10722_s13  ;;  %v3808_v39 = vsel %vm1946_vm6, %v3776_v5, %v10788_v55  ;;  %v10805_v55 = vld [vmem:[#allocation39_spill] sm:$0xff] }
 0x4cb   : > { %5119 = vmatmul.mubr.msk.f32.gmra.mrb[8].mxu1 %vm2144_vm12, %v3967_v33  ;;  %v3840_v23 = vsel %vm1979_vm7, %v3808_v39, %v3292_v4  ;;  %v10806_v39 = vld [vmem:[#allocation84_spill] sm:$0xff] }
 0x4cc   : > { %v3489_v21 = vpop.permute.xlu1 %3488  ;;  %v3491_v57 = vpop.permute.xlu0 %3490  ;;  %v3872_v24 = vsel %vm2012_vm8, %v3840_v23, %v3393_v19  ;;  %v10801_v19 = vld [vmem:[#allocation194_spill] sm:$0xff] }
 0x4cd   : > { %v3904_v13 = vsel %vm2045_vm9, %v3872_v24, %v3489_v21  ;;  %v3905_v54 = vsel %vm2045_vm9, %v3873_v16, %v3491_v57  ;;  %v3778_v12 = vsel %vm1914_vm5, %v3748_v47, %v10801_v19  ;;  %v10803_v21 = vld [vmem:[#allocation141_spill] sm:$0xff]  ;;  %v10804_v57 = vld [vmem:[#allocation163_spill] sm:$0xff] }
 0x4ce   : > { %3508 = vrot.lane.b32.xlu1 %v10786_v59, %s10725_s17  ;;  %3213 = vrot.lane.b32.xlu0 %v10786_v59, %s5424_s0  ;;  %v3810_v63 = vsel %vm1946_vm6, %v3778_v12, %v10802_v51  ;;  %v10808_v24 = vld [vmem:[#allocation175_spill] sm:$0xff] }
 0x4d0   : > { %v3579_v41 = vpop.permute.xlu1 %3578  ;;  %v3296_v37 = vpop.permute.xlu0 %3295 }
 0x4d1   : > { %v3936_v52 = vsel %vm2078_vm10, %v3904_v13, %v3579_v41  ;;  %v3842_v27 = vsel %vm1979_vm7, %v3810_v63, %v3296_v37  ;;  %v3749_v41 = vsel %vm1882_vm4, %v10806_v39, %v10805_v55  ;;  %v10807_v37 = vld [vmem:[#allocation120_spill] sm:$0xff]  ;;  %v10818_v63 = vld [vmem:[#allocation170_spill] sm:$0xff] }
 0x4d2   : > { %3510 = vrot.lane.b32.xlu1 %v10789_v9, %s10725_s17  ;;  %3598 = vrot.lane.b32.xlu0 %v10790_v58, %s10728_s18  ;;  %v3779_v23 = vsel %vm1914_vm5, %v3749_v41, %v10807_v37  ;;  %v10822_v55 = vld [vmem:[#allocation186_spill] sm:$0xff] }
 0x4d3   : > { %v2500_v39 = vmax.f32 %v10822_v55, 0.0 }
 0x4d4   : > { %v3581_v40 = vpop.permute.xlu1 %3580  ;;  %v3669_v17 = vpop.permute.xlu0 %3668 }
 0x4d5   : > { %v3968_v2 = vsel %vm2111_vm11, %v3936_v52, %v3669_v17  ;;  %v3937_v4 = vsel %vm2078_vm10, %v3905_v54, %v3581_v40 }
 0x4d6   : > { %3215 = vrot.lane.b32.xlu1 %v10789_v9, %s5424_s0  ;;  %3315 = vrot.lane.b32.xlu0 %v10790_v58, %s5425_s29  ;;  %v3811_v58 = vsel %vm1946_vm6, %v3779_v23, %v10808_v24  ;;  %v10823_v23 = vld [vmem:[#allocation30_spill] sm:$0xff]  ;;  %v10824_v24 = vld [vmem:[#allocation115_spill] sm:$0xff] }
 0x4d7   : > { %5121 = vmatprep.mubr.msk.f32.mxu1 %vm2144_vm12, %v3968_v2  ;;  %v10809_v2 = vld [vmem:[#allocation28_spill] sm:$0xff] }
 0x4d8   : > { %v3298_v45 = vpop.permute.xlu1 %3297  ;;  %v3397_v30 = vpop.permute.xlu0 %3396 }
 0x4d9   : > { %v3874_v33 = vsel %vm2012_vm8, %v3842_v27, %v3397_v30  ;;  %v3843_v40 = vsel %vm1979_vm7, %v3811_v58, %v3298_v45  ;;  %v10811_v30 = vld [vmem:[#allocation167_spill] sm:$0xff] }
 0x4da   : > { %3600 = vrot.lane.b32.xlu1 %v10795_v20, %s10728_s18  ;;  %3688 = vrot.lane.b32.xlu0 %v10796_v1, %s10731_s28  ;;  %v10819_v27 = vld [vmem:[#allocation135_spill] sm:$0xff] }
 0x4dc   : > { %v3671_v18 = vpop.permute.xlu1 %3670  ;;  %v3399_v53 = vpop.permute.xlu0 %3398 }
 0x4dd   : > { %v3969_v44 = vsel %vm2111_vm11, %v3937_v4, %v3671_v18  ;;  %v3875_v17 = vsel %vm2012_vm8, %v3843_v40, %v3399_v53  ;;  %v10814_v4 = vld [vmem:[#allocation35_spill] sm:$0xff]  ;;  %v10815_v18 = vld [vmem:[#allocation58_spill] sm:$0xff] }
 0x4de   : > { %3317 = vrot.lane.b32.xlu1 %v10795_v20, %s5425_s29  ;;  %3416 = vrot.lane.b32.xlu0 %v10796_v1, %s10722_s13  ;;  %v10812_v20 = vld [vmem:[#allocation71_spill] sm:$0xff]  ;;  %v10813_v1 = vld [vmem:[#allocation102_spill] sm:$0xff] }
 0x4df   : > { %5122 = vmatmul.mubr.msk.f32.gmra.mrb[10].mxu1 %vm2144_vm12, %v3969_v44  ;;  %v3750_v54 = vsel %vm1882_vm4, %v10813_v1, %v10812_v20  ;;  %v10827_v1 = vld [vmem:[#allocation88_spill] sm:$0xff] }
 0x4e0   : > { %v3493_v35 = vpop.permute.xlu1 %3492  ;;  %v3198_v32 = vpop.permute.xlu0 %3197  ;;  %v3780_v53 = vsel %vm1914_vm5, %v3750_v54, %v10815_v18  ;;  %v10828_v18 = vld [vmem:[#allocation191_spill] sm:$0xff] }
 0x4e1   : > { %v3906_v48 = vsel %vm2045_vm9, %v3874_v33, %v3493_v35  ;;  %v3812_v44 = vsel %vm1946_vm6, %v3780_v53, %v3198_v32  ;;  %v10820_v33 = vld [vmem:[#allocation208_spill] sm:$0xff]  ;;  %v3752_v53 = vsel %vm1882_vm4, %v10772_v10, %v10828_v18 }
 0x4e2   : > { %3690 = vrot.lane.b32.xlu1 %v10797_v31, %s10731_s28  ;;  %3418 = vrot.lane.b32.xlu0 %v10797_v31, %s10722_s13 }
 0x4e4   : > { %v3495_v26 = vpop.permute.xlu1 %3494  ;;  %v3583_v46 = vpop.permute.xlu0 %3582 }
 0x4e5   : > { %v3938_v15 = vsel %vm2078_vm10, %v3906_v48, %v3583_v46  ;;  %v3907_v56 = vsel %vm2045_vm9, %v3875_v17, %v3495_v26  ;;  %v10821_v48 = vld [vmem:[#allocation164_spill] sm:$0xff] }
 0x4e6   : > { %3512 = vrot.lane.b32.xlu1 %v10800_v60, %s10725_s17  ;;  %3217 = vrot.lane.b32.xlu0 %v10800_v60, %s5424_s0 }
 0x4e8   : > { %v3200_v49 = vpop.permute.xlu1 %3199  ;;  %v3300_v6 = vpop.permute.xlu0 %3299 }
 0x4e9   : > { %v3844_v26 = vsel %vm1979_vm7, %v3812_v44, %v3300_v6  ;;  %v3751_v6 = vsel %vm1882_vm4, %v10819_v27, %v10818_v63  ;;  %v10829_v44 = vld [vmem:[#allocation165_spill] sm:$0xff] }
 0x4ea   : > { %3514 = vrot.lane.b32.xlu1 %v10803_v21, %s10725_s17  ;;  %3602 = vrot.lane.b32.xlu0 %v10804_v57, %s10728_s18 }
 0x4ec   : > { %v3585_v11 = vpop.permute.xlu1 %3584  ;;  %v3673_v14 = vpop.permute.xlu0 %3672 }
 0x4ed   : > { %v3970_v5 = vsel %vm2111_vm11, %v3938_v15, %v3673_v14  ;;  %v3939_v3 = vsel %vm2078_vm10, %v3907_v56, %v3585_v11  ;;  %v2501_v15 = vmax.f32 %v10821_v48, 0.0  ;;  %v10834_v48 = vld [vmem:[#allocation90_spill] sm:$0xff] }
 0x4ee   : > { %3219 = vrot.lane.b32.xlu1 %v10803_v21, %s5424_s0  ;;  %3319 = vrot.lane.b32.xlu0 %v10804_v57, %s5425_s29  ;;  %v3781_v57 = vsel %vm1914_vm5, %v3751_v6, %v10820_v33 }
 0x4ef   : > { %5124 = vmatprep.mubr.msk.f32.mxu1 %vm2144_vm12, %v3970_v5  ;;  %v3813_v11 = vsel %vm1946_vm6, %v3781_v57, %v3200_v49  ;;  %v10833_v57 = vld [vmem:[#allocation56_spill] sm:$0xff] }
 0x4f0   : > { %v3302_v13 = vpop.permute.xlu1 %3301  ;;  %v3401_v52 = vpop.permute.xlu0 %3400 }
 0x4f1   : > { %v3876_v46 = vsel %vm2012_vm8, %v3844_v26, %v3401_v52  ;;  %v3845_v41 = vsel %vm1979_vm7, %v3813_v11, %v3302_v13  ;;  %v5359_v52 = vld [vmem:[%s7620_s27] ss:$0 sm:$0xff]  ;;  %v10830_v26 = vld [vmem:[#allocation51_spill] sm:$0xff]  ;;  %s4486_s27 = sld [smem:[#allocation3 + %s5402_s19]] }
 0x4f2   : > { %3604 = vrot.lane.b32.xlu1 %v10809_v2, %s10728_s18  ;;  %3692 = vrot.lane.b32.xlu0 %v10810_v36, %s10731_s28  ;;  %v2539_v40 = vmul.f32 %v5359_v52, %v2501_v15  ;;  %v5360_v13 = vld [vmem:[%s7626_s12] ss:$0 sm:$0xff]  ;;  %s549_s12 = scalar_lea.vmem %s9824_s8, %s5555_s15  ;;  %s10846_s15 = sshll.u32 %s5561_s26, 3 }
 0x4f4   : > { %v3675_v61 = vpop.permute.xlu1 %3674  ;;  %v3403_v62 = vpop.permute.xlu0 %3402 }
 0x4f5   : > { %v3971_v38 = vsel %vm2111_vm11, %v3939_v3, %v3675_v61  ;;  %v3877_v37 = vsel %vm2012_vm8, %v3845_v41, %v3403_v62  ;;  %v2577_v3 = vadd.f32 %v5360_v13, %v2539_v40 }
 0x4f6   : > { %3321 = vrot.lane.b32.xlu1 %v10809_v2, %s5425_s29  ;;  %3420 = vrot.lane.b32.xlu0 %v10810_v36, %s10722_s13  ;;  %v2538_v36 = vmul.f32 %v5359_v52, %v2500_v39 }
 0x4f7   : > { %5125 = vmatmul.mubr.msk.f32.gmra.mrb[12].mxu1 %vm2144_vm12, %v3971_v38 }
 0x4f8   : > { %v3497_v7 = vpop.permute.xlu1 %3496  ;;  %v8962_v45 = vpop.permute.xlu0 %3201  ;;  %v2576_v38 = vadd.f32 %v5360_v13, %v2538_v36 }
 0x4f9   : > { %v3908_v47 = vsel %vm2045_vm9, %v3876_v46, %v3497_v7  ;;  %v10825_v7 = vld [vmem:[#allocation189_spill] sm:$0xff]  ;;  %v3782_v46 = vsel %vm1914_vm5, %v3752_v53, %v10830_v26 }
 0x4fa   : > { %3694 = vrot.lane.b32.xlu1 %v10811_v30, %s10731_s28  ;;  %3422 = vrot.lane.b32.xlu0 %v10811_v30, %s10722_s13  ;;  %v10826_v30 = vld [vmem:[#allocation89_spill] sm:$0xff]  ;;  %v9028_v54 = vadd.f32 %v2576_v38, %v10827_v1  ;;  %v10839_v1 = vld [vmem:[#allocation195_spill] sm:$0xff] }
 0x4fc   : > { %v3499_v29 = vpop.permute.xlu1 %3498  ;;  %v3587_v16 = vpop.permute.xlu0 %3586 }
 0x4fd   : > { %v3940_v19 = vsel %vm2078_vm10, %v3908_v47, %v3587_v16  ;;  %v3909_v58 = vsel %vm2045_vm9, %v3877_v37, %v3499_v29  ;;  %v9025_v29 = vadd.f32 %v2577_v3, %v10826_v30  ;;  %v10835_v37 = vld [vmem:[#allocation187_spill] sm:$0xff] }
 0x4fe   : > { %3516 = vrot.lane.b32.xlu1 %v10814_v4, %s10725_s17  ;;  %3221 = vrot.lane.b32.xlu0 %v10814_v4, %s5424_s0 }
 0x4ff   : > { %5355 = vtanh.f32 %v9025_v29 }
 0x500   : > { %v8978_v35 = vpop.permute.xlu1 %3203  ;;  %v3304_v31 = vpop.permute.xlu0 %3303  ;;  %5357 = vtanh.f32 %v9028_v54 }
 0x502   : > { %3518 = vrot.lane.b32.xlu1 %v10816_v22, %s10725_s17  ;;  %3606 = vrot.lane.b32.xlu0 %v10817_v0, %s10728_s18 }
 0x504   : > { %v3589_v12 = vpop.permute.xlu1 %3588  ;;  %v3677_v51 = vpop.permute.xlu0 %3676 }
 0x505   : > { %v3972_v32 = vsel %vm2111_vm11, %v3940_v19, %v3677_v51  ;;  %v3941_v49 = vsel %vm2078_vm10, %v3909_v58, %v3589_v12  ;;  %v10831_v51 = vld [vmem:[#allocation166_spill] sm:$0xff] }
 0x506   : > { %3223 = vrot.lane.b32.xlu1 %v10816_v22, %s5424_s0  ;;  %3323 = vrot.lane.b32.xlu0 %v10817_v0, %s5425_s29  ;;  %v3814_v0 = vsel %vm1946_vm6, %v3782_v46, %v8962_v45 }
 0x507   : > { %5127 = vmatprep.mubr.msk.f32.mxu1 %vm2144_vm12, %v3972_v32  ;;  %v3846_v10 = vsel %vm1979_vm7, %v3814_v0, %v3304_v31  ;;  %v10832_v32 = vld [vmem:[#allocation188_spill] sm:$0xff]  ;;  %v3753_v31 = vsel %vm1882_vm4, %v10773_v34, %v10833_v57  ;;  %v10840_v57 = vld [vmem:[#allocation54_spill] sm:$0xff] }
 0x508   : > { %v3306_v14 = vpop.permute.xlu1 %3305  ;;  %v3405_v5 = vpop.permute.xlu0 %3404  ;;  %v3783_v15 = vsel %vm1914_vm5, %v3753_v31, %v10834_v48  ;;  %v3755_v31 = vsel %vm1882_vm4, %v7937_v50, %v10840_v57  ;;  %v10841_v48 = vld [vmem:[#allocation60_spill] sm:$0xff] }
 0x509   : > { %v3878_v12 = vsel %vm2012_vm8, %v3846_v10, %v3405_v5  ;;  %v3815_v11 = vsel %vm1946_vm6, %v3783_v15, %v8978_v35  ;;  %v5356_v41 = vpop.eup %5355  ;;  %v3785_v15 = vsel %vm1914_vm5, %v3755_v31, %v10841_v48 }
 0x50a   : > { %3608 = vrot.lane.b32.xlu1 %v10823_v23, %s10728_s18  ;;  %3696 = vrot.lane.b32.xlu0 %v10824_v24, %s10731_s28  ;;  %v3847_v39 = vsel %vm1979_vm7, %v3815_v11, %v3306_v14 }
 0x50c   : > { %v3679_v17 = vpop.permute.xlu1 %3678  ;;  %v3407_v2 = vpop.permute.xlu0 %3406 }
 0x50d   : > { %v3973_v56 = vsel %vm2111_vm11, %v3941_v49, %v3679_v17  ;;  %v3879_v34 = vsel %vm2012_vm8, %v3847_v39, %v3407_v2  ;;  %v2727_v17 = vrot.slane %v5356_v41, 7 }
 0x50e   : > { %3325 = vrot.lane.b32.xlu1 %v10823_v23, %s5425_s29  ;;  %3424 = vrot.lane.b32.xlu0 %v10824_v24, %s10722_s13  ;;  %v10836_v23 = vld [vmem:[#allocation169_spill] sm:$0xff]  ;;  %v5358_v24 = vpop.eup %5357 }
 0x50f   : > { %5128 = vmatmul.mubr.msk.f32.gmra.mrb[14].mxu1 %vm2144_vm12, %v3973_v56  ;;  %v2726_v14 = vrot.slane %v5358_v24, 7  ;;  %v10837_v56 = vld [vmem:[#allocation38_spill] sm:$0xff] }
 0x510   : > { %v3501_v61 = vpop.permute.xlu1 %3500  ;;  %v9018_v62 = vpop.permute.xlu0 %3205 }
 0x511   : > { %v3910_v63 = vsel %vm2045_vm9, %v3878_v12, %v3501_v61  ;;  %v2791_v13 = vsel %vm802_vm0, 0.0, %v2726_v14  ;;  %v2728_v3 = vsel %vm802_vm0, %v2726_v14, %v2727_v17 }
 0x512   : > { %3698 = vrot.lane.b32.xlu1 %v10825_v7, %s10731_s28  ;;  %3426 = vrot.lane.b32.xlu0 %v10825_v7, %s10722_s13  ;;  %v3266_v7 = vrot.slane %v2791_v13, 1  ;;  %v3267_v30 = vrot.slane %v2728_v3, 1 }
 0x514   : > { %v3503_v16 = vpop.permute.xlu1 %3502  ;;  %v3591_v20 = vpop.permute.xlu0 %3590  ;;  %v3268_v10 = vsel %vm961_vm1, %v3266_v7, %v3267_v30 }
 0x515   : > { %v3942_v27 = vsel %vm2078_vm10, %v3910_v63, %v3591_v20  ;;  %v3911_v58 = vsel %vm2045_vm9, %v3879_v34, %v3503_v16  ;;  %v10838_v16 = vld [vmem:[#allocation117_spill] sm:$0xff] }
 0x516   : > { %3520 = vrot.lane.b32.xlu1 %v10829_v44, %s10725_s17  ;;  %3225 = vrot.lane.b32.xlu0 %v10829_v44, %s5424_s0  ;;  %v3754_v20 = vsel %vm1882_vm4, %v7934_v43, %v10838_v16  ;;  %v2807_v43 = vsel %vm802_vm0, %v2727_v17, 0.0 }
 0x517   : > { %v3784_v18 = vsel %vm1914_vm5, %v3754_v20, %v10839_v1 }
 0x518   : > { %v9042_v47 = vpop.permute.xlu1 %3207  ;;  %v3308_v19 = vpop.permute.xlu0 %3307  ;;  %v3816_v53 = vsel %vm1946_vm6, %v3784_v18, %v9018_v62 }
 0x519   : > { %v3848_v0 = vsel %vm1979_vm7, %v3816_v53, %v3308_v19  ;;  %v3817_v11 = vsel %vm1946_vm6, %v3785_v15, %v9042_v47  ;;  %v10844_v53 = vld [vmem:[#allocation171_spill] sm:$0xff] }
 0x51a   : > { %3522 = vrot.lane.b32.xlu1 %v10831_v51, %s10725_s17  ;;  %3610 = vrot.lane.b32.xlu0 %v10832_v32, %s10728_s18 }
 0x51c   : > { %v3593_v45 = vpop.permute.xlu1 %3592  ;;  %v3681_v6 = vpop.permute.xlu0 %3680 }
 0x51d   : > { %v3974_v33 = vsel %vm2111_vm11, %v3942_v27, %v3681_v6  ;;  %v3943_v52 = vsel %vm2078_vm10, %v3911_v58, %v3593_v45  ;;  %v3367_v45 = vrot.slane %v2791_v13, 2  ;;  %v3368_v6 = vrot.slane %v2728_v3, 2 }
 0x51e   : > { %3227 = vrot.lane.b32.xlu1 %v10831_v51, %s5424_s0  ;;  %3327 = vrot.lane.b32.xlu0 %v10832_v32, %s5425_s29 }
 0x51f   : > { %5130 = vmatprep.mubr.msk.f32.mxu1 %vm2144_vm12, %v3974_v33  ;;  %v3269_v33 = vrot.slane %v2807_v43, 1  ;;  %v3369_v50 = vsel %vm1132_vm2, %v3367_v45, %v3368_v6 }
 0x520   : > { %v3310_v5 = vpop.permute.xlu1 %3309  ;;  %v3409_v55 = vpop.permute.xlu0 %3408 }
 0x521   : > { %v3880_v12 = vsel %vm2012_vm8, %v3848_v0, %v3409_v55  ;;  %v3849_v41 = vsel %vm1979_vm7, %v3817_v11, %v3310_v5  ;;  %v3270_v34 = vsel %vm961_vm1, %v3267_v30, %v3269_v33  ;;  %v9159_v0 = vld [vmem:[%s549_s12] ss:$0 sm:$0xff] }
 0x522   : > { %3612 = vrot.lane.b32.xlu1 %v10835_v37, %s10728_s18  ;;  %3700 = vrot.lane.b32.xlu0 %v10836_v23, %s10731_s28 }
 0x524   : > { %v3683_v40 = vpop.permute.xlu1 %3682  ;;  %v3411_v35 = vpop.permute.xlu0 %3410 }
 0x525   : > { %v3975_v49 = vsel %vm2111_vm11, %v3943_v52, %v3683_v40  ;;  %v3370_v40 = vrot.slane %v2807_v43, 2 }
 0x526   : > { %3329 = vrot.lane.b32.xlu1 %v10835_v37, %s5425_s29  ;;  %3428 = vrot.lane.b32.xlu0 %v10836_v23, %s10722_s13  ;;  %v3881_v37 = vsel %vm2012_vm8, %v3849_v41, %v3411_v35 }
 0x527   : > { %5131 = vmatmul.mubr.msk.f32.gmra.mrb[16].mxu1 %vm2144_vm12, %v3975_v49  ;;  %v3371_v49 = vsel %vm1132_vm2, %v3368_v6, %v3370_v40 }
 0x528   : > { %v3505_v2 = vpop.permute.xlu1 %3504  ;;  %v9080_v36 = vpop.permute.xlu0 %3209 }
 0x529   : > { %v3912_v32 = vsel %vm2045_vm9, %v3880_v12, %v3505_v2  ;;  %v10842_v2 = vld [vmem:[#allocation40_spill] sm:$0xff]  ;;  %v10845_v12 = vld [vmem:[#allocation62_spill] sm:$0xff] }
 0x52a   : > { %3702 = vrot.lane.b32.xlu1 %v10837_v56, %s10731_s28  ;;  %3430 = vrot.lane.b32.xlu0 %v10837_v56, %s10722_s13  ;;  %v3756_v56 = vsel %vm1882_vm4, %v10778_v42, %v10842_v2  ;;  %v10850_v2 = vld [vmem:[#allocation142_spill] sm:$0xff] }
 0x52c   : > { %v3507_v61 = vpop.permute.xlu1 %3506  ;;  %v3595_v38 = vpop.permute.xlu0 %3594 }
 0x52d   : > { %v3944_v63 = vsel %vm2078_vm10, %v3912_v32, %v3595_v38  ;;  %v3913_v23 = vsel %vm2045_vm9, %v3881_v37, %v3507_v61 }
 0x52e   : > { %3524 = vrot.lane.b32.xlu1 %v2791_v13, %s10725_s17  ;;  %3229 = vrot.lane.b32.xlu0 %v2791_v13, %s5424_s0  ;;  %v10843_v13 = vld [vmem:[#allocation121_spill] sm:$0xff] }
 0x530   : > { %v9097_v26 = vpop.permute.xlu1 %3211  ;;  %v3312_v46 = vpop.permute.xlu0 %3311 }
 0x532   : > { %3526 = vrot.lane.b32.xlu1 %v2728_v3, %s10725_s17  ;;  %3614 = vrot.lane.b32.xlu0 %v3268_v10, %s10728_s18 }
 0x534   : > { %v3597_v62 = vpop.permute.xlu1 %3596  ;;  %v3685_v27 = vpop.permute.xlu0 %3684 }
 0x535   : > { %v3976_v19 = vsel %vm2111_vm11, %v3944_v63, %v3685_v27  ;;  %v3945_v24 = vsel %vm2078_vm10, %v3913_v23, %v3597_v62  ;;  %v9166_v27 = vld [vmem:[%s552_s14] ss:$0 sm:$0xff]  ;;  %v10848_v23 = vld [vmem:[#allocation79_spill] sm:$0xff] }
 0x536   : > { %3231 = vrot.lane.b32.xlu1 %v2728_v3, %s5424_s0  ;;  %3331 = vrot.lane.b32.xlu0 %v3268_v10, %s5425_s29  ;;  %v3786_v3 = vsel %vm1914_vm5, %v3756_v56, %v10843_v13 }
 0x537   : > { %5133 = vmatprep.mubr.msk.f32.mxu1 %vm2144_vm12, %v3976_v19  ;;  %v3818_v61 = vsel %vm1946_vm6, %v3786_v3, %v9080_v36 }
 0x538   : > { %v3314_v55 = vpop.permute.xlu1 %3313  ;;  %v3413_v39 = vpop.permute.xlu0 %3412  ;;  %v3850_v30 = vsel %vm1979_vm7, %v3818_v61, %v3312_v46  ;;  %v3757_v46 = vsel %vm1882_vm4, %v10779_v25, %v10844_v53 }
 0x539   : > { %v3882_v16 = vsel %vm2012_vm8, %v3850_v30, %v3413_v39  ;;  %v3787_v43 = vsel %vm1914_vm5, %v3757_v46, %v10845_v12  ;;  %v10851_v12 = vld [vmem:[#allocation118_spill] sm:$0xff] }
 0x53a   : > { %3616 = vrot.lane.b32.xlu1 %v3270_v34, %s10728_s18  ;;  %3704 = vrot.lane.b32.xlu0 %v3369_v50, %s10731_s28  ;;  %v3819_v62 = vsel %vm1946_vm6, %v3787_v43, %v9097_v26  ;;  %s9180_s18 = scalar_lea.vmem %s9826_s10, %s10846_s15  ;;  %v9182_v26 = vstv %s4486_s27 }
 0x53b   : > { %v3851_v25 = vsel %vm1979_vm7, %v3819_v62, %v3314_v55 }
 0x53c   : > { %v3687_v58 = vpop.permute.xlu1 %3686  ;;  %v3415_v47 = vpop.permute.xlu0 %3414 }
 0x53d   : > { %v3977_v52 = vsel %vm2111_vm11, %v3945_v24, %v3687_v58  ;;  %v3883_v57 = vsel %vm2012_vm8, %v3851_v25, %v3415_v47 }
 0x53e   : > { %3333 = vrot.lane.b32.xlu1 %v3270_v34, %s5425_s29  ;;  %3432 = vrot.lane.b32.xlu0 %v3369_v50, %s10722_s13  ;;  %v10847_v34 = vld [vmem:[#allocation78_spill] sm:$0xff] }
 0x53f   : > { %5134 = vmatmul.mubr.msk.f32.gmra.mrb[18].mxu1 %vm2144_vm12, %v3977_v52 }
 0x540   : > { %v3509_v5 = vpop.permute.xlu1 %3508  ;;  %v3214_v35 = vpop.permute.xlu0 %3213 }
 0x541   : > { %v3914_v20 = vsel %vm2045_vm9, %v3882_v16, %v3509_v5 }
 0x542   : > { %3706 = vrot.lane.b32.xlu1 %v3371_v49, %s10731_s28  ;;  %3434 = vrot.lane.b32.xlu0 %v3371_v49, %s10722_s13 }
 0x544   : > { %v3511_v14 = vpop.permute.xlu1 %3510  ;;  %v3599_v17 = vpop.permute.xlu0 %3598 }
 0x545   : > { %v3946_v42 = vsel %vm2078_vm10, %v3914_v20, %v3599_v17  ;;  %v3915_v48 = vsel %vm2045_vm9, %v3883_v57, %v3511_v14  ;;  %v10849_v14 = vld [vmem:[#allocation192_spill] sm:$0xff] }
 0x546   : > { %v3758_v17 = vsel %vm1882_vm4, %v8002_v8, %v10849_v14 }
 0x547   : > { %v3788_v56 = vsel %vm1914_vm5, %v3758_v17, %v10850_v2  ;;  %v10856_v17 = vld [vmem:[#allocation196_spill] sm:$0xff] }
 0x548   : > { %v9140_v38 = vpop.permute.xlu1 %3215  ;;  %v3316_v7 = vpop.permute.xlu0 %3315  ;;  %v3820_v13 = vsel %vm1946_vm6, %v3788_v56, %v3214_v35 }
 0x549   : > { %v3852_v30 = vsel %vm1979_vm7, %v3820_v13, %v3316_v7  ;;  %v3759_v7 = vsel %vm1882_vm4, %v8005_v28, %v10851_v12  ;;  %v10853_v28 = vld [vmem:[#allocation98_spill] sm:$0xff]  ;;  %v10857_v12 = vld [vmem:[#allocation131_spill] sm:$0xff] }
 0x54c   : > { %v3601_v1 = vpop.permute.xlu1 %3600  ;;  %v3689_v18 = vpop.permute.xlu0 %3688 }
 0x54d   : > { %v3978_v36 = vsel %vm2111_vm11, %v3946_v42, %v3689_v18  ;;  %v3947_v11 = vsel %vm2078_vm10, %v3915_v48, %v3601_v1 }
 0x54e   : > { %v5108_v10 = vpop.f32.mrb[0].mxu1  ;;  %5136 = vmatprep.mubr.msk.f32.mxu1 %vm2144_vm12, %v3978_v36 }
 0x54f   : > { %v4315_v32 = vmax.f32 %v5108_v10, 0.0  ;;  %v4155_v63 = vpop.f32.mrb[1].mxu1 }
 0x550   : > { %v4314_v45 = vmax.f32 %v4155_v63, 0.0  ;;  %v3318_v6 = vpop.permute.xlu1 %3317  ;;  %v3417_v19 = vpop.permute.xlu0 %3416 }
 0x551   : > { %v4353_v33 = vmul.f32 %v9159_v0, %v4315_v32  ;;  %v3884_v16 = vsel %vm2012_vm8, %v3852_v30, %v3417_v19  ;;  %v10852_v32 = vld [vmem:[#allocation174_spill] sm:$0xff] }
 0x552   : > { %v4352_v31 = vmul.f32 %v9159_v0, %v4314_v45  ;;  %v3789_v63 = vsel %vm1914_vm5, %v3759_v7, %v10852_v32 }
 0x553   : > { %v4391_v15 = vadd.f32 %v9166_v27, %v4353_v33  ;;  %v3821_v45 = vsel %vm1946_vm6, %v3789_v63, %v9140_v38  ;;  %v10859_v63 = vld [vmem:[#allocation152_spill] sm:$0xff] }
 0x554   : > { %v4390_v55 = vadd.f32 %v9166_v27, %v4352_v31  ;;  %v3691_v39 = vpop.permute.xlu1 %3690  ;;  %v3419_v41 = vpop.permute.xlu0 %3418  ;;  %v3853_v57 = vsel %vm1979_vm7, %v3821_v45, %v3318_v6  ;;  %v10860_v45 = vld [vmem:[#allocation122_spill] sm:$0xff] }
 0x555   : > { %v4423_v50 = vadd.f32 %v4391_v15, %v10847_v34  ;;  %v3979_v37 = vsel %vm2111_vm11, %v3947_v11, %v3691_v39  ;;  %v3885_v48 = vsel %vm2012_vm8, %v3853_v57, %v3419_v41  ;;  %v10854_v15 = vld [vmem:[#allocation80_spill] sm:$0xff] }
 0x556   : > { %v4422_v24 = vadd.f32 %v4390_v55, %v10848_v23  ;;  %5137 = vmatmul.mubr.msk.f32.gmra.mrb[20].mxu1 %vm2144_vm12, %v3979_v37 }
 0x557   : > { %4455 = vst.msk [vmem:[%s9180_s18 + $0x8] sm:$0xff] %vm1882_vm4, %v4423_v50  ;;  %v9192_v58 = vmul.f32 %v9182_v26, %v4423_v50 }
 0x558   : > { %4454 = vst.msk [vmem:[%s9180_s18] sm:$0xff] %vm1882_vm4, %v4422_v24  ;;  %v9197_v47 = vmul.f32 %v9182_v26, %v4422_v24  ;;  %v3513_v52 = vpop.permute.xlu1 %3512  ;;  %v3218_v40 = vpop.permute.xlu0 %3217 }
 0x559   : > { %v3916_v42 = vsel %vm2045_vm9, %v3884_v16, %v3513_v52  ;;  %4525 = vst.msk [vmem:[%s5572_s20 + $0x8] sm:$0xff] (!%p4958_p3), %vm1882_vm4, %v9192_v58 }
 0x55a   : > { %4524 = vst.msk [vmem:[%s5572_s20] sm:$0xff] (!%p4958_p3), %vm1882_vm4, %v9197_v47 }
 0x55c   : > { %v3515_v5 = vpop.permute.xlu1 %3514  ;;  %v3603_v49 = vpop.permute.xlu0 %3602 }
 0x55d   : > { %v3948_v36 = vsel %vm2078_vm10, %v3916_v42, %v3603_v49  ;;  %v3917_v55 = vsel %vm2045_vm9, %v3885_v48, %v3515_v5  ;;  %v10855_v5 = vld [vmem:[#allocation55_spill] sm:$0xff] }
 0x55e   : > { %v3760_v49 = vsel %vm1882_vm4, %v10786_v59, %v10855_v5 }
 0x55f   : > { %v3790_v2 = vsel %vm1914_vm5, %v3760_v49, %v10856_v17 }
 0x560   : > { %v9205_v3 = vpop.permute.xlu1 %3219  ;;  %v3320_v61 = vpop.permute.xlu0 %3319  ;;  %v3822_v30 = vsel %vm1946_vm6, %v3790_v2, %v3218_v40 }
 0x562   : > { %v5111_v20 = vpop.f32.mrb[2].mxu1 }
 0x563   : > { %v4317_v1 = vmax.f32 %v5111_v20, 0.0  ;;  %v4165_v18 = vpop.f32.mrb[3].mxu1 }
 0x564   : > { %v4316_v8 = vmax.f32 %v4165_v18, 0.0  ;;  %v3605_v53 = vpop.permute.xlu1 %3604  ;;  %v3693_v46 = vpop.permute.xlu0 %3692 }
 0x565   : > { %v4355_v10 = vmul.f32 %v9159_v0, %v4317_v1  ;;  %v3980_v35 = vsel %vm2111_vm11, %v3948_v36, %v3693_v46  ;;  %v3949_v6 = vsel %vm2078_vm10, %v3917_v55, %v3605_v53  ;;  %v3854_v1 = vsel %vm1979_vm7, %v3822_v30, %v3320_v61 }
 0x566   : > { %v4354_v43 = vmul.f32 %v9159_v0, %v4316_v8  ;;  %5139 = vmatprep.mubr.msk.f32.mxu1 %vm2144_vm12, %v3980_v35 }
 0x567   : > { %v4393_v62 = vadd.f32 %v9166_v27, %v4355_v10 }
 0x568   : > { %v4392_v19 = vadd.f32 %v9166_v27, %v4354_v43  ;;  %v3322_v25 = vpop.permute.xlu1 %3321  ;;  %v3421_v33 = vpop.permute.xlu0 %3420  ;;  %v10858_v43 = vld [vmem:[#allocation57_spill] sm:$0xff] }
 0x569   : > { %v4425_v31 = vadd.f32 %v4393_v62, %v10853_v28  ;;  %v3886_v36 = vsel %vm2012_vm8, %v3854_v1, %v3421_v33  ;;  %v3761_v32 = vsel %vm1882_vm4, %v10789_v9, %v10858_v43 }
 0x56a   : > { %v4424_v11 = vadd.f32 %v4392_v19, %v10854_v15  ;;  %v3791_v19 = vsel %vm1914_vm5, %v3761_v32, %v10860_v45  ;;  %v10865_v32 = vld [vmem:[#allocation172_spill] sm:$0xff] }
 0x56b   : > { %4457 = vst.msk [vmem:[%s9180_s18 + $0x18] sm:$0xff] %vm1882_vm4, %v4425_v31  ;;  %v9232_v39 = vmul.f32 %v9182_v26, %v4425_v31  ;;  %v3823_v57 = vsel %vm1946_vm6, %v3791_v19, %v9205_v3 }
 0x56c   : > { %4456 = vst.msk [vmem:[%s9180_s18 + $0x10] sm:$0xff] %vm1882_vm4, %v4424_v11  ;;  %v9237_v38 = vmul.f32 %v9182_v26, %v4424_v11  ;;  %v3695_v34 = vpop.permute.xlu1 %3694  ;;  %v3423_v50 = vpop.permute.xlu0 %3422  ;;  %v3855_v48 = vsel %vm1979_vm7, %v3823_v57, %v3322_v25 }
 0x56d   : > { %v3981_v41 = vsel %vm2111_vm11, %v3949_v6, %v3695_v34  ;;  %v3887_v15 = vsel %vm2012_vm8, %v3855_v48, %v3423_v50  ;;  %4527 = vst.msk [vmem:[%s5572_s20 + $0x18] sm:$0xff] (!%p4958_p3), %vm1882_vm4, %v9232_v39 }
 0x56e   : > { %5140 = vmatmul.mubr.msk.f32.gmra.mrb[22].mxu1 %vm2144_vm12, %v3981_v41  ;;  %4526 = vst.msk [vmem:[%s5572_s20 + $0x10] sm:$0xff] (!%p4958_p3), %vm1882_vm4, %v9237_v38 }
 0x570   : > { %v3517_v37 = vpop.permute.xlu1 %3516  ;;  %v3222_v23 = vpop.permute.xlu0 %3221 }
 0x571   : > { %v3918_v8 = vsel %vm2045_vm9, %v3886_v36, %v3517_v37 }
 0x574   : > { %v3519_v24 = vpop.permute.xlu1 %3518  ;;  %v3607_v52 = vpop.permute.xlu0 %3606 }
 0x575   : > { %v3950_v40 = vsel %vm2078_vm10, %v3918_v8, %v3607_v52  ;;  %v3919_v11 = vsel %vm2045_vm9, %v3887_v15, %v3519_v24  ;;  %v10861_v24 = vld [vmem:[#allocation42_spill] sm:$0xff] }
 0x576   : > { %v5114_v14 = vpop.f32.mrb[4].mxu1  ;;  %v3762_v2 = vsel %vm1882_vm4, %v10800_v60, %v10861_v24 }
 0x577   : > { %v4319_v56 = vmax.f32 %v5114_v14, 0.0  ;;  %v4175_v13 = vpop.f32.mrb[5].mxu1 }
 0x578   : > { %v4318_v16 = vmax.f32 %v4175_v13, 0.0  ;;  %v9248_v20 = vpop.permute.xlu1 %3223  ;;  %v3324_v42 = vpop.permute.xlu0 %3323  ;;  %v10862_v13 = vld [vmem:[#allocation65_spill] sm:$0xff] }
 0x579   : > { %v4357_v18 = vmul.f32 %v9159_v0, %v4319_v56  ;;  %v3792_v30 = vsel %vm1914_vm5, %v3762_v2, %v10862_v13  ;;  %v10867_v2 = vld [vmem:[#allocation81_spill] sm:$0xff] }
 0x57a   : > { %v4356_v59 = vmul.f32 %v9159_v0, %v4318_v16  ;;  %v3824_v1 = vsel %vm1946_vm6, %v3792_v30, %v3222_v23  ;;  %v10868_v13 = vld [vmem:[#allocation193_spill] sm:$0xff] }
 0x57b   : > { %v4395_v53 = vadd.f32 %v9166_v27, %v4357_v18  ;;  %v3856_v8 = vsel %vm1979_vm7, %v3824_v1, %v3324_v42  ;;  %v3764_v30 = vsel %vm1882_vm4, %v10814_v4, %v10868_v13 }
 0x57c   : > { %v4394_v46 = vadd.f32 %v9166_v27, %v4356_v59  ;;  %v3609_v10 = vpop.permute.xlu1 %3608  ;;  %v3697_v35 = vpop.permute.xlu0 %3696 }
 0x57d   : > { %v4427_v61 = vadd.f32 %v4395_v53, %v10857_v12  ;;  %v3982_v7 = vsel %vm2111_vm11, %v3950_v40, %v3697_v35  ;;  %v3951_v55 = vsel %vm2078_vm10, %v3919_v11, %v3609_v10  ;;  %v10863_v53 = vld [vmem:[#allocation153_spill] sm:$0xff] }
 0x57e   : > { %v4426_v62 = vadd.f32 %v4394_v46, %v10859_v63  ;;  %5142 = vmatprep.mubr.msk.f32.mxu1 %vm2144_vm12, %v3982_v7  ;;  %v10864_v46 = vld [vmem:[#allocation179_spill] sm:$0xff]  ;;  %v3763_v63 = vsel %vm1882_vm4, %v10803_v21, %v10865_v32 }
 0x57f   : > { %4459 = vst.msk [vmem:[%s9180_s18 + $0x28] sm:$0xff] %vm1882_vm4, %v4427_v61  ;;  %v9270_v33 = vmul.f32 %v9182_v26, %v4427_v61  ;;  %v10871_v32 = vld [vmem:[#allocation119_spill] sm:$0xff] }
 0x580   : > { %4458 = vst.msk [vmem:[%s9180_s18 + $0x20] sm:$0xff] %vm1882_vm4, %v4426_v62  ;;  %v9277_v28 = vmul.f32 %v9182_v26, %v4426_v62  ;;  %v3326_v9 = vpop.permute.xlu1 %3325  ;;  %v3425_v31 = vpop.permute.xlu0 %3424  ;;  %v10866_v62 = vld [vmem:[#allocation61_spill] sm:$0xff] }
 0x581   : > { %v3888_v60 = vsel %vm2012_vm8, %v3856_v8, %v3425_v31  ;;  %v3793_v45 = vsel %vm1914_vm5, %v3763_v63, %v10866_v62  ;;  %v10872_v62 = vld [vmem:[#allocation207_spill] sm:$0xff]  ;;  %4529 = vst.msk [vmem:[%s5572_s20 + $0x28] sm:$0xff] (!%p4958_p3), %vm1882_vm4, %v9270_v33 }
 0x582   : > { %v3825_v19 = vsel %vm1946_vm6, %v3793_v45, %v9248_v20  ;;  %v3765_v45 = vsel %vm1882_vm4, %v10816_v22, %v10872_v62  ;;  %4528 = vst.msk [vmem:[%s5572_s20 + $0x20] sm:$0xff] (!%p4958_p3), %vm1882_vm4, %v9277_v28 }
 0x583   : > { %v3857_v48 = vsel %vm1979_vm7, %v3825_v19, %v3326_v9  ;;  %v10873_v19 = vld [vmem:[#allocation197_spill] sm:$0xff] }
 0x584   : > { %v3699_v6 = vpop.permute.xlu1 %3698  ;;  %v3427_v34 = vpop.permute.xlu0 %3426 }
 0x585   : > { %v3983_v41 = vsel %vm2111_vm11, %v3951_v55, %v3699_v6  ;;  %v3889_v15 = vsel %vm2012_vm8, %v3857_v48, %v3427_v34 }
 0x586   : > { %5143 = vmatmul.mubr.msk.f32.gmra.mrb[24].mxu1 %vm2144_vm12, %v3983_v41 }
 0x588   : > { %v3521_v3 = vpop.permute.xlu1 %3520  ;;  %v3226_v37 = vpop.permute.xlu0 %3225 }
 0x589   : > { %v3920_v35 = vsel %vm2045_vm9, %v3888_v60, %v3521_v3 }
 0x58a   : > { %v5117_v52 = vpop.f32.mrb[6].mxu1 }
 0x58b   : > { %v4321_v5 = vmax.f32 %v5117_v52, 0.0  ;;  %v4185_v49 = vpop.f32.mrb[7].mxu1 }
 0x58c   : > { %v4320_v14 = vmax.f32 %v4185_v49, 0.0  ;;  %v3523_v17 = vpop.permute.xlu1 %3522  ;;  %v3611_v25 = vpop.permute.xlu0 %3610 }
 0x58d   : > { %v4359_v50 = vmul.f32 %v9159_v0, %v4321_v5  ;;  %v3952_v42 = vsel %vm2078_vm10, %v3920_v35, %v3611_v25  ;;  %v3921_v11 = vsel %vm2045_vm9, %v3889_v15, %v3523_v17 }
 0x58e   : > { %v4358_v56 = vmul.f32 %v9159_v0, %v4320_v14 }
 0x58f   : > { %v4397_v16 = vadd.f32 %v9166_v27, %v4359_v50 }
 0x590   : > { %v4396_v18 = vadd.f32 %v9166_v27, %v4358_v56  ;;  %v9295_v36 = vpop.permute.xlu1 %3227  ;;  %v3328_v59 = vpop.permute.xlu0 %3327 }
 0x591   : > { %v4429_v40 = vadd.f32 %v4397_v16, %v10863_v53  ;;  %v10869_v16 = vld [vmem:[#allocation99_spill] sm:$0xff] }
 0x592   : > { %v4428_v10 = vadd.f32 %v4396_v18, %v10864_v46  ;;  %v10870_v18 = vld [vmem:[#allocation143_spill] sm:$0xff] }
 0x593   : > { %4461 = vst.msk [vmem:[%s9180_s18 + $0x38] sm:$0xff] %vm1882_vm4, %v4429_v40  ;;  %v9305_v12 = vmul.f32 %v9182_v26, %v4429_v40  ;;  %v3794_v8 = vsel %vm1914_vm5, %v3764_v30, %v10870_v18 }
 0x594   : > { %4460 = vst.msk [vmem:[%s9180_s18 + $0x30] sm:$0xff] %vm1882_vm4, %v4428_v10  ;;  %v9310_v23 = vmul.f32 %v9182_v26, %v4428_v10  ;;  %v3613_v61 = vpop.permute.xlu1 %3612  ;;  %v3701_v7 = vpop.permute.xlu0 %3700  ;;  %v3826_v40 = vsel %vm1946_vm6, %v3794_v8, %v3226_v37  ;;  %v3766_v37 = vsel %vm1882_vm4, %v10829_v44, %v10871_v32 }
 0x595   : > { %v3984_v43 = vsel %vm2111_vm11, %v3952_v42, %v3701_v7  ;;  %v3953_v55 = vsel %vm2078_vm10, %v3921_v11, %v3613_v61  ;;  %v3858_v4 = vsel %vm1979_vm7, %v3826_v40, %v3328_v59  ;;  %v3796_v59 = vsel %vm1914_vm5, %v3766_v37, %v10873_v19  ;;  %v10879_v40 = vld [vmem:[#allocation96_spill] sm:$0xff]  ;;  %4531 = vst.msk [vmem:[%s5572_s20 + $0x38] sm:$0xff] (!%p4958_p3), %vm1882_vm4, %v9305_v12 }
 0x596   : > { %5145 = vmatprep.mubr.msk.f32.mxu1 %vm2144_vm12, %v3984_v43  ;;  %4530 = vst.msk [vmem:[%s5572_s20 + $0x30] sm:$0xff] (!%p4958_p3), %vm1882_vm4, %v9310_v23 }
 0x598   : > { %v3330_v57 = vpop.permute.xlu1 %3329  ;;  %v3429_v31 = vpop.permute.xlu0 %3428 }
 0x599   : > { %v3890_v35 = vsel %vm2012_vm8, %v3858_v4, %v3429_v31  ;;  %v10874_v31 = vld [vmem:[#allocation91_spill] sm:$0xff] }
 0x59a   : > { %v3795_v48 = vsel %vm1914_vm5, %v3765_v45, %v10874_v31 }
 0x59b   : > { %v3827_v11 = vsel %vm1946_vm6, %v3795_v48, %v9295_v36 }
 0x59c   : > { %v3703_v6 = vpop.permute.xlu1 %3702  ;;  %v3431_v21 = vpop.permute.xlu0 %3430 }
 0x59d   : > { %v3985_v41 = vsel %vm2111_vm11, %v3953_v55, %v3703_v6 }
 0x59e   : > { %v5120_v3 = vpop.f32.mrb[8].mxu1  ;;  %5146 = vmatmul.mubr.msk.f32.gmra.mrb[26].mxu1 %vm2144_vm12, %v3985_v41  ;;  %v10875_v41 = vld [vmem:[#allocation59_spill] sm:$0xff] }
 0x59f   : > { %v4323_v52 = vmax.f32 %v5120_v3, 0.0  ;;  %v4195_v20 = vpop.f32.mrb[9].mxu1  ;;  %v3767_v22 = vsel %vm1882_vm4, %v10831_v51, %v10875_v41  ;;  %v3859_v3 = vsel %vm1979_vm7, %v3827_v11, %v3330_v57  ;;  %v10878_v51 = vld [vmem:[#allocation95_spill] sm:$0xff] }
 0x5a0   : > { %v4322_v5 = vmax.f32 %v4195_v20, 0.0  ;;  %v3525_v49 = vpop.permute.xlu1 %3524  ;;  %v3230_v9 = vpop.permute.xlu0 %3229  ;;  %v10876_v20 = vld [vmem:[#allocation209_spill] sm:$0xff] }
 0x5a1   : > { %v4361_v34 = vmul.f32 %v9159_v0, %v4323_v52  ;;  %v3922_v42 = vsel %vm2045_vm9, %v3890_v35, %v3525_v49  ;;  %v3828_v15 = vsel %vm1946_vm6, %v3796_v59, %v3230_v9  ;;  %v3891_v49 = vsel %vm2012_vm8, %v3859_v3, %v3431_v21  ;;  %v10877_v9 = vld [vmem:[#allocation75_spill] sm:$0xff] }
 0x5a2   : > { %v4360_v14 = vmul.f32 %v9159_v0, %v4322_v5  ;;  %v3797_v5 = vsel %vm1914_vm5, %v3767_v22, %v10876_v20 }
 0x5a3   : > { %v4399_v17 = vadd.f32 %v9166_v27, %v4361_v34 }
 0x5a4   : > { %v4398_v25 = vadd.f32 %v9166_v27, %v4360_v14  ;;  %v3527_v50 = vpop.permute.xlu1 %3526  ;;  %v3615_v24 = vpop.permute.xlu0 %3614 }
 0x5a5   : > { %v4431_v56 = vadd.f32 %v4399_v17, %v10867_v2  ;;  %v3954_v61 = vsel %vm2078_vm10, %v3922_v42, %v3615_v24  ;;  %v3923_v14 = vsel %vm2045_vm9, %v3891_v49, %v3527_v50 }
 0x5a6   : > { %v4430_v1 = vadd.f32 %v4398_v25, %v10869_v16 }
 0x5a7   : > { %4463 = vst.msk [vmem:[%s9180_s18 + $0x48] sm:$0xff] %vm1882_vm4, %v4431_v56  ;;  %v9342_v53 = vmul.f32 %v9182_v26, %v4431_v56 }
 0x5a8   : > { %4462 = vst.msk [vmem:[%s9180_s18 + $0x40] sm:$0xff] %vm1882_vm4, %v4430_v1  ;;  %v9348_v60 = vmul.f32 %v9182_v26, %v4430_v1  ;;  %v3232_v46 = vpop.permute.xlu1 %3231  ;;  %v3332_v10 = vpop.permute.xlu0 %3331 }
 0x5a9   : > { %v3860_v44 = vsel %vm1979_vm7, %v3828_v15, %v3332_v10  ;;  %v3829_v17 = vsel %vm1946_vm6, %v3797_v5, %v3232_v46  ;;  %4533 = vst.msk [vmem:[%s5572_s20 + $0x48] sm:$0xff] (!%p4958_p3), %vm1882_vm4, %v9342_v53 }
 0x5aa   : > { %4532 = vst.msk [vmem:[%s5572_s20 + $0x40] sm:$0xff] (!%p4958_p3), %vm1882_vm4, %v9348_v60 }
 0x5ac   : > { %v3617_v7 = vpop.permute.xlu1 %3616  ;;  %v3705_v43 = vpop.permute.xlu0 %3704 }
 0x5ad   : > { %v3986_v63 = vsel %vm2111_vm11, %v3954_v61, %v3705_v43  ;;  %v3955_v2 = vsel %vm2078_vm10, %v3923_v14, %v3617_v7  ;;  %v10880_v61 = vld [vmem:[#allocation100_spill] sm:$0xff]  ;;  %v10881_v43 = vld [vmem:[#allocation26_spill] sm:$0xff] }
 0x5ae   : > { %5148 = vmatprep.mubr.msk.f32.mxu1 %vm2144_vm12, %v3986_v63 }
 0x5b0   : > { %v3334_v55 = vpop.permute.xlu1 %3333  ;;  %v3433_v6 = vpop.permute.xlu0 %3432 }
 0x5b1   : > { %v3892_v52 = vsel %vm2012_vm8, %v3860_v44, %v3433_v6  ;;  %v3861_v56 = vsel %vm1979_vm7, %v3829_v17, %v3334_v55  ;;  %v10882_v44 = vld [vmem:[#allocation82_spill] sm:$0xff]  ;;  %v10884_v17 = vld [vmem:[#allocation83_spill] sm:$0xff] }
 0x5b2   : > { %v3924_v36 = vsel %vm2045_vm9, %v3892_v52, %v10877_v9  ;;  %v5123_v34 = vpop.f32.mrb[10].mxu1  ;;  %v10883_v6 = vld [vmem:[#allocation134_spill] sm:$0xff] }
 0x5b3   : > { %v4325_v25 = vmax.f32 %v5123_v34, 0.0  ;;  %v4205_v24 = vpop.f32.mrb[11].mxu1  ;;  %v3956_v57 = vsel %vm2078_vm10, %v3924_v36, %v10878_v51 }
 0x5b4   : > { %v4324_v13 = vmax.f32 %v4205_v24, 0.0  ;;  %v3707_v30 = vpop.permute.xlu1 %3706  ;;  %v3435_v21 = vpop.permute.xlu0 %3434  ;;  %v3988_v46 = vsel %vm2111_vm11, %v3956_v57, %v10879_v40  ;;  %v10885_v24 = vld [vmem:[#allocation103_spill] sm:$0xff] }
 0x5b5   : > { %v4363_v16 = vmul.f32 %v9159_v0, %v4325_v25  ;;  %v3987_v1 = vsel %vm2111_vm11, %v3955_v2, %v3707_v30  ;;  %v3893_v50 = vsel %vm2012_vm8, %v3861_v56, %v3435_v21 }
 0x5b6   : > { %v4362_v18 = vmul.f32 %v9159_v0, %v4324_v13  ;;  %v3925_v8 = vsel %vm2045_vm9, %v3893_v50, %v10877_v9  ;;  %5149 = vmatmul.mubr.msk.f32.gmra.mrb[28].mxu1 %vm2144_vm12, %v3987_v1 }
 0x5b7   : > { %v4401_v10 = vadd.f32 %v9166_v27, %v4363_v16  ;;  %5151 = vmatprep.mubr.msk.f32.mxu1 %vm2144_vm12, %v3988_v46  ;;  %v3957_v4 = vsel %vm2078_vm10, %v3925_v8, %v10878_v51  ;;  %v10886_v8 = vld [vmem:[#allocation137_spill] sm:$0xff] }
 0x5b8   : > { %v4400_v35 = vadd.f32 %v9166_v27, %v4362_v18  ;;  %v3989_v42 = vsel %vm2111_vm11, %v3957_v4, %v10879_v40  ;;  %v10887_v46 = vld [vmem:[#allocation133_spill] sm:$0xff] }
 0x5b9   : > { %v4433_v7 = vadd.f32 %v4401_v10, %v10880_v61 }
 0x5ba   : > { %v4432_v32 = vadd.f32 %v4400_v35, %v10881_v43  ;;  %5152 = vmatmul.mubr.msk.f32.gmra.mrb[30].mxu1 %vm2144_vm12, %v3989_v42 }
 0x5bb   : > { %4465 = vst.msk [vmem:[%s9180_s18 + $0x58] sm:$0xff] %vm1882_vm4, %v4433_v7  ;;  %v9408_v37 = vmul.f32 %v9182_v26, %v4433_v7 }
 0x5bc   : > { %4464 = vst.msk [vmem:[%s9180_s18 + $0x50] sm:$0xff] %vm1882_vm4, %v4432_v32  ;;  %v9413_v63 = vmul.f32 %v9182_v26, %v4432_v32 }
 0x5bd   : > { %4535 = vst.msk [vmem:[%s5572_s20 + $0x58] sm:$0xff] (!%p4958_p3), %vm1882_vm4, %v9408_v37 }
 0x5be   : > { %4534 = vst.msk [vmem:[%s5572_s20 + $0x50] sm:$0xff] (!%p4958_p3), %vm1882_vm4, %v9413_v63 }
 0x5ca   : > { %v5126_v62 = vpop.f32.mrb[12].mxu1 }
 0x5cb   : > { %v4327_v45 = vmax.f32 %v5126_v62, 0.0  ;;  %v4215_v19 = vpop.f32.mrb[13].mxu1 }
 0x5cc   : > { %v4326_v59 = vmax.f32 %v4215_v19, 0.0 }
 0x5cd   : > { %v4365_v31 = vmul.f32 %v9159_v0, %v4327_v45 }
 0x5ce   : > { %v4364_v48 = vmul.f32 %v9159_v0, %v4326_v59  ;;  %v10888_v59 = vld [vmem:[#allocation138_spill] sm:$0xff] }
 0x5cf   : > { %v4403_v15 = vadd.f32 %v9166_v27, %v4365_v31 }
 0x5d0   : > { %v4402_v11 = vadd.f32 %v9166_v27, %v4364_v48  ;;  %v10889_v48 = vld [vmem:[#allocation139_spill] sm:$0xff] }
 0x5d1   : > { %v4435_v55 = vadd.f32 %v4403_v15, %v10882_v44 }
 0x5d2   : > { %v4434_v41 = vadd.f32 %v4402_v11, %v10883_v6 }
 0x5d3   : > { %4467 = vst.msk [vmem:[%s9180_s18 + $0x68] sm:$0xff] %vm1882_vm4, %v4435_v55  ;;  %v9424_v22 = vmul.f32 %v9182_v26, %v4435_v55 }
 0x5d4   : > { %4466 = vst.msk [vmem:[%s9180_s18 + $0x60] sm:$0xff] %vm1882_vm4, %v4434_v41  ;;  %v9429_v3 = vmul.f32 %v9182_v26, %v4434_v41 }
 0x5d5   : > { %4537 = vst.msk [vmem:[%s5572_s20 + $0x68] sm:$0xff] (!%p4958_p3), %vm1882_vm4, %v9424_v22 }
 0x5d6   : > { %4536 = vst.msk [vmem:[%s5572_s20 + $0x60] sm:$0xff] (!%p4958_p3), %vm1882_vm4, %v9429_v3 }
 0x5e2   : > { %v5129_v52 = vpop.f32.mrb[14].mxu1 }
 0x5e3   : > { %v4329_v20 = vmax.f32 %v5129_v52, 0.0  ;;  %v4225_v5 = vpop.f32.mrb[15].mxu1 }
 0x5e4   : > { %v4328_v49 = vmax.f32 %v4225_v5, 0.0 }
 0x5e5   : > { %v4367_v9 = vmul.f32 %v9159_v0, %v4329_v20 }
 0x5e6   : > { %v4366_v36 = vmul.f32 %v9159_v0, %v4328_v49 }
 0x5e7   : > { %v4405_v34 = vadd.f32 %v9166_v27, %v4367_v9 }
 0x5e8   : > { %v4404_v14 = vadd.f32 %v9166_v27, %v4366_v36  ;;  %v10890_v36 = vld [vmem:[#allocation158_spill] sm:$0xff] }
 0x5e9   : > { %v4437_v25 = vadd.f32 %v4405_v34, %v10884_v17 }
 0x5ea   : > { %v4436_v51 = vadd.f32 %v4404_v14, %v10885_v24  ;;  %v10891_v14 = vld [vmem:[#allocation181_spill] sm:$0xff] }
 0x5eb   : > { %4469 = vst.msk [vmem:[%s9180_s18 + $0x78] sm:$0xff] %vm1882_vm4, %v4437_v25  ;;  %v9440_v57 = vmul.f32 %v9182_v26, %v4437_v25 }
 0x5ec   : > { %4468 = vst.msk [vmem:[%s9180_s18 + $0x70] sm:$0xff] %vm1882_vm4, %v4436_v51  ;;  %v9445_v2 = vmul.f32 %v9182_v26, %v4436_v51 }
 0x5ed   : > { %4539 = vst.msk [vmem:[%s5572_s20 + $0x78] sm:$0xff] (!%p4958_p3), %vm1882_vm4, %v9440_v57 }
 0x5ee   : > { %4538 = vst.msk [vmem:[%s5572_s20 + $0x70] sm:$0xff] (!%p4958_p3), %vm1882_vm4, %v9445_v2 }
 0x5fa   : > { %v5132_v56 = vpop.f32.mrb[16].mxu1 }
 0x5fb   : > { %v4331_v13 = vmax.f32 %v5132_v56, 0.0  ;;  %v4235_v30 = vpop.f32.mrb[17].mxu1 }
 0x5fc   : > { %v4330_v21 = vmax.f32 %v4235_v30, 0.0 }
 0x5fd   : > { %v4369_v16 = vmul.f32 %v9159_v0, %v4331_v13 }
 0x5fe   : > { %v4368_v1 = vmul.f32 %v9159_v0, %v4330_v21 }
 0x5ff   : > { %v4407_v50 = vadd.f32 %v9166_v27, %v4369_v16 }
 0x600   : > { %v4406_v18 = vadd.f32 %v9166_v27, %v4368_v1 }
 0x601   : > { %v4439_v40 = vadd.f32 %v4407_v50, %v10886_v8 }
 0x602   : > { %v4438_v10 = vadd.f32 %v4406_v18, %v10887_v46  ;;  %v10892_v18 = vld [vmem:[#allocation182_spill] sm:$0xff] }
 0x603   : > { %4471 = vst.msk [vmem:[%s9180_s18 + $0x88] sm:$0xff] %vm1882_vm4, %v4439_v40  ;;  %v9456_v4 = vmul.f32 %v9182_v26, %v4439_v40  ;;  %v10893_v40 = vld [vmem:[#allocation140_spill] sm:$0xff] }
 0x604   : > { %4470 = vst.msk [vmem:[%s9180_s18 + $0x80] sm:$0xff] %vm1882_vm4, %v4438_v10  ;;  %v9461_v35 = vmul.f32 %v9182_v26, %v4438_v10 }
 0x605   : > { %4541 = vst.msk [vmem:[%s5572_s20 + $0x88] sm:$0xff] (!%p4958_p3), %vm1882_vm4, %v9456_v4 }
 0x606   : > { %4540 = vst.msk [vmem:[%s5572_s20 + $0x80] sm:$0xff] (!%p4958_p3), %vm1882_vm4, %v9461_v35 }
 0x612   : > { %v5135_v42 = vpop.f32.mrb[18].mxu1 }
 0x613   : > { %v4333_v61 = vmax.f32 %v5135_v42, 0.0  ;;  %v4245_v7 = vpop.f32.mrb[19].mxu1 }
 0x614   : > { %v4332_v43 = vmax.f32 %v4245_v7, 0.0 }
 0x615   : > { %v4371_v32 = vmul.f32 %v9159_v0, %v4333_v61 }
 0x616   : > { %v4370_v62 = vmul.f32 %v9159_v0, %v4332_v43 }
 0x617   : > { %v4409_v45 = vadd.f32 %v9166_v27, %v4371_v32 }
 0x618   : > { %v4408_v19 = vadd.f32 %v9166_v27, %v4370_v62 }
 0x619   : > { %v4441_v31 = vadd.f32 %v4409_v45, %v10888_v59 }
 0x61a   : > { %v4440_v15 = vadd.f32 %v4408_v19, %v10889_v48 }
 0x61b   : > { %4473 = vst.msk [vmem:[%s9180_s18 + $0x98] sm:$0xff] %vm1882_vm4, %v4441_v31  ;;  %v9472_v11 = vmul.f32 %v9182_v26, %v4441_v31  ;;  %v10894_v31 = vld [vmem:[#allocation162_spill] sm:$0xff] }
 0x61c   : > { %4472 = vst.msk [vmem:[%s9180_s18 + $0x90] sm:$0xff] %vm1882_vm4, %v4440_v15  ;;  %v9477_v44 = vmul.f32 %v9182_v26, %v4440_v15  ;;  %v10895_v15 = vld [vmem:[#allocation183_spill] sm:$0xff] }
 0x61d   : > { %4543 = vst.msk [vmem:[%s5572_s20 + $0x98] sm:$0xff] (!%p4958_p3), %vm1882_vm4, %v9472_v11 }
 0x61e   : > { %4542 = vst.msk [vmem:[%s5572_s20 + $0x90] sm:$0xff] (!%p4958_p3), %vm1882_vm4, %v9477_v44 }
 0x629   : > { %v5138_v55 = vpop.f32.mrb[20].mxu1 }
 0x62a   : > { %v4335_v6 = vmax.f32 %v5138_v55, 0.0  ;;  %v4255_v41 = vpop.f32.mrb[21].mxu1 }
 0x62b   : > { %v4334_v52 = vmax.f32 %v4255_v41, 0.0 }
 0x62c   : > { %v4373_v20 = vmul.f32 %v9159_v0, %v4335_v6 }
 0x62d   : > { %v4372_v5 = vmul.f32 %v9159_v0, %v4334_v52 }
 0x62e   : > { %v4411_v49 = vadd.f32 %v9166_v27, %v4373_v20 }
 0x62f   : > { %v4410_v9 = vadd.f32 %v9166_v27, %v4372_v5 }
 0x630   : > { %v4443_v34 = vadd.f32 %v4411_v49, %v10890_v36 }
 0x631   : > { %v4442_v17 = vadd.f32 %v4410_v9, %v10891_v14 }
 0x632   : > { %4475 = vst.msk [vmem:[%s9180_s18 + $0xa8] sm:$0xff] %vm1882_vm4, %v4443_v34  ;;  %v9488_v25 = vmul.f32 %v9182_v26, %v4443_v34 }
 0x633   : > { %4474 = vst.msk [vmem:[%s9180_s18 + $0xa0] sm:$0xff] %vm1882_vm4, %v4442_v17  ;;  %v9493_v24 = vmul.f32 %v9182_v26, %v4442_v17  ;;  %v10896_v17 = vld [vmem:[#allocation33_spill] sm:$0xff] }
 0x634   : > { %4545 = vst.msk [vmem:[%s5572_s20 + $0xa8] sm:$0xff] (!%p4958_p3), %vm1882_vm4, %v9488_v25 }
 0x635   : > { %4544 = vst.msk [vmem:[%s5572_s20 + $0xa0] sm:$0xff] (!%p4958_p3), %vm1882_vm4, %v9493_v24 }
 0x641   : > { %v5141_v51 = vpop.f32.mrb[22].mxu1 }
 0x642   : > { %v4337_v56 = vmax.f32 %v5141_v51, 0.0  ;;  %v4265_v13 = vpop.f32.mrb[23].mxu1 }
 0x643   : > { %v4336_v30 = vmax.f32 %v4265_v13, 0.0 }
 0x644   : > { %v4375_v21 = vmul.f32 %v9159_v0, %v4337_v56  ;;  %v10897_v56 = vld [vmem:[#allocation110_spill] sm:$0xff] }
 0x645   : > { %v4374_v16 = vmul.f32 %v9159_v0, %v4336_v30 }
 0x646   : > { %v4413_v1 = vadd.f32 %v9166_v27, %v4375_v21 }
 0x647   : > { %v4412_v50 = vadd.f32 %v9166_v27, %v4374_v16 }
 0x648   : > { %v4445_v8 = vadd.f32 %v4413_v1, %v10892_v18 }
 0x649   : > { %v4444_v46 = vadd.f32 %v4412_v50, %v10893_v40 }
 0x64a   : > { %4477 = vst.msk [vmem:[%s9180_s18 + $0xb8] sm:$0xff] %vm1882_vm4, %v4445_v8  ;;  %v9504_v10 = vmul.f32 %v9182_v26, %v4445_v8 }
 0x64b   : > { %4476 = vst.msk [vmem:[%s9180_s18 + $0xb0] sm:$0xff] %vm1882_vm4, %v4444_v46  ;;  %v9509_v42 = vmul.f32 %v9182_v26, %v4444_v46 }
 0x64c   : > { %4547 = vst.msk [vmem:[%s5572_s20 + $0xb8] sm:$0xff] (!%p4958_p3), %vm1882_vm4, %v9504_v10 }
 0x64d   : > { %4546 = vst.msk [vmem:[%s5572_s20 + $0xb0] sm:$0xff] (!%p4958_p3), %vm1882_vm4, %v9509_v42 }
 0x659   : > { %v5144_v61 = vpop.f32.mrb[24].mxu1 }
 0x65a   : > { %v4339_v7 = vmax.f32 %v5144_v61, 0.0  ;;  %v4275_v43 = vpop.f32.mrb[25].mxu1 }
 0x65b   : > { %v4338_v32 = vmax.f32 %v4275_v43, 0.0 }
 0x65c   : > { %v4377_v62 = vmul.f32 %v9159_v0, %v4339_v7 }
 0x65d   : > { %v4376_v45 = vmul.f32 %v9159_v0, %v4338_v32 }
 0x65e   : > { %v4415_v19 = vadd.f32 %v9166_v27, %v4377_v62 }
 0x65f   : > { %v4414_v59 = vadd.f32 %v9166_v27, %v4376_v45  ;;  %v10898_v45 = vld [vmem:[#allocation185_spill] sm:$0xff] }
 0x660   : > { %v4447_v48 = vadd.f32 %v4415_v19, %v10894_v31  ;;  %v10899_v31 = vld [vmem:[#allocation111_spill] sm:$0xff] }
 0x661   : > { %v4446_v55 = vadd.f32 %v4414_v59, %v10895_v15 }
 0x662   : > { %4479 = vst.msk [vmem:[%s9180_s18 + $0xc8] sm:$0xff] %vm1882_vm4, %v4447_v48  ;;  %v9520_v6 = vmul.f32 %v9182_v26, %v4447_v48 }
 0x663   : > { %4478 = vst.msk [vmem:[%s9180_s18 + $0xc0] sm:$0xff] %vm1882_vm4, %v4446_v55  ;;  %v9525_v41 = vmul.f32 %v9182_v26, %v4446_v55 }
 0x664   : > { %4549 = vst.msk [vmem:[%s5572_s20 + $0xc8] sm:$0xff] (!%p4958_p3), %vm1882_vm4, %v9520_v6 }
 0x665   : > { %4548 = vst.msk [vmem:[%s5572_s20 + $0xc0] sm:$0xff] (!%p4958_p3), %vm1882_vm4, %v9525_v41 }
 0x671   : > { %v5147_v52 = vpop.f32.mrb[26].mxu1 }
 0x672   : > { %v4341_v20 = vmax.f32 %v5147_v52, 0.0  ;;  %v4285_v5 = vpop.f32.mrb[27].mxu1 }
 0x673   : > { %v4340_v49 = vmax.f32 %v4285_v5, 0.0 }
 0x674   : > { %v4379_v9 = vmul.f32 %v9159_v0, %v4341_v20 }
 0x675   : > { %v4378_v36 = vmul.f32 %v9159_v0, %v4340_v49 }
 0x676   : > { %v4417_v34 = vadd.f32 %v9166_v27, %v4379_v9 }
 0x677   : > { %v4416_v14 = vadd.f32 %v9166_v27, %v4378_v36 }
 0x678   : > { %v4449_v51 = vadd.f32 %v4417_v34, %v10896_v17 }
 0x679   : > { %v4448_v13 = vadd.f32 %v4416_v14, %v10897_v56 }
 0x67a   : > { %4481 = vst.msk [vmem:[%s9180_s18 + $0xd8] sm:$0xff] %vm1882_vm4, %v4449_v51  ;;  %v9536_v30 = vmul.f32 %v9182_v26, %v4449_v51 }
 0x67b   : > { %4480 = vst.msk [vmem:[%s9180_s18 + $0xd0] sm:$0xff] %vm1882_vm4, %v4448_v13  ;;  %v9541_v21 = vmul.f32 %v9182_v26, %v4448_v13 }
 0x67c   : > { %4551 = vst.msk [vmem:[%s5572_s20 + $0xd8] sm:$0xff] (!%p4958_p3), %vm1882_vm4, %v9536_v30 }
 0x67d   : > { %4550 = vst.msk [vmem:[%s5572_s20 + $0xd0] sm:$0xff] (!%p4958_p3), %vm1882_vm4, %v9541_v21 }
 0x689   : > { %v5150_v16 = vpop.f32.mrb[28].mxu1 }
 0x68a   : > { %v4343_v1 = vmax.f32 %v5150_v16, 0.0  ;;  %v4295_v50 = vpop.f32.mrb[29].mxu1 }
 0x68b   : > { %v4342_v18 = vmax.f32 %v4295_v50, 0.0 }
 0x68c   : > { %v4381_v8 = vmul.f32 %v9159_v0, %v4343_v1 }
 0x68d   : > { %v4380_v40 = vmul.f32 %v9159_v0, %v4342_v18  ;;  %v5153_v46 = vpop.f32.mrb[30].mxu1 }
 0x68e   : > { %v4419_v61 = vadd.f32 %v9166_v27, %v4381_v8  ;;  %v4345_v7 = vmax.f32 %v5153_v46, 0.0  ;;  %v4305_v43 = vpop.f32.mrb[31].mxu1 }
 0x68f   : > { %v4418_v32 = vadd.f32 %v9166_v27, %v4380_v40  ;;  %v4344_v62 = vmax.f32 %v4305_v43, 0.0 }
 0x690   : > { %v4451_v19 = vadd.f32 %v4419_v61, %v10898_v45  ;;  %v4383_v59 = vmul.f32 %v9159_v0, %v4345_v7 }
 0x691   : > { %v4450_v48 = vadd.f32 %v4418_v32, %v10899_v31  ;;  %v4382_v15 = vmul.f32 %v9159_v0, %v4344_v62  ;;  %4523 = sbr.rel (%p4958_p3) target bundleno = 1690 (0x69a), region = 68 }
 0x692   : > { %4483 = vst.msk [vmem:[%s9180_s18 + $0xe8] sm:$0xff] %vm1882_vm4, %v4451_v19  ;;  %v9554_v55 = vmul.f32 %v9182_v26, %v4451_v19  ;;  %v4421_v52 = vadd.f32 %v9166_v27, %v4383_v59 }
 0x693   : > { %4482 = vst.msk [vmem:[%s9180_s18 + $0xe0] sm:$0xff] %vm1882_vm4, %v4450_v48  ;;  %v9560_v20 = vmul.f32 %v9182_v26, %v4450_v48  ;;  %v4420_v5 = vadd.f32 %v9166_v27, %v4382_v15 }
 0x694   : > { %v4453_v49 = vadd.f32 %v4421_v52, %v9025_v29  ;;  %4553 = vst.msk [vmem:[%s5572_s20 + $0xe8] sm:$0xff] (!%p4958_p3), %vm1882_vm4, %v9554_v55 }
 0x695   : > { %v4452_v9 = vadd.f32 %v4420_v5, %v9028_v54  ;;  %4552 = vst.msk [vmem:[%s5572_s20 + $0xe0] sm:$0xff] (!%p4958_p3), %vm1882_vm4, %v9560_v20 }
 0x696   : > { %4485 = vst.msk [vmem:[%s9180_s18 + $0xf8] sm:$0xff] %vm1882_vm4, %v4453_v49  ;;  %v9568_v0 = vmul.f32 %v9182_v26, %v4453_v49 }
 0x697   : > { %4484 = vst.msk [vmem:[%s9180_s18 + $0xf0] sm:$0xff] %vm1882_vm4, %v4452_v9  ;;  %v9573_v36 = vmul.f32 %v9182_v26, %v4452_v9 }
 0x698   : > { %4555 = vst.msk [vmem:[%s5572_s20 + $0xf8] sm:$0xff] %vm1882_vm4, %v9568_v0 }
 0x699   : > { %4554 = vst.msk [vmem:[%s5572_s20 + $0xf0] sm:$0xff] %vm1882_vm4, %v9573_v36 }
 0x69a PF: > { %p4959_p5 = scmp.le.s32.totalorder %s5402_s19, 0 }
 0x69b   : > { %v4560_v29 = vld [vmem:[%s5572_s20] sm:$0xff] (!%p4959_p5)  ;;  %v4561_v54 = vld [vmem:[%s5572_s20 + $0x8] sm:$0xff] (!%p4959_p5)  ;;  %v4562_v27 = vld [vmem:[%s5572_s20 + $0x10] sm:$0xff] (!%p4959_p5) }
 0x69c   : > { %4559 = sbr.rel (%p4959_p5) target bundleno = 1710 (0x6ae), region = 72  ;;  %v4592_v26 = vadd.f32 (!%p4959_p5), %v4560_v29, %v9197_v47  ;;  %v4593_v34 = vadd.f32 (!%p4959_p5), %v4561_v54, %v9192_v58  ;;  %v4594_v14 = vadd.f32 (!%p4959_p5), %v4562_v27, %v9237_v38  ;;  %v4563_v17 = vld [vmem:[%s5572_s20 + $0x18] sm:$0xff] (!%p4959_p5)  ;;  %v4564_v51 = vld [vmem:[%s5572_s20 + $0x20] sm:$0xff] (!%p4959_p5)  ;;  %v4565_v56 = vld [vmem:[%s5572_s20 + $0x28] sm:$0xff] (!%p4959_p5) }
 0x69d   : > { %v4595_v13 = vadd.f32 (!%p4959_p5), %v4563_v17, %v9232_v39  ;;  %v4596_v16 = vadd.f32 (!%p4959_p5), %v4564_v51, %v9277_v28  ;;  %v4597_v1 = vadd.f32 (!%p4959_p5), %v4565_v56, %v9270_v33  ;;  %v4566_v47 = vld [vmem:[%s5572_s20 + $0x30] sm:$0xff] (!%p4959_p5)  ;;  %v4567_v50 = vld [vmem:[%s5572_s20 + $0x38] sm:$0xff] (!%p4959_p5)  ;;  %v4568_v58 = vld [vmem:[%s5572_s20 + $0x40] sm:$0xff] (!%p4959_p5) }
 0x69e   : > { %4624 = vst.msk [vmem:[%s5572_s20] sm:$0xff] (!%p4959_p5), %vm1882_vm4, %v4592_v26  ;;  %4625 = vst.msk [vmem:[%s5572_s20 + $0x8] sm:$0xff] (!%p4959_p5), %vm1882_vm4, %v4593_v34  ;;  %v4598_v39 = vadd.f32 (!%p4959_p5), %v4566_v47, %v9310_v23  ;;  %v4599_v38 = vadd.f32 (!%p4959_p5), %v4567_v50, %v9305_v12  ;;  %v4600_v33 = vadd.f32 (!%p4959_p5), %v4568_v58, %v9348_v60  ;;  %v4569_v28 = vld [vmem:[%s5572_s20 + $0x48] sm:$0xff] (!%p4959_p5)  ;;  %v4570_v18 = vld [vmem:[%s5572_s20 + $0x50] sm:$0xff] (!%p4959_p5) }
 0x69f   : > { %4626 = vst.msk [vmem:[%s5572_s20 + $0x10] sm:$0xff] (!%p4959_p5), %vm1882_vm4, %v4594_v14  ;;  %v4571_v8 = vld [vmem:[%s5572_s20 + $0x58] sm:$0xff] (!%p4959_p5)  ;;  %4627 = vst.msk [vmem:[%s5572_s20 + $0x18] sm:$0xff] (!%p4959_p5), %vm1882_vm4, %v4595_v13  ;;  %v4601_v23 = vadd.f32 (!%p4959_p5), %v4569_v28, %v9342_v53  ;;  %v4602_v12 = vadd.f32 (!%p4959_p5), %v4570_v18, %v9413_v63  ;;  %v4572_v40 = vld [vmem:[%s5572_s20 + $0x60] sm:$0xff] (!%p4959_p5) }
 0x6a0   : > { %4628 = vst.msk [vmem:[%s5572_s20 + $0x20] sm:$0xff] (!%p4959_p5), %vm1882_vm4, %v4596_v16  ;;  %4629 = vst.msk [vmem:[%s5572_s20 + $0x28] sm:$0xff] (!%p4959_p5), %vm1882_vm4, %v4597_v1  ;;  %v4603_v60 = vadd.f32 (!%p4959_p5), %v4571_v8, %v9408_v37  ;;  %v4573_v46 = vld [vmem:[%s5572_s20 + $0x68] sm:$0xff] (!%p4959_p5)  ;;  %v4574_v61 = vld [vmem:[%s5572_s20 + $0x70] sm:$0xff] (!%p4959_p5)  ;;  %v4604_v53 = vadd.f32 (!%p4959_p5), %v4572_v40, %v9429_v3 }
 0x6a1   : > { %4630 = vst.msk [vmem:[%s5572_s20 + $0x30] sm:$0xff] (!%p4959_p5), %vm1882_vm4, %v4598_v39  ;;  %4631 = vst.msk [vmem:[%s5572_s20 + $0x38] sm:$0xff] (!%p4959_p5), %vm1882_vm4, %v4599_v38  ;;  %v4605_v63 = vadd.f32 (!%p4959_p5), %v4573_v46, %v9424_v22  ;;  %v4606_v37 = vadd.f32 (!%p4959_p5), %v4574_v61, %v9445_v2  ;;  %v4575_v7 = vld [vmem:[%s5572_s20 + $0x78] sm:$0xff] (!%p4959_p5)  ;;  %v4576_v43 = vld [vmem:[%s5572_s20 + $0x80] sm:$0xff] (!%p4959_p5) }
 0x6a2   : > { %4632 = vst.msk [vmem:[%s5572_s20 + $0x40] sm:$0xff] (!%p4959_p5), %vm1882_vm4, %v4600_v33  ;;  %v4577_v32 = vld [vmem:[%s5572_s20 + $0x88] sm:$0xff] (!%p4959_p5)  ;;  %4633 = vst.msk [vmem:[%s5572_s20 + $0x48] sm:$0xff] (!%p4959_p5), %vm1882_vm4, %v4601_v23  ;;  %v4607_v3 = vadd.f32 (!%p4959_p5), %v4575_v7, %v9440_v57  ;;  %v4608_v22 = vadd.f32 (!%p4959_p5), %v4576_v43, %v9461_v35  ;;  %v4578_v62 = vld [vmem:[%s5572_s20 + $0x90] sm:$0xff] (!%p4959_p5) }
 0x6a3   : > { %4634 = vst.msk [vmem:[%s5572_s20 + $0x50] sm:$0xff] %vm1882_vm4, %v4602_v12  ;;  %4635 = vst.msk [vmem:[%s5572_s20 + $0x58] sm:$0xff] %vm1882_vm4, %v4603_v60  ;;  %v4609_v2 = vadd.f32 %v4577_v32, %v9456_v4  ;;  %v4579_v45 = vld [vmem:[%s5572_s20 + $0x98] sm:$0xff]  ;;  %v4580_v19 = vld [vmem:[%s5572_s20 + $0xa0] sm:$0xff]  ;;  %v4610_v57 = vadd.f32 %v4578_v62, %v9477_v44 }
 0x6a4   : > { %4636 = vst.msk [vmem:[%s5572_s20 + $0x60] sm:$0xff] %vm1882_vm4, %v4604_v53  ;;  %4637 = vst.msk [vmem:[%s5572_s20 + $0x68] sm:$0xff] %vm1882_vm4, %v4605_v63  ;;  %v4611_v35 = vadd.f32 %v4579_v45, %v9472_v11  ;;  %v4612_v4 = vadd.f32 %v4580_v19, %v9493_v24  ;;  %v4581_v59 = vld [vmem:[%s5572_s20 + $0xa8] sm:$0xff]  ;;  %v4582_v31 = vld [vmem:[%s5572_s20 + $0xb0] sm:$0xff] }
 0x6a5   : > { %4638 = vst.msk [vmem:[%s5572_s20 + $0x70] sm:$0xff] %vm1882_vm4, %v4606_v37  ;;  %v4583_v48 = vld [vmem:[%s5572_s20 + $0xb8] sm:$0xff]  ;;  %4639 = vst.msk [vmem:[%s5572_s20 + $0x78] sm:$0xff] %vm1882_vm4, %v4607_v3  ;;  %v4613_v44 = vadd.f32 %v4581_v59, %v9488_v25  ;;  %v4614_v11 = vadd.f32 %v4582_v31, %v9509_v42  ;;  %v4584_v15 = vld [vmem:[%s5572_s20 + $0xc0] sm:$0xff] }
 0x6a6   : > { %4640 = vst.msk [vmem:[%s5572_s20 + $0x80] sm:$0xff] %vm1882_vm4, %v4608_v22  ;;  %4641 = vst.msk [vmem:[%s5572_s20 + $0x88] sm:$0xff] %vm1882_vm4, %v4609_v2  ;;  %v4615_v24 = vadd.f32 %v4583_v48, %v9504_v10  ;;  %v4585_v52 = vld [vmem:[%s5572_s20 + $0xc8] sm:$0xff]  ;;  %v4586_v5 = vld [vmem:[%s5572_s20 + $0xd0] sm:$0xff]  ;;  %v4616_v25 = vadd.f32 %v4584_v15, %v9525_v41 }
 0x6a7   : > { %4642 = vst.msk [vmem:[%s5572_s20 + $0x90] sm:$0xff] %vm1882_vm4, %v4610_v57  ;;  %4643 = vst.msk [vmem:[%s5572_s20 + $0x98] sm:$0xff] %vm1882_vm4, %v4611_v35  ;;  %v4617_v42 = vadd.f32 %v4585_v52, %v9520_v6  ;;  %v4618_v10 = vadd.f32 %v4586_v5, %v9541_v21  ;;  %v4587_v49 = vld [vmem:[%s5572_s20 + $0xd8] sm:$0xff]  ;;  %v4588_v9 = vld [vmem:[%s5572_s20 + $0xe0] sm:$0xff] }
 0x6a8   : > { %4644 = vst.msk [vmem:[%s5572_s20 + $0xa0] sm:$0xff] %vm1882_vm4, %v4612_v4  ;;  %v4589_v29 = vld [vmem:[%s5572_s20 + $0xe8] sm:$0xff]  ;;  %4645 = vst.msk [vmem:[%s5572_s20 + $0xa8] sm:$0xff] %vm1882_vm4, %v4613_v44  ;;  %v4619_v41 = vadd.f32 %v4587_v49, %v9536_v30  ;;  %v4620_v6 = vadd.f32 %v4588_v9, %v9560_v20  ;;  %v4590_v54 = vld [vmem:[%s5572_s20 + $0xf0] sm:$0xff] }
 0x6a9   : > { %4646 = vst.msk [vmem:[%s5572_s20 + $0xb0] sm:$0xff] %vm1882_vm4, %v4614_v11  ;;  %4647 = vst.msk [vmem:[%s5572_s20 + $0xb8] sm:$0xff] %vm1882_vm4, %v4615_v24  ;;  %v4621_v21 = vadd.f32 %v4589_v29, %v9554_v55  ;;  %v4591_v27 = vld [vmem:[%s5572_s20 + $0xf8] sm:$0xff]  ;;  %v4622_v26 = vadd.f32 %v4590_v54, %v9573_v36 }
 0x6aa   : > { %4648 = vst.msk [vmem:[%s5572_s20 + $0xc0] sm:$0xff] %vm1882_vm4, %v4616_v25  ;;  %4649 = vst.msk [vmem:[%s5572_s20 + $0xc8] sm:$0xff] %vm1882_vm4, %v4617_v42  ;;  %v4623_v34 = vadd.f32 %v4591_v27, %v9568_v0 }
 0x6ab   : > { %4650 = vst.msk [vmem:[%s5572_s20 + $0xd0] sm:$0xff] %vm1882_vm4, %v4618_v10  ;;  %4651 = vst.msk [vmem:[%s5572_s20 + $0xd8] sm:$0xff] %vm1882_vm4, %v4619_v41 }
 0x6ac   : > { %4652 = vst.msk [vmem:[%s5572_s20 + $0xe0] sm:$0xff] %vm1882_vm4, %v4620_v6  ;;  %4653 = vst.msk [vmem:[%s5572_s20 + $0xe8] sm:$0xff] %vm1882_vm4, %v4621_v21 }
 0x6ad   : > { %4654 = vst.msk [vmem:[%s5572_s20 + $0xf0] sm:$0xff] %vm1882_vm4, %v4622_v26  ;;  %4655 = vst.msk [vmem:[%s5572_s20 + $0xf8] sm:$0xff] %vm1882_vm4, %v4623_v34 }
 0x6ae PF: > { %s24_s23 = sadd.s32 1, %s5418_s23   ;;  %s10900_s19 = smov %s5410_s21 }
 0x6af   : > { %p21_p6 = scmp.ge.s32.totalorder %s24_s23, 6   ;;  %s10901_s20 = smov %s5414_s22 }
 0x6b0   : > { %s10902_s21 = smov %s10905_s24  ;;  %s10903_s22 = smov %s10909_s25 }
 0x6b1   :  { %23 = sbr.rel (!%p21_p6) target bundleno = 5 (0x5), region = 136 }
 0x6b8   :  { %4701 = vsyncpa [#allocation4], 1 }
 0x6b9   :  { %4703 = vsyncpa [#allocation4 + $0x1], 1 }

</bundles_post_ra>
